<compile_context>
chip_gen: v7x
topology: tpu7x:2x2x1
jax: 0.10.0
libtpu: 0.0.40
codegen_flags: <defaults>
</compile_context>

<pallas_src>
import functools

import jax
import jax.numpy as jnp
import numpy as np
from jax.experimental import pallas as pl
from jax.experimental.pallas import tpu as pltpu

# ---------------- example hyper-parameters -----------------------------------
BATCH = 512         # example batch (2 batch tiles of TB=256)
INPUT_DIM = 64      # input feature dim (padded to 128 internally)
LATENT_DIM = 50     # module default latent_dim=50 (padded to 128 internally)
H1 = 512            # fixed by the module
H2 = 128            # fixed by the module
TB = 256            # batch tile: >=256 fills the v6e/v7x MXU, >=128 for v5e


def _round_up(x, m):
    return ((x + m - 1) // m) * m


# ---------------- kernel ------------------------------------------------------
def autoencoder_kernel(
    x_ref,                      # (TB, IN_PAD)       f32
    w1_ref, b1_ref,             # (IN_PAD, 512) bf16, (1, 512)  f32
    w2_ref, b2_ref,             # (512, 128)    bf16, (1, 128)  f32
    w3_ref, b3_ref,             # (128, LAT_PAD)bf16, (1, LAT_PAD) f32
    w4_ref, b4_ref,             # (LAT_PAD, 128)bf16, (1, 128)  f32
    w5_ref, b5_ref,             # (128, 512)    bf16, (1, 512)  f32
    w6_ref, b6_ref,             # (512, IN_PAD) bf16, (1, IN_PAD) f32
    xrec_ref, z_ref,
):
    def lin(h, w_ref, b_ref):
        # bf16 MXU matmul, f32 accumulation, f32 bias add.
        return jnp.dot(h.astype(jnp.bfloat16), w_ref[...],
                       preferred_element_type=jnp.float32) + b_ref[...]

    x = x_ref[...]                                   # (TB, IN_PAD) f32

    # ---- encoder -------------------------------------------------------------
    h = jnp.maximum(lin(x, w1_ref, b1_ref), 0.0)     # (TB, 512)
    h = jnp.maximum(lin(h, w2_ref, b2_ref), 0.0)     # (TB, 128)
    z = lin(h, w3_ref, b3_ref)                       # (TB, LAT_PAD)

    # ---- decoder -------------------------------------------------------------
    h = jnp.maximum(lin(z, w4_ref, b4_ref), 0.0)     # (TB, 128)
    h = jnp.maximum(lin(h, w5_ref, b5_ref), 0.0)     # (TB, 512)
    x_recon = lin(h, w6_ref, b6_ref)                 # (TB, IN_PAD)

    z_ref[...] = z
    xrec_ref[...] = x_recon


def _resident(shape):
    # Whole array in VMEM; same block for every batch tile -> DMA'd once and
    # kept resident across the grid (Pallas skips re-fetching unchanged blocks).
    return pl.BlockSpec(shape, lambda i: (0,) * len(shape))


def _batch_tiled(tb, ncols):
    return pl.BlockSpec((tb, ncols), lambda i: (i, 0))


# ---------------- wrapper -----------------------------------------------------
@functools.partial(jax.jit, static_argnames=("input_dim", "latent_dim"))
def autoencoder_forward(x, params, *, input_dim, latent_dim):
    """params: padded, pre-transposed bf16 weights + f32 biases (see init_params)."""
    (w1, b1, w2, b2, w3, b3, w4, b4, w5, b5, w6, b6) = params
    batch = x.shape[0]
    in_pad = w1.shape[0]
    lat_pad = w3.shape[1]

    padded_batch = _round_up(batch, 8)
    tb = min(TB, padded_batch)
    padded_batch = _round_up(padded_batch, tb)
    grid = (padded_batch // tb,)

    # zero-pad rows (batch) and columns (input_dim -> in_pad); exact.
    x_pad = jnp.zeros((padded_batch, in_pad), jnp.float32)
    x_pad = x_pad.at[:batch, :input_dim].set(x.astype(jnp.float32))

    in_specs = [
        _batch_tiled(tb, in_pad),
        _resident(w1.shape), _resident(b1.shape),
        _resident(w2.shape), _resident(b2.shape),
        _resident(w3.shape), _resident(b3.shape),
        _resident(w4.shape), _resident(b4.shape),
        _resident(w5.shape), _resident(b5.shape),
        _resident(w6.shape), _resident(b6.shape),
    ]
    out_specs = (
        _batch_tiled(tb, in_pad),     # x_recon (lane-dense: in_pad multiple of 128)
        _batch_tiled(tb, lat_pad),    # z       (lane-dense: lat_pad multiple of 128)
    )

    xrec_pad, z_pad = pl.pallas_call(
        autoencoder_kernel,
        out_shape=(jax.ShapeDtypeStruct((padded_batch, in_pad), jnp.float32),
                   jax.ShapeDtypeStruct((padded_batch, lat_pad), jnp.float32)),
        grid_spec=pltpu.PrefetchScalarGridSpec(
            num_scalar_prefetch=0,
            grid=grid,
            in_specs=in_specs,
            out_specs=out_specs,
        ),
        compiler_params=pltpu.CompilerParams(
            # batch tiles are independent -> shard across the 2 TCs on v7x
            dimension_semantics=("parallel",)),
    )(x_pad, w1, b1, w2, b2, w3, b3, w4, b4, w5, b5, w6, b6)

    # slice padding away before exposing results to callers
    return xrec_pad[:batch, :input_dim], z_pad[:batch, :latent_dim]


# ---------------- params (PyTorch-Linear-style init, padded + transposed) -----
def init_params(key, input_dim=INPUT_DIM, latent_dim=LATENT_DIM):
    in_pad = _round_up(input_dim, 128)
    lat_pad = _round_up(latent_dim, 128)
    dims = [  # (fan_in, fan_out, padded_in, padded_out)
        (input_dim, H1, in_pad, H1),
        (H1, H2, H1, H2),
        (H2, latent_dim, H2, lat_pad),
        (latent_dim, H2, lat_pad, H2),
        (H2, H1, H2, H1),
        (H1, input_dim, H1, in_pad),
    ]
    ks = jax.random.split(key, len(dims))
    params = []
    for k, (fan_in, fan_out, pin, pout) in zip(ks, dims):
        bound = 1.0 / np.sqrt(fan_in)
        kw, kb = jax.random.split(k)
        w = jax.random.uniform(kw, (fan_in, fan_out), jnp.float32, -bound, bound)
        b = jax.random.uniform(kb, (fan_out,), jnp.float32, -bound, bound)
        # zero-pad (exact) and store weights bf16, pre-transposed to (in, out)
        w_pad = jnp.zeros((pin, pout), jnp.float32).at[:fan_in, :fan_out].set(w)
        b_pad = jnp.zeros((1, pout), jnp.float32).at[0, :fan_out].set(b)
        params += [w_pad.astype(jnp.bfloat16), b_pad]
    return tuple(params)


# ---------------- plain-JAX reference (same bf16/f32 numerics) ----------------
def autoencoder_ref(x, params, *, input_dim, latent_dim):
    (w1, b1, w2, b2, w3, b3, w4, b4, w5, b5, w6, b6) = params
    in_pad = w1.shape[0]
    xp = jnp.zeros((x.shape[0], in_pad), jnp.float32).at[:, :input_dim].set(x)

    def lin(h, w, b):
        return jnp.dot(h.astype(jnp.bfloat16), w,
                       preferred_element_type=jnp.float32) + b

    h = jax.nn.relu(lin(xp, w1, b1))
    h = jax.nn.relu(lin(h, w2, b2))
    z = lin(h, w3, b3)
    h = jax.nn.relu(lin(z, w4, b4))
    h = jax.nn.relu(lin(h, w5, b5))
    x_recon = lin(h, w6, b6)
    return x_recon[:, :input_dim], z[:, :latent_dim]


if __name__ == "__main__":
    key = jax.random.PRNGKey(0)
    kx, kp = jax.random.split(key)
    x = jax.random.normal(kx, (BATCH, INPUT_DIM), jnp.float32)
    params = init_params(kp)

    x_recon, z = autoencoder_forward(x, params,
                                     input_dim=INPUT_DIM, latent_dim=LATENT_DIM)
    x_recon = jax.block_until_ready(x_recon)
    z = jax.block_until_ready(z)

    x_recon_ref, z_ref = autoencoder_ref(x, params,
                                         input_dim=INPUT_DIM, latent_dim=LATENT_DIM)
    x_recon_ref = jax.block_until_ready(x_recon_ref)
    z_ref = jax.block_until_ready(z_ref)

    assert x_recon.shape == (BATCH, INPUT_DIM)
    assert z.shape == (BATCH, LATENT_DIM)
    np.testing.assert_allclose(np.asarray(z), np.asarray(z_ref),
                               atol=2e-3, rtol=2e-3)
    np.testing.assert_allclose(np.asarray(x_recon), np.asarray(x_recon_ref),
                               atol=2e-3, rtol=2e-3)
    print("KERNEL_OK")
</pallas_src>

<mosaic_0001>
module attributes {stable_mosaic.version = 11 : i64} {
  func.func @autoencoder_kernel(%arg0: i32, %arg1: memref<256x128xf32, #tpu.memory_space<vmem>>, %arg2: memref<128x512xbf16, #tpu.memory_space<vmem>>, %arg3: memref<1x512xf32, #tpu.memory_space<vmem>>, %arg4: memref<512x128xbf16, #tpu.memory_space<vmem>>, %arg5: memref<1x128xf32, #tpu.memory_space<vmem>>, %arg6: memref<128x128xbf16, #tpu.memory_space<vmem>>, %arg7: memref<1x128xf32, #tpu.memory_space<vmem>>, %arg8: memref<128x128xbf16, #tpu.memory_space<vmem>>, %arg9: memref<1x128xf32, #tpu.memory_space<vmem>>, %arg10: memref<128x512xbf16, #tpu.memory_space<vmem>>, %arg11: memref<1x512xf32, #tpu.memory_space<vmem>>, %arg12: memref<512x128xbf16, #tpu.memory_space<vmem>>, %arg13: memref<1x128xf32, #tpu.memory_space<vmem>>, %arg14: memref<256x128xf32, #tpu.memory_space<vmem>>, %arg15: memref<256x128xf32, #tpu.memory_space<vmem>>) attributes {dimension_semantics = [#tpu.dimension_semantics<parallel>], iteration_bounds = array<i64: 2>, scalar_prefetch = 0 : i64, scratch_operands = 0 : i64, tpu.core_type = #tpu.core_type<tc>, window_params = [{transform_indices = @transform_0, window_bounds = array<i64: 256, 128>}, {pipeline_mode = #tpu.pipeline_mode<synchronous>, transform_indices = @transform_1, window_bounds = array<i64: 128, 512>}, {pipeline_mode = #tpu.pipeline_mode<synchronous>, transform_indices = @transform_2, window_bounds = array<i64: 1, 512>}, {pipeline_mode = #tpu.pipeline_mode<synchronous>, transform_indices = @transform_3, window_bounds = array<i64: 512, 128>}, {pipeline_mode = #tpu.pipeline_mode<synchronous>, transform_indices = @transform_4, window_bounds = array<i64: 1, 128>}, {pipeline_mode = #tpu.pipeline_mode<synchronous>, transform_indices = @transform_5, window_bounds = array<i64: 128, 128>}, {pipeline_mode = #tpu.pipeline_mode<synchronous>, transform_indices = @transform_6, window_bounds = array<i64: 1, 128>}, {pipeline_mode = #tpu.pipeline_mode<synchronous>, transform_indices = @transform_7, window_bounds = array<i64: 128, 128>}, {pipeline_mode = #tpu.pipeline_mode<synchronous>, transform_indices = @transform_8, window_bounds = array<i64: 1, 128>}, {pipeline_mode = #tpu.pipeline_mode<synchronous>, transform_indices = @transform_9, window_bounds = array<i64: 128, 512>}, {pipeline_mode = #tpu.pipeline_mode<synchronous>, transform_indices = @transform_10, window_bounds = array<i64: 1, 512>}, {pipeline_mode = #tpu.pipeline_mode<synchronous>, transform_indices = @transform_11, window_bounds = array<i64: 512, 128>}, {pipeline_mode = #tpu.pipeline_mode<synchronous>, transform_indices = @transform_12, window_bounds = array<i64: 1, 128>}, {transform_indices = @transform_13, window_bounds = array<i64: 256, 128>}, {transform_indices = @transform_14, window_bounds = array<i64: 256, 128>}]} {
    %c0 = arith.constant 0 : index
    %c0_0 = arith.constant 0 : index
    %0 = vector.load %arg1[%c0, %c0_0] : memref<256x128xf32, #tpu.memory_space<vmem>>, vector<256x128xf32>
    %1 = arith.truncf %0 : vector<256x128xf32> to vector<256x128xbf16>
    %c0_1 = arith.constant 0 : index
    %c0_2 = arith.constant 0 : index
    %2 = vector.load %arg2[%c0_1, %c0_2] : memref<128x512xbf16, #tpu.memory_space<vmem>>, vector<128x512xbf16>
    %cst = arith.constant dense<0.000000e+00> : vector<256x512xf32>
    %3 = tpu.matmul %1, %2, %cst {dimension_numbers = #tpu.dot_dimension_numbers<[1], [0], [0], [1], [0, 0, 1, 1], [], []>} : vector<256x128xbf16>, vector<128x512xbf16>, vector<256x512xf32> -> vector<256x512xf32>
    %c0_3 = arith.constant 0 : index
    %c0_4 = arith.constant 0 : index
    %4 = vector.load %arg3[%c0_3, %c0_4] : memref<1x512xf32, #tpu.memory_space<vmem>>, vector<1x512xf32>
    %5 = vector.broadcast %4 : vector<1x512xf32> to vector<256x512xf32>
    %6 = arith.addf %3, %5 : vector<256x512xf32>
    %cst_5 = arith.constant 0.000000e+00 : f32
    %7 = vector.broadcast %cst_5 : f32 to vector<256x512xf32>
    %8 = arith.maximumf %6, %7 : vector<256x512xf32>
    %9 = arith.truncf %8 : vector<256x512xf32> to vector<256x512xbf16>
    %c0_6 = arith.constant 0 : index
    %c0_7 = arith.constant 0 : index
    %10 = vector.load %arg4[%c0_6, %c0_7] : memref<512x128xbf16, #tpu.memory_space<vmem>>, vector<512x128xbf16>
    %cst_8 = arith.constant dense<0.000000e+00> : vector<256x128xf32>
    %11 = tpu.matmul %9, %10, %cst_8 {dimension_numbers = #tpu.dot_dimension_numbers<[1], [0], [0], [1], [0, 0, 1, 1], [], []>} : vector<256x512xbf16>, vector<512x128xbf16>, vector<256x128xf32> -> vector<256x128xf32>
    %c0_9 = arith.constant 0 : index
    %c0_10 = arith.constant 0 : index
    %12 = vector.load %arg5[%c0_9, %c0_10] : memref<1x128xf32, #tpu.memory_space<vmem>>, vector<1x128xf32>
    %13 = vector.broadcast %12 : vector<1x128xf32> to vector<256x128xf32>
    %14 = arith.addf %11, %13 : vector<256x128xf32>
    %cst_11 = arith.constant 0.000000e+00 : f32
    %15 = vector.broadcast %cst_11 : f32 to vector<256x128xf32>
    %16 = arith.maximumf %14, %15 : vector<256x128xf32>
    %17 = arith.truncf %16 : vector<256x128xf32> to vector<256x128xbf16>
    %c0_12 = arith.constant 0 : index
    %c0_13 = arith.constant 0 : index
    %18 = vector.load %arg6[%c0_12, %c0_13] : memref<128x128xbf16, #tpu.memory_space<vmem>>, vector<128x128xbf16>
    %cst_14 = arith.constant dense<0.000000e+00> : vector<256x128xf32>
    %19 = tpu.matmul %17, %18, %cst_14 {dimension_numbers = #tpu.dot_dimension_numbers<[1], [0], [0], [1], [0, 0, 1, 1], [], []>} : vector<256x128xbf16>, vector<128x128xbf16>, vector<256x128xf32> -> vector<256x128xf32>
    %c0_15 = arith.constant 0 : index
    %c0_16 = arith.constant 0 : index
    %20 = vector.load %arg7[%c0_15, %c0_16] : memref<1x128xf32, #tpu.memory_space<vmem>>, vector<1x128xf32>
    %21 = vector.broadcast %20 : vector<1x128xf32> to vector<256x128xf32>
    %22 = arith.addf %19, %21 : vector<256x128xf32>
    %23 = arith.truncf %22 : vector<256x128xf32> to vector<256x128xbf16>
    %c0_17 = arith.constant 0 : index
    %c0_18 = arith.constant 0 : index
    %24 = vector.load %arg8[%c0_17, %c0_18] : memref<128x128xbf16, #tpu.memory_space<vmem>>, vector<128x128xbf16>
    %cst_19 = arith.constant dense<0.000000e+00> : vector<256x128xf32>
    %25 = tpu.matmul %23, %24, %cst_19 {dimension_numbers = #tpu.dot_dimension_numbers<[1], [0], [0], [1], [0, 0, 1, 1], [], []>} : vector<256x128xbf16>, vector<128x128xbf16>, vector<256x128xf32> -> vector<256x128xf32>
    %c0_20 = arith.constant 0 : index
    %c0_21 = arith.constant 0 : index
    %26 = vector.load %arg9[%c0_20, %c0_21] : memref<1x128xf32, #tpu.memory_space<vmem>>, vector<1x128xf32>
    %27 = vector.broadcast %26 : vector<1x128xf32> to vector<256x128xf32>
    %28 = arith.addf %25, %27 : vector<256x128xf32>
    %cst_22 = arith.constant 0.000000e+00 : f32
    %29 = vector.broadcast %cst_22 : f32 to vector<256x128xf32>
    %30 = arith.maximumf %28, %29 : vector<256x128xf32>
    %31 = arith.truncf %30 : vector<256x128xf32> to vector<256x128xbf16>
    %c0_23 = arith.constant 0 : index
    %c0_24 = arith.constant 0 : index
    %32 = vector.load %arg10[%c0_23, %c0_24] : memref<128x512xbf16, #tpu.memory_space<vmem>>, vector<128x512xbf16>
    %cst_25 = arith.constant dense<0.000000e+00> : vector<256x512xf32>
    %33 = tpu.matmul %31, %32, %cst_25 {dimension_numbers = #tpu.dot_dimension_numbers<[1], [0], [0], [1], [0, 0, 1, 1], [], []>} : vector<256x128xbf16>, vector<128x512xbf16>, vector<256x512xf32> -> vector<256x512xf32>
    %c0_26 = arith.constant 0 : index
    %c0_27 = arith.constant 0 : index
    %34 = vector.load %arg11[%c0_26, %c0_27] : memref<1x512xf32, #tpu.memory_space<vmem>>, vector<1x512xf32>
    %35 = vector.broadcast %34 : vector<1x512xf32> to vector<256x512xf32>
    %36 = arith.addf %33, %35 : vector<256x512xf32>
    %cst_28 = arith.constant 0.000000e+00 : f32
    %37 = vector.broadcast %cst_28 : f32 to vector<256x512xf32>
    %38 = arith.maximumf %36, %37 : vector<256x512xf32>
    %39 = arith.truncf %38 : vector<256x512xf32> to vector<256x512xbf16>
    %c0_29 = arith.constant 0 : index
    %c0_30 = arith.constant 0 : index
    %40 = vector.load %arg12[%c0_29, %c0_30] : memref<512x128xbf16, #tpu.memory_space<vmem>>, vector<512x128xbf16>
    %cst_31 = arith.constant dense<0.000000e+00> : vector<256x128xf32>
    %41 = tpu.matmul %39, %40, %cst_31 {dimension_numbers = #tpu.dot_dimension_numbers<[1], [0], [0], [1], [0, 0, 1, 1], [], []>} : vector<256x512xbf16>, vector<512x128xbf16>, vector<256x128xf32> -> vector<256x128xf32>
    %c0_32 = arith.constant 0 : index
    %c0_33 = arith.constant 0 : index
    %42 = vector.load %arg13[%c0_32, %c0_33] : memref<1x128xf32, #tpu.memory_space<vmem>>, vector<1x128xf32>
    %43 = vector.broadcast %42 : vector<1x128xf32> to vector<256x128xf32>
    %44 = arith.addf %41, %43 : vector<256x128xf32>
    %c0_34 = arith.constant 0 : index
    %c0_35 = arith.constant 0 : index
    %45 = vector.load %arg15[%c0_34, %c0_35] : memref<256x128xf32, #tpu.memory_space<vmem>>, vector<256x128xf32>
    tpu.vector_store %arg15[%c0_34, %c0_35], %22 {strides = array<i32>} : memref<256x128xf32, #tpu.memory_space<vmem>>, vector<256x128xf32>,
    %c0_36 = arith.constant 0 : index
    %c0_37 = arith.constant 0 : index
    %46 = vector.load %arg14[%c0_36, %c0_37] : memref<256x128xf32, #tpu.memory_space<vmem>>, vector<256x128xf32>
    tpu.vector_store %arg14[%c0_36, %c0_37], %44 {strides = array<i32>} : memref<256x128xf32, #tpu.memory_space<vmem>>, vector<256x128xf32>,
    return
  }
  func.func @transform_0(%arg0: i32) -> (i32, i32) {
    %c0_i32 = arith.constant 0 : i32
    %c0_i32_0 = arith.constant 0 : i32
    return %arg0, %c0_i32 : i32, i32
  }
  func.func @transform_1(%arg0: i32) -> (i32, i32) {
    %c0_i32 = arith.constant 0 : i32
    %c0_i32_0 = arith.constant 0 : i32
    %c0_i32_1 = arith.constant 0 : i32
    return %c0_i32, %c0_i32_0 : i32, i32
  }
  func.func @transform_2(%arg0: i32) -> (i32, i32) {
    %c0_i32 = arith.constant 0 : i32
    %c0_i32_0 = arith.constant 0 : i32
    %c0_i32_1 = arith.constant 0 : i32
    return %c0_i32, %c0_i32_0 : i32, i32
  }
  func.func @transform_3(%arg0: i32) -> (i32, i32) {
    %c0_i32 = arith.constant 0 : i32
    %c0_i32_0 = arith.constant 0 : i32
    %c0_i32_1 = arith.constant 0 : i32
    return %c0_i32, %c0_i32_0 : i32, i32
  }
  func.func @transform_4(%arg0: i32) -> (i32, i32) {
    %c0_i32 = arith.constant 0 : i32
    %c0_i32_0 = arith.constant 0 : i32
    %c0_i32_1 = arith.constant 0 : i32
    return %c0_i32, %c0_i32_0 : i32, i32
  }
  func.func @transform_5(%arg0: i32) -> (i32, i32) {
    %c0_i32 = arith.constant 0 : i32
    %c0_i32_0 = arith.constant 0 : i32
    %c0_i32_1 = arith.constant 0 : i32
    return %c0_i32, %c0_i32_0 : i32, i32
  }
  func.func @transform_6(%arg0: i32) -> (i32, i32) {
    %c0_i32 = arith.constant 0 : i32
    %c0_i32_0 = arith.constant 0 : i32
    %c0_i32_1 = arith.constant 0 : i32
    return %c0_i32, %c0_i32_0 : i32, i32
  }
  func.func @transform_7(%arg0: i32) -> (i32, i32) {
    %c0_i32 = arith.constant 0 : i32
    %c0_i32_0 = arith.constant 0 : i32
    %c0_i32_1 = arith.constant 0 : i32
    return %c0_i32, %c0_i32_0 : i32, i32
  }
  func.func @transform_8(%arg0: i32) -> (i32, i32) {
    %c0_i32 = arith.constant 0 : i32
    %c0_i32_0 = arith.constant 0 : i32
    %c0_i32_1 = arith.constant 0 : i32
    return %c0_i32, %c0_i32_0 : i32, i32
  }
  func.func @transform_9(%arg0: i32) -> (i32, i32) {
    %c0_i32 = arith.constant 0 : i32
    %c0_i32_0 = arith.constant 0 : i32
    %c0_i32_1 = arith.constant 0 : i32
    return %c0_i32, %c0_i32_0 : i32, i32
  }
  func.func @transform_10(%arg0: i32) -> (i32, i32) {
    %c0_i32 = arith.constant 0 : i32
    %c0_i32_0 = arith.constant 0 : i32
    %c0_i32_1 = arith.constant 0 : i32
    return %c0_i32, %c0_i32_0 : i32, i32
  }
  func.func @transform_11(%arg0: i32) -> (i32, i32) {
    %c0_i32 = arith.constant 0 : i32
    %c0_i32_0 = arith.constant 0 : i32
    %c0_i32_1 = arith.constant 0 : i32
    return %c0_i32, %c0_i32_0 : i32, i32
  }
  func.func @transform_12(%arg0: i32) -> (i32, i32) {
    %c0_i32 = arith.constant 0 : i32
    %c0_i32_0 = arith.constant 0 : i32
    %c0_i32_1 = arith.constant 0 : i32
    return %c0_i32, %c0_i32_0 : i32, i32
  }
  func.func @transform_13(%arg0: i32) -> (i32, i32) {
    %c0_i32 = arith.constant 0 : i32
    %c0_i32_0 = arith.constant 0 : i32
    return %arg0, %c0_i32 : i32, i32
  }
  func.func @transform_14(%arg0: i32) -> (i32, i32) {
    %c0_i32 = arith.constant 0 : i32
    %c0_i32_0 = arith.constant 0 : i32
    return %arg0, %c0_i32 : i32, i32
  }
}

</mosaic_0001>

<bundles_post_ra>
// kernel: autoencoder_forward.1
= control target key start
LH: loop header
LB: loop body
LE: loop exit
PB: predicated region body
PF: predicated region fallthrough
CT: control target
= control target key end

     0   :  { %s5040_s29 = smov 0   ;;  %s6113_s0 = inlined_call_operand.vmem [shape: f32[512,128], index: 0, kind: input, shape index: {}]   ;;  %s6114_s1 = inlined_call_operand.vmem [shape: bf16[128,512], index: 1, kind: input, shape index: {}]   ;;  %s6115_s2 = inlined_call_operand.vmem [shape: f32[1,512], index: 2, kind: input, shape index: {}]   ;;  %s6116_s3 = inlined_call_operand.vmem [shape: bf16[512,128], index: 3, kind: input, shape index: {}]   ;;  %s6117_s4 = inlined_call_operand.vmem [shape: f32[1,128], index: 4, kind: input, shape index: {}]   ;;  %s6118_s5 = inlined_call_operand.vmem [shape: bf16[128,128], index: 5, kind: input, shape index: {}]   ;;  %s6119_s6 = inlined_call_operand.vmem [shape: f32[1,128], index: 6, kind: input, shape index: {}]   ;;  %s6120_s7 = inlined_call_operand.vmem [shape: bf16[128,128], index: 7, kind: input, shape index: {}]   ;;  %s6121_s8 = inlined_call_operand.vmem [shape: f32[1,128], index: 8, kind: input, shape index: {}]   ;;  %s6122_s9 = inlined_call_operand.vmem [shape: bf16[128,512], index: 9, kind: input, shape index: {}]   ;;  %s6123_s10 = inlined_call_operand.vmem [shape: f32[1,512], index: 10, kind: input, shape index: {}]   ;;  %s6124_s11 = inlined_call_operand.vmem [shape: bf16[512,128], index: 11, kind: input, shape index: {}]   ;;  %s6125_s12 = inlined_call_operand.vmem [shape: f32[1,128], index: 12, kind: input, shape index: {}]   ;;  %s6126_s13 = inlined_call_operand.vmem [shape: f32[512,128], index: 13, kind: output, shape index: {0}]   ;;  %s6127_s14 = inlined_call_operand.vmem [shape: f32[512,128], index: 14, kind: output, shape index: {1}]  }
   0x1 LB: > { %s4018_s30 = sadd.s32 4294967295, %s4962_s29   ;;  %p4022_p0 = scmp.ge.s32.totalorder %s4962_s29, 1  ;;  %s4962_s29 = sphi %s5040_s29, %s25_s29  }
   0x2   : > { %p416_p1 = scmp.lt.s32.totalorder %s4962_s29, 3 }
   0x4   : > { %p417_p2 = pnand %p4022_p0, %p416_p1 }
   0x5   : > { %v4780_v0 = vld [vmem:[%s6114_s1 + $0x4] ss:$16 sps:$4 sm:$0xff] (!%p417_p2)   ;;  %v4782_v1 = vld [vmem:[%s6114_s1 + $0xc] ss:$16 sps:$4 sm:$0xff] (!%p417_p2)   ;;  %v4964_v2 = vmov (!%p417_p2), 0   ;;  %s4023_s17 = sshll.u32 (!%p417_p2), %s4018_s30, 5 }
   0x6   : > { %420 = sbr.rel (%p417_p2) target bundleno = 1499 (0x5db), region = 72  ;;  %780 = vmatprep.mubr.bf16.mxu0 (!%p417_p2), %v4964_v2  ;;  %973 = vmatprep.mubr.bf16.mxu1 (!%p417_p2), %v4964_v2  ;;  %v4784_v3 = vld [vmem:[%s6114_s1] ss:$16 sps:$4 sm:$0xff] (!%p417_p2)   ;;  %v4785_v4 = vld [vmem:[%s6114_s1 + $0x8] ss:$16 sps:$4 sm:$0xff] (!%p417_p2)   ;;  %p468_p3 = scmp.lt.s32.totalorder (!%p417_p2), %s4023_s17, 63 }
   0x7   : > { %748 = vmatprep.subr.bf16.mxu0 (!%p417_p2), %v4780_v0  ;;  %941 = vmatprep.subr.bf16.mxu1 (!%p417_p2), %v4782_v1  ;;  %v4786_v5 = vld [vmem:[%s6114_s1 + $0x24] ss:$16 sps:$4 sm:$0xff] (!%p417_p2)   ;;  %v4788_v6 = vld [vmem:[%s6114_s1 + $0x2c] ss:$16 sps:$4 sm:$0xff] (!%p417_p2)   ;;  %v4790_v7 = vld [vmem:[%s6114_s1 + $0x20] ss:$16 sps:$4 sm:$0xff] (!%p417_p2)  }
   0x8   : > { %749 = vmatpush1.bf16.msra.mxu0 (!%p417_p2), %v4784_v3  ;;  %942 = vmatpush1.bf16.msra.mxu1 (!%p417_p2), %v4785_v4  ;;  %v4791_v8 = vld [vmem:[%s6114_s1 + $0x28] ss:$16 sps:$4 sm:$0xff] (!%p417_p2)   ;;  %v4792_v9 = vld [vmem:[%s6114_s1 + $0x44] ss:$16 sps:$4 sm:$0xff] (!%p417_p2)   ;;  %v4794_v10 = vld [vmem:[%s6114_s1 + $0x4c] ss:$16 sps:$4 sm:$0xff] (!%p417_p2)  }
   0x9   : > { %750 = vmatprep.subr.bf16.mxu0 (!%p417_p2), %v4786_v5  ;;  %943 = vmatprep.subr.bf16.mxu1 (!%p417_p2), %v4788_v6  ;;  %v4796_v11 = vld [vmem:[%s6114_s1 + $0x40] ss:$16 sps:$4 sm:$0xff] (!%p417_p2)   ;;  %v4797_v12 = vld [vmem:[%s6114_s1 + $0x48] ss:$16 sps:$4 sm:$0xff] (!%p417_p2)   ;;  %v4798_v13 = vld [vmem:[%s6114_s1 + $0x64] ss:$16 sps:$4 sm:$0xff] (!%p417_p2)  }
   0xa   : > { %v4800_v14 = vld [vmem:[%s6114_s1 + $0x6c] ss:$16 sps:$4 sm:$0xff] (!%p417_p2)   ;;  %v4802_v15 = vld [vmem:[%s6114_s1 + $0x60] ss:$16 sps:$4 sm:$0xff] (!%p417_p2)   ;;  %v4803_v16 = vld [vmem:[%s6114_s1 + $0x68] ss:$16 sps:$4 sm:$0xff] (!%p417_p2)  }
   0xb   : > { %v4804_v17 = vld [vmem:[%s6114_s1 + $0x84] ss:$16 sps:$4 sm:$0xff] (!%p417_p2)   ;;  %v4806_v18 = vld [vmem:[%s6114_s1 + $0x8c] ss:$16 sps:$4 sm:$0xff] (!%p417_p2)   ;;  %v4808_v19 = vld [vmem:[%s6114_s1 + $0x80] ss:$16 sps:$4 sm:$0xff] (!%p417_p2)  }
   0xc   : > { %751 = vmatpush1.bf16.msra.mxu0 (!%p417_p2), %v4790_v7  ;;  %944 = vmatpush1.bf16.msra.mxu1 (!%p417_p2), %v4791_v8  ;;  %v4809_v20 = vld [vmem:[%s6114_s1 + $0x88] ss:$16 sps:$4 sm:$0xff] (!%p417_p2)   ;;  %v4810_v21 = vld [vmem:[%s6114_s1 + $0xa4] ss:$16 sps:$4 sm:$0xff] (!%p417_p2)   ;;  %v4812_v22 = vld [vmem:[%s6114_s1 + $0xac] ss:$16 sps:$4 sm:$0xff] (!%p417_p2)  }
   0xd   : > { %752 = vmatprep.subr.bf16.mxu0 %v4792_v9  ;;  %945 = vmatprep.subr.bf16.mxu1 %v4794_v10  ;;  %s6129_s17 = smov (!%p468_p3, %s4023_s17), 63  ;;  %v4814_v23 = vld [vmem:[%s6114_s1 + $0xa0] ss:$16 sps:$4 sm:$0xff]   ;;  %v4815_v24 = vld [vmem:[%s6114_s1 + $0xa8] ss:$16 sps:$4 sm:$0xff]  }
   0xe   : > { %v4816_v25 = vld [vmem:[%s6114_s1 + $0xc4] ss:$16 sps:$4 sm:$0xff]   ;;  %v4818_v26 = vld [vmem:[%s6114_s1 + $0xcc] ss:$16 sps:$4 sm:$0xff]   ;;  %s5130_s30 = sshll.u32 %s6129_s17, 3 }
   0xf   : > { %v4820_v27 = vld [vmem:[%s6114_s1 + $0xc0] ss:$16 sps:$4 sm:$0xff]   ;;  %v4821_v28 = vld [vmem:[%s6114_s1 + $0xc8] ss:$16 sps:$4 sm:$0xff]   ;;  %v4822_v29 = vld [vmem:[%s6114_s1 + $0xe4] ss:$16 sps:$4 sm:$0xff]   ;;  %s5148_s22 = scalar_lea.vmem %s6113_s0, %s5130_s30  ;;  %s5580_s21 = scalar_lea.vmem %s6127_s14, %s5130_s30 }
  0x10   : > { %753 = vmatpush1.bf16.msra.mxu0 %v4796_v11  ;;  %946 = vmatpush1.bf16.msra.mxu1 %v4797_v12  ;;  %v4824_v30 = vld [vmem:[%s6114_s1 + $0xec] ss:$16 sps:$4 sm:$0xff]   ;;  %v4826_v31 = vld [vmem:[%s6114_s1 + $0xe0] ss:$16 sps:$4 sm:$0xff]   ;;  %v4827_v32 = vld [vmem:[%s6114_s1 + $0xe8] ss:$16 sps:$4 sm:$0xff]   ;;  %s6045_s25 = scalar_lea.vmem %s6126_s13, %s5130_s30 }
  0x11   : > { %754 = vmatprep.subr.bf16.mxu0 %v4798_v13  ;;  %947 = vmatprep.subr.bf16.mxu1 %v4800_v14  ;;  %v486_v33 = vld [vmem:[%s5148_s22] sm:$0xff]  ;;  %v487_v34 = vld [vmem:[%s5148_s22 + $0x8] sm:$0xff]  ;;  %v488_v40 = vld [vmem:[%s5148_s22 + $0x10] sm:$0xff] }
  0x12   : > { %v4828_v35 = vld [vmem:[%s6116_s3 + $0x40] sm:$0xff]   ;;  %v518_v36 = vpack.c.bf16 %v487_v34, %v486_v33  ;;  %v4832_v41 = vld [vmem:[%s6116_s3 + $0x48] sm:$0xff]   ;;  %v489_v42 = vld [vmem:[%s5148_s22 + $0x18] sm:$0xff] }
  0x13   : > { %v4829_v37 = vld [vmem:[%s6116_s3] sm:$0xff]   ;;  %v4833_v43 = vld [vmem:[%s6116_s3 + $0x8] sm:$0xff]   ;;  %v519_v45 = vpack.c.bf16 %v489_v42, %v488_v40  ;;  %v4836_v47 = vld [vmem:[%s6116_s3 + $0x50] sm:$0xff]  }
  0x14   : > { %755 = vmatpush1.bf16.msra.mxu0 %v4802_v15  ;;  %948 = vmatpush1.bf16.msra.mxu1 %v4803_v16  ;;  %v4830_v38 = vld [vmem:[%s6116_s3 + $0xc0] sm:$0xff]   ;;  %v4834_v44 = vld [vmem:[%s6116_s3 + $0xc8] sm:$0xff]   ;;  %v4837_v48 = vld [vmem:[%s6116_s3 + $0x10] sm:$0xff]  }
  0x15   : > { %756 = vmatprep.subr.bf16.mxu0 %v4804_v17  ;;  %949 = vmatprep.subr.bf16.mxu1 %v4806_v18  ;;  %v4831_v39 = vld [vmem:[%s6116_s3 + $0x80] sm:$0xff]   ;;  %v4835_v46 = vld [vmem:[%s6116_s3 + $0x88] sm:$0xff]   ;;  %v4838_v51 = vld [vmem:[%s6116_s3 + $0xd0] sm:$0xff]  }
  0x16   : > { %v490_v49 = vld [vmem:[%s5148_s22 + $0x20] sm:$0xff]  ;;  %v491_v50 = vld [vmem:[%s5148_s22 + $0x28] sm:$0xff]  ;;  %v4839_v52 = vld [vmem:[%s6116_s3 + $0x90] sm:$0xff]  }
  0x17   : > { %v4840_v53 = vld [vmem:[%s6116_s3 + $0x58] sm:$0xff]   ;;  %v520_v56 = vpack.c.bf16 %v491_v50, %v490_v49  ;;  %v4844_v58 = vld [vmem:[%s6116_s3 + $0x60] sm:$0xff]   ;;  %v492_v60 = vld [vmem:[%s5148_s22 + $0x30] sm:$0xff]  ;;  %v568_v50 = vlaneseq }
  0x18   : > { %757 = vmatpush1.bf16.msra.mxu0 %v4808_v19  ;;  %950 = vmatpush1.bf16.msra.mxu1 %v4809_v20  ;;  %v4841_v54 = vld [vmem:[%s6116_s3 + $0x18] sm:$0xff]   ;;  %v4845_v59 = vld [vmem:[%s6116_s3 + $0x20] sm:$0xff]   ;;  %v4848_v0 = vld [vmem:[%s6116_s3 + $0x68] sm:$0xff]  }
  0x19   : > { %758 = vmatprep.subr.bf16.mxu0 %v4810_v21  ;;  %951 = vmatprep.subr.bf16.mxu1 %v4812_v22  ;;  %v4842_v55 = vld [vmem:[%s6116_s3 + $0xd8] sm:$0xff]   ;;  %v4846_v62 = vld [vmem:[%s6116_s3 + $0xe0] sm:$0xff]   ;;  %v4849_v1 = vld [vmem:[%s6116_s3 + $0x28] sm:$0xff]  }
  0x1a   : > { %v4843_v57 = vld [vmem:[%s6116_s3 + $0x98] sm:$0xff]   ;;  %v4847_v63 = vld [vmem:[%s6116_s3 + $0xa0] sm:$0xff]   ;;  %v4850_v3 = vld [vmem:[%s6116_s3 + $0xe8] sm:$0xff]  }
  0x1b   : > { %v493_v61 = vld [vmem:[%s5148_s22 + $0x38] sm:$0xff]  ;;  %v4851_v5 = vld [vmem:[%s6116_s3 + $0xa8] sm:$0xff]   ;;  %v4852_v6 = vld [vmem:[%s6116_s3 + $0x70] sm:$0xff]  }
  0x1c   : > { %759 = vmatpush1.bf16.msra.mxu0 %v4814_v23  ;;  %952 = vmatpush1.bf16.msra.mxu1 %v4815_v24  ;;  %v521_v4 = vpack.c.bf16 %v493_v61, %v492_v60  ;;  %v4853_v7 = vld [vmem:[%s6116_s3 + $0x30] sm:$0xff]   ;;  %v494_v8 = vld [vmem:[%s5148_s22 + $0x40] sm:$0xff]  ;;  %v495_v9 = vld [vmem:[%s5148_s22 + $0x48] sm:$0xff] }
  0x1d   : > { %760 = vmatprep.subr.bf16.mxu0 %v4816_v25  ;;  %953 = vmatprep.subr.bf16.mxu1 %v4818_v26  ;;  %v4854_v10 = vld [vmem:[%s6116_s3 + $0xf0] sm:$0xff]   ;;  %v4856_v12 = vld [vmem:[%s6116_s3 + $0x78] sm:$0xff]   ;;  %v522_v15 = vpack.c.bf16 %v495_v9, %v494_v8  ;;  %v498_v20 = vld [vmem:[%s5148_s22 + $0x60] sm:$0xff] }
  0x1e   : > { %v4855_v11 = vld [vmem:[%s6116_s3 + $0xb0] sm:$0xff]   ;;  %v4857_v13 = vld [vmem:[%s6116_s3 + $0x38] sm:$0xff]   ;;  %v499_v21 = vld [vmem:[%s5148_s22 + $0x68] sm:$0xff] }
  0x1f   : > { %v4858_v14 = vld [vmem:[%s6116_s3 + $0xf8] sm:$0xff]   ;;  %v496_v17 = vld [vmem:[%s5148_s22 + $0x50] sm:$0xff]  ;;  %v524_v22 = vpack.c.bf16 %v499_v21, %v498_v20  ;;  %v502_v26 = vld [vmem:[%s5148_s22 + $0x80] sm:$0xff] }
  0x20   : > { %761 = vmatpush1.bf16.msra.mxu0 %v4820_v27  ;;  %954 = vmatpush1.bf16.msra.mxu1 %v4821_v28  ;;  %v4859_v16 = vld [vmem:[%s6116_s3 + $0xb8] sm:$0xff]   ;;  %v500_v23 = vld [vmem:[%s5148_s22 + $0x70] sm:$0xff]  ;;  %v503_v27 = vld [vmem:[%s5148_s22 + $0x88] sm:$0xff] }
  0x21   : > { %762 = vmatprep.subr.bf16.mxu0 %v4822_v29  ;;  %955 = vmatprep.subr.bf16.mxu1 %v4824_v30  ;;  %v497_v18 = vld [vmem:[%s5148_s22 + $0x58] sm:$0xff]  ;;  %v526_v28 = vpack.c.bf16 %v503_v27, %v502_v26  ;;  %v504_v29 = vld [vmem:[%s5148_s22 + $0x90] sm:$0xff]  ;;  %v507_v33 = vld [vmem:[%s5148_s22 + $0xa8] sm:$0xff] }
  0x22   : > { %v523_v19 = vpack.c.bf16 %v497_v18, %v496_v17  ;;  %v501_v24 = vld [vmem:[%s5148_s22 + $0x78] sm:$0xff] }
  0x23   : > { %v525_v25 = vpack.c.bf16 %v501_v24, %v500_v23  ;;  %v505_v30 = vld [vmem:[%s5148_s22 + $0x98] sm:$0xff] }
  0x24   : > { %763 = vmatpush1.bf16.msra.mxu0 %v4826_v31  ;;  %956 = vmatpush1.bf16.msra.mxu1 %v4827_v32  ;;  %v527_v31 = vpack.c.bf16 %v505_v30, %v504_v29  ;;  %v506_v32 = vld [vmem:[%s5148_s22 + $0xa0] sm:$0xff]  ;;  %v513_v42 = vld [vmem:[%s5148_s22 + $0xd8] sm:$0xff] }
  0x25   : > { %4179 = vmatprep.subr.bf16.mxu0 %v4828_v35  ;;  %4291 = vmatprep.subr.bf16.mxu1 %v4830_v38  ;;  %v528_v34 = vpack.c.bf16 %v507_v33, %v506_v32  ;;  %v508_v35 = vld [vmem:[%s5148_s22 + $0xb0] sm:$0xff]  ;;  %v510_v38 = vld [vmem:[%s5148_s22 + $0xc0] sm:$0xff]  ;;  %v4861_v33 = vld [vmem:[%s6118_s5 + $0x8] sm:$0xff]  }
  0x27   : > { %781 = vmatmul.mubr.bf16.vlgmr.msra.gmra.mrb[0].mxu0 %v518_v36  ;;  %974 = vmatmul.mubr.bf16.vlgmr.msra.gmra.mrb[0].mxu1 %v518_v36  ;;  %v509_v36 = vld [vmem:[%s5148_s22 + $0xb8] sm:$0xff] }
  0x28   : > { %790 = vmatprep.mubr.bf16.mxu0 %v4964_v2  ;;  %983 = vmatprep.mubr.bf16.mxu1 %v4964_v2 }
  0x29   : > { %4180 = vmatpush3.bf16.msra.mxu0 %v4829_v37  ;;  %4292 = vmatpush3.bf16.msra.mxu1 %v4831_v39  ;;  %v529_v37 = vpack.c.bf16 %v509_v36, %v508_v35  ;;  %v511_v39 = vld [vmem:[%s5148_s22 + $0xc8] sm:$0xff] }
  0x2a   : > { %4181 = vmatprep.subr.bf16.mxu0 %v4832_v41  ;;  %4293 = vmatprep.subr.bf16.mxu1 %v4834_v44  ;;  %v530_v40 = vpack.c.bf16 %v511_v39, %v510_v38  ;;  %v512_v41 = vld [vmem:[%s5148_s22 + $0xd0] sm:$0xff]  ;;  %v514_v44 = vld [vmem:[%s5148_s22 + $0xe0] sm:$0xff] }
  0x2d   : > { %4182 = vmatpush3.bf16.msra.mxu0 %v4833_v43  ;;  %4294 = vmatpush3.bf16.msra.mxu1 %v4835_v46  ;;  %v531_v43 = vpack.c.bf16 %v513_v42, %v512_v41 }
  0x2e   : > { %4183 = vmatprep.subr.bf16.mxu0 %v4836_v47  ;;  %4295 = vmatprep.subr.bf16.mxu1 %v4838_v51  ;;  %v516_v47 = vld [vmem:[%s5148_s22 + $0xf0] sm:$0xff]  ;;  %v5314_v51 = vshrl.u32 %v568_v50, 7 }
  0x2f   : > { %791 = vmatmul.mubr.bf16.gmra.mrb[4].mxu0 %v519_v45  ;;  %984 = vmatmul.mubr.bf16.gmra.mrb[4].mxu1 %v519_v45  ;;  %v515_v45 = vld [vmem:[%s5148_s22 + $0xe8] sm:$0xff] }
  0x30   : > { %800 = vmatprep.mubr.bf16.mxu0 %v4964_v2  ;;  %993 = vmatprep.mubr.bf16.mxu1 %v4964_v2  ;;  %v532_v46 = vpack.c.bf16 %v515_v45, %v514_v44 }
  0x31   : > { %4184 = vmatpush3.bf16.msra.mxu0 %v4837_v48  ;;  %4296 = vmatpush3.bf16.msra.mxu1 %v4839_v52  ;;  %v517_v48 = vld [vmem:[%s5148_s22 + $0xf8] sm:$0xff]  ;;  %v4860_v52 = vld [vmem:[%s6118_s5] sm:$0xff]  }
  0x32   : > { %4185 = vmatprep.subr.bf16.mxu0 %v4840_v53  ;;  %4297 = vmatprep.subr.bf16.mxu1 %v4842_v55  ;;  %v533_v49 = vpack.c.bf16 %v517_v48, %v516_v47  ;;  %v570_v53 = vsub.s32 0, %v5314_v51  ;;  %v566_v55 = vld [vmem:[%s6115_s2] sm:$0xf] }
  0x35   : > { %4186 = vmatpush3.bf16.msra.mxu0 %v4841_v54  ;;  %4298 = vmatpush3.bf16.msra.mxu1 %v4843_v57  ;;  %v578_v54 = vsub.s32 2, %v5314_v51  ;;  %v582_v57 = vsub.s32 3, %v5314_v51 }
  0x36   : > { %4187 = vmatprep.subr.bf16.mxu0 %v4844_v58  ;;  %4299 = vmatprep.subr.bf16.mxu1 %v4846_v62  ;;  %v5328_v58 = vrot.slane %v566_v55, %v570_v53 }
  0x37   : > { %801 = vmatmul.mubr.bf16.gmra.mrb[8].mxu0 %v520_v56  ;;  %994 = vmatmul.mubr.bf16.gmra.mrb[8].mxu1 %v520_v56  ;;  %v574_v56 = vsub.s32 1, %v5314_v51  ;;  %v5340_v61 = vrot.slane %v566_v55, %v582_v57 }
  0x38   : > { %810 = vmatprep.mubr.bf16.mxu0 %v4964_v2  ;;  %1003 = vmatprep.mubr.bf16.mxu1 %v4964_v2 }
  0x39   : > { %4188 = vmatpush3.bf16.msra.mxu0 %v4845_v59  ;;  %4300 = vmatpush3.bf16.msra.mxu1 %v4847_v63  ;;  %v5332_v59 = vrot.slane %v566_v55, %v578_v54  ;;  %v5336_v60 = vrot.slane %v566_v55, %v574_v56 }
  0x3a   : > { %4189 = vmatprep.subr.bf16.mxu0 %v4848_v0  ;;  %4301 = vmatprep.subr.bf16.mxu1 %v4850_v3 }
  0x3d   : > { %4190 = vmatpush3.bf16.msra.mxu0 %v4849_v1  ;;  %4302 = vmatpush3.bf16.msra.mxu1 %v4851_v5 }
  0x3e   : > { %4191 = vmatprep.subr.bf16.mxu0 %v4852_v6  ;;  %4303 = vmatprep.subr.bf16.mxu1 %v4854_v10 }
  0x3f   : > { %811 = vmatmul.mubr.bf16.gmra.mrb[12].mxu0 %v521_v4  ;;  %1004 = vmatmul.mubr.bf16.gmra.mrb[12].mxu1 %v521_v4 }
  0x40   : > { %820 = vmatprep.mubr.bf16.mxu0 %v4964_v2  ;;  %1013 = vmatprep.mubr.bf16.mxu1 %v4964_v2 }
  0x41   : > { %4192 = vmatpush3.bf16.msra.mxu0 %v4853_v7  ;;  %4304 = vmatpush3.bf16.msra.mxu1 %v4855_v11 }
  0x42   : > { %4193 = vmatprep.subr.bf16.mxu0 %v4856_v12  ;;  %4305 = vmatprep.subr.bf16.mxu1 %v4858_v14 }
  0x45   : > { %4194 = vmatpush3.bf16.msra.mxu0 %v4857_v13  ;;  %4306 = vmatpush3.bf16.msra.mxu1 %v4859_v16 }
  0x46   : > { %4675 = vmatprep.subr.bf16.mxu0 %v4860_v52 }
  0x47   : > { %821 = vmatmul.mubr.bf16.gmra.mrb[16].mxu0 %v522_v15  ;;  %1014 = vmatmul.mubr.bf16.gmra.mrb[16].mxu1 %v522_v15 }
  0x48   : > { %830 = vmatprep.mubr.bf16.mxu0 %v4964_v2  ;;  %1023 = vmatprep.mubr.bf16.mxu1 %v4964_v2 }
  0x4f   : > { %831 = vmatmul.mubr.bf16.gmra.mrb[20].mxu0 %v523_v19  ;;  %1024 = vmatmul.mubr.bf16.gmra.mrb[20].mxu1 %v523_v19 }
  0x50   : > { %840 = vmatprep.mubr.bf16.mxu0 %v4964_v2  ;;  %1033 = vmatprep.mubr.bf16.mxu1 %v4964_v2 }
  0x57   : > { %841 = vmatmul.mubr.bf16.gmra.mrb[24].mxu0 %v524_v22  ;;  %1034 = vmatmul.mubr.bf16.gmra.mrb[24].mxu1 %v524_v22 }
  0x58   : > { %850 = vmatprep.mubr.bf16.mxu0 %v4964_v2  ;;  %1043 = vmatprep.mubr.bf16.mxu1 %v4964_v2 }
  0x5f   : > { %851 = vmatmul.mubr.bf16.gmra.mrb[28].mxu0 %v525_v25  ;;  %1044 = vmatmul.mubr.bf16.gmra.mrb[28].mxu1 %v525_v25 }
  0x60   : > { %860 = vmatprep.mubr.bf16.mxu0 %v4964_v2  ;;  %1053 = vmatprep.mubr.bf16.mxu1 %v4964_v2 }
  0x67   : > { %861 = vmatmul.mubr.bf16.gmra.mrb[32].mxu0 %v526_v28  ;;  %1054 = vmatmul.mubr.bf16.gmra.mrb[32].mxu1 %v526_v28 }
  0x68   : > { %870 = vmatprep.mubr.bf16.mxu0 %v4964_v2  ;;  %1063 = vmatprep.mubr.bf16.mxu1 %v4964_v2 }
  0x6f   : > { %871 = vmatmul.mubr.bf16.gmra.mrb[36].mxu0 %v527_v31  ;;  %1064 = vmatmul.mubr.bf16.gmra.mrb[36].mxu1 %v527_v31 }
  0x70   : > { %880 = vmatprep.mubr.bf16.mxu0 %v4964_v2  ;;  %1073 = vmatprep.mubr.bf16.mxu1 %v4964_v2 }
  0x77   : > { %881 = vmatmul.mubr.bf16.gmra.mrb[40].mxu0 %v528_v34  ;;  %1074 = vmatmul.mubr.bf16.gmra.mrb[40].mxu1 %v528_v34 }
  0x78   : > { %890 = vmatprep.mubr.bf16.mxu0 %v4964_v2  ;;  %1083 = vmatprep.mubr.bf16.mxu1 %v4964_v2 }
  0x7f   : > { %891 = vmatmul.mubr.bf16.gmra.mrb[44].mxu0 %v529_v37  ;;  %1084 = vmatmul.mubr.bf16.gmra.mrb[44].mxu1 %v529_v37 }
  0x80   : > { %900 = vmatprep.mubr.bf16.mxu0 %v4964_v2  ;;  %1093 = vmatprep.mubr.bf16.mxu1 %v4964_v2 }
  0x87   : > { %901 = vmatmul.mubr.bf16.gmra.mrb[48].mxu0 %v530_v40  ;;  %1094 = vmatmul.mubr.bf16.gmra.mrb[48].mxu1 %v530_v40 }
  0x88   : > { %910 = vmatprep.mubr.bf16.mxu0 %v4964_v2  ;;  %1103 = vmatprep.mubr.bf16.mxu1 %v4964_v2 }
  0x8f   : > { %911 = vmatmul.mubr.bf16.gmra.mrb[52].mxu0 %v531_v43  ;;  %1104 = vmatmul.mubr.bf16.gmra.mrb[52].mxu1 %v531_v43 }
  0x90   : > { %920 = vmatprep.mubr.bf16.mxu0 %v4964_v2  ;;  %1113 = vmatprep.mubr.bf16.mxu1 %v4964_v2 }
  0x97   : > { %921 = vmatmul.mubr.bf16.gmra.mrb[56].mxu0 %v532_v46  ;;  %1114 = vmatmul.mubr.bf16.gmra.mrb[56].mxu1 %v532_v46 }
  0x98   : > { %930 = vmatprep.mubr.bf16.mxu0 %v4964_v2  ;;  %1123 = vmatprep.mubr.bf16.mxu1 %v4964_v2 }
  0x9f   : > { %931 = vmatmul.mubr.bf16.gmra.mrb[60].mxu0 %v533_v49  ;;  %1124 = vmatmul.mubr.bf16.gmra.mrb[60].mxu1 %v533_v49  ;;  %v4862_v49 = vld [vmem:[%s6118_s5 + $0x10] sm:$0xff]  }
  0xfa   : > { %v782_v62 = vpop.f32.mrb[0].mxu0  ;;  %v975_v63 = vpop.f32.mrb[0].mxu1 }
  0xfb   : > { %v783_v0 = vadd.f32 %v782_v62, %v5328_v58  ;;  %v976_v1 = vadd.f32 %v975_v63, %v5332_v59  ;;  %v784_v3 = vpop.f32.mrb[1].mxu0  ;;  %v977_v4 = vpop.f32.mrb[1].mxu1 }
  0xfc   : > { %v785_v5 = vadd.f32 %v784_v3, %v5336_v60  ;;  %v978_v6 = vadd.f32 %v977_v4, %v5340_v61  ;;  %v786_v7 = vpop.f32.mrb[2].mxu0  ;;  %v979_v8 = vpop.f32.mrb[2].mxu1 }
  0xfd   : > { %v1136_v9 = vmax.f32 %v976_v1, 0.0  ;;  %v787_v10 = vadd.f32 %v786_v7, %v5328_v58  ;;  %v980_v11 = vadd.f32 %v979_v8, %v5332_v59  ;;  %v788_v12 = vpop.f32.mrb[3].mxu0  ;;  %v981_v13 = vpop.f32.mrb[3].mxu1  ;;  %v1134_v17 = vmax.f32 %v783_v0, 0.0 }
  0xfe   : > { %v1137_v14 = vmax.f32 %v978_v6, 0.0  ;;  %v789_v15 = vadd.f32 %v788_v12, %v5336_v60  ;;  %v982_v16 = vadd.f32 %v981_v13, %v5340_v61  ;;  %v1135_v20 = vmax.f32 %v785_v5, 0.0 }
  0xff   : > { %v1138_v18 = vmax.f32 %v787_v10, 0.0  ;;  %v1140_v19 = vmax.f32 %v980_v11, 0.0 }
 0x100   : > { %v1139_v21 = vmax.f32 %v789_v15, 0.0  ;;  %v1141_v22 = vmax.f32 %v982_v16, 0.0 }
 0x101   : > { %v1262_v23 = vpack.c.bf16 %v1138_v18, %v1134_v17  ;;  %v1264_v24 = vpack.c.bf16 %v1140_v19, %v1136_v9  ;;  %v4863_v9 = vld [vmem:[%s6118_s5 + $0x18] sm:$0xff]  }
 0x102   : > { %v792_v25 = vpop.f32.mrb[4].mxu0  ;;  %v985_v26 = vpop.f32.mrb[4].mxu1  ;;  %v1263_v27 = vpack.c.bf16 %v1139_v21, %v1135_v20  ;;  %v1265_v28 = vpack.c.bf16 %v1141_v22, %v1137_v14 }
 0x103   : > { %v793_v29 = vadd.f32 %v792_v25, %v5328_v58  ;;  %v986_v30 = vadd.f32 %v985_v26, %v5332_v59  ;;  %v794_v31 = vpop.f32.mrb[5].mxu0  ;;  %v987_v32 = vpop.f32.mrb[5].mxu1  ;;  %v4864_v25 = vld [vmem:[%s6118_s5 + $0x20] sm:$0xff]  }
 0x104   : > { %v795_v34 = vadd.f32 %v794_v31, %v5336_v60  ;;  %v988_v35 = vadd.f32 %v987_v32, %v5340_v61  ;;  %v796_v36 = vpop.f32.mrb[6].mxu0  ;;  %v989_v37 = vpop.f32.mrb[6].mxu1  ;;  %1621 = vmatprep.mubr.bf16.mxu0 %v1263_v27  ;;  %1782 = vmatprep.mubr.bf16.mxu1 %v1265_v28 }
 0x105   : > { %v1144_v38 = vmax.f32 %v986_v30, 0.0  ;;  %v797_v39 = vadd.f32 %v796_v36, %v5328_v58  ;;  %v990_v40 = vadd.f32 %v989_v37, %v5332_v59  ;;  %v798_v41 = vpop.f32.mrb[7].mxu0  ;;  %v991_v42 = vpop.f32.mrb[7].mxu1  ;;  %1622 = vmatmul.mubr.bf16.vlgmr.msra.gmra.mrb[64].mxu0 %v1262_v23  ;;  %1783 = vmatmul.mubr.bf16.vlgmr.msra.gmra.mrb[64].mxu1 %v1264_v24  ;;  %v1142_v46 = vmax.f32 %v793_v29, 0.0 }
 0x106   : > { %v1145_v43 = vmax.f32 %v988_v35, 0.0  ;;  %v799_v44 = vadd.f32 %v798_v41, %v5336_v60  ;;  %v992_v45 = vadd.f32 %v991_v42, %v5340_v61  ;;  %4676 = vmatpush3.bf16.msra.mxu0 %v4860_v52  ;;  %v1143_v50 = vmax.f32 %v795_v34, 0.0 }
 0x107   : > { %v1146_v47 = vmax.f32 %v797_v39, 0.0  ;;  %v1148_v48 = vmax.f32 %v990_v40, 0.0  ;;  %4677 = vmatprep.subr.bf16.mxu0 %v4861_v33  ;;  %v4865_v39 = vld [vmem:[%s6118_s5 + $0x28] sm:$0xff]  }
 0x108   : > { %v1147_v55 = vmax.f32 %v799_v44, 0.0  ;;  %v1149_v62 = vmax.f32 %v992_v45, 0.0 }
 0x109   : > { %v1266_v63 = vpack.c.bf16 %v1146_v47, %v1142_v46  ;;  %v1268_v0 = vpack.c.bf16 %v1148_v48, %v1144_v38 }
 0x10a   : > { %v802_v1 = vpop.f32.mrb[8].mxu0  ;;  %v995_v3 = vpop.f32.mrb[8].mxu1  ;;  %v1267_v4 = vpack.c.bf16 %v1147_v55, %v1143_v50  ;;  %v1269_v5 = vpack.c.bf16 %v1149_v62, %v1145_v43  ;;  %4678 = vmatpush3.bf16.msra.mxu0 %v4861_v33 }
 0x10b   : > { %v803_v52 = vadd.f32 %v802_v1, %v5328_v58  ;;  %v996_v6 = vadd.f32 %v995_v3, %v5332_v59  ;;  %v804_v7 = vpop.f32.mrb[9].mxu0  ;;  %v997_v8 = vpop.f32.mrb[9].mxu1  ;;  %4679 = vmatprep.subr.bf16.mxu0 %v4862_v49  ;;  %v4866_v1 = vld [vmem:[%s6118_s5 + $0x30] sm:$0xff]  }
 0x10c   : > { %v805_v10 = vadd.f32 %v804_v7, %v5336_v60  ;;  %v998_v11 = vadd.f32 %v997_v8, %v5340_v61  ;;  %v806_v12 = vpop.f32.mrb[10].mxu0  ;;  %v999_v13 = vpop.f32.mrb[10].mxu1  ;;  %1629 = vmatprep.mubr.bf16.mxu0 %v1267_v4  ;;  %1790 = vmatprep.mubr.bf16.mxu1 %v1269_v5 }
 0x10d   : > { %v1152_v14 = vmax.f32 %v996_v6, 0.0  ;;  %v807_v15 = vadd.f32 %v806_v12, %v5328_v58  ;;  %v1000_v16 = vadd.f32 %v999_v13, %v5332_v59  ;;  %v808_v17 = vpop.f32.mrb[11].mxu0  ;;  %v1001_v18 = vpop.f32.mrb[11].mxu1  ;;  %1630 = vmatmul.mubr.bf16.gmra.mrb[68].mxu0 %v1266_v63  ;;  %1791 = vmatmul.mubr.bf16.gmra.mrb[68].mxu1 %v1268_v0  ;;  %v1150_v22 = vmax.f32 %v803_v52, 0.0 }
 0x10e   : > { %v1153_v19 = vmax.f32 %v998_v11, 0.0  ;;  %v809_v20 = vadd.f32 %v808_v17, %v5336_v60  ;;  %v1002_v21 = vadd.f32 %v1001_v18, %v5340_v61  ;;  %4680 = vmatpush3.bf16.msra.mxu0 %v4862_v49  ;;  %v1151_v26 = vmax.f32 %v805_v10, 0.0 }
 0x10f   : > { %v1154_v23 = vmax.f32 %v807_v15, 0.0  ;;  %v1156_v24 = vmax.f32 %v1000_v16, 0.0  ;;  %4681 = vmatprep.subr.bf16.mxu0 %v4863_v9 }
 0x110   : > { %v1155_v27 = vmax.f32 %v809_v20, 0.0  ;;  %v1157_v28 = vmax.f32 %v1002_v21, 0.0 }
 0x111   : > { %v1270_v29 = vpack.c.bf16 %v1154_v23, %v1150_v22  ;;  %v1272_v30 = vpack.c.bf16 %v1156_v24, %v1152_v14 }
 0x112   : > { %v812_v31 = vpop.f32.mrb[12].mxu0  ;;  %v1005_v32 = vpop.f32.mrb[12].mxu1  ;;  %v1271_v33 = vpack.c.bf16 %v1155_v27, %v1151_v26  ;;  %v1273_v34 = vpack.c.bf16 %v1157_v28, %v1153_v19  ;;  %4682 = vmatpush3.bf16.msra.mxu0 %v4863_v9 }
 0x113   : > { %v813_v35 = vadd.f32 %v812_v31, %v5328_v58  ;;  %v1006_v36 = vadd.f32 %v1005_v32, %v5332_v59  ;;  %v814_v37 = vpop.f32.mrb[13].mxu0  ;;  %v1007_v38 = vpop.f32.mrb[13].mxu1  ;;  %4683 = vmatprep.subr.bf16.mxu0 %v4864_v25 }
 0x114   : > { %v815_v40 = vadd.f32 %v814_v37, %v5336_v60  ;;  %v1008_v41 = vadd.f32 %v1007_v38, %v5340_v61  ;;  %v816_v42 = vpop.f32.mrb[14].mxu0  ;;  %v1009_v43 = vpop.f32.mrb[14].mxu1  ;;  %1637 = vmatprep.mubr.bf16.mxu0 %v1271_v33  ;;  %1798 = vmatprep.mubr.bf16.mxu1 %v1273_v34 }
 0x115   : > { %v1160_v44 = vmax.f32 %v1006_v36, 0.0  ;;  %v817_v45 = vadd.f32 %v816_v42, %v5328_v58  ;;  %v1010_v46 = vadd.f32 %v1009_v43, %v5332_v59  ;;  %v818_v47 = vpop.f32.mrb[15].mxu0  ;;  %v1011_v48 = vpop.f32.mrb[15].mxu1  ;;  %1638 = vmatmul.mubr.bf16.gmra.mrb[72].mxu0 %v1270_v29  ;;  %1799 = vmatmul.mubr.bf16.gmra.mrb[72].mxu1 %v1272_v30  ;;  %v1158_v62 = vmax.f32 %v813_v35, 0.0 }
 0x116   : > { %v1161_v49 = vmax.f32 %v1008_v41, 0.0  ;;  %v819_v50 = vadd.f32 %v818_v47, %v5336_v60  ;;  %v1012_v55 = vadd.f32 %v1011_v48, %v5340_v61  ;;  %4684 = vmatpush3.bf16.msra.mxu0 %v4864_v25  ;;  %v1159_v3 = vmax.f32 %v815_v40, 0.0 }
 0x117   : > { %v1162_v63 = vmax.f32 %v817_v45, 0.0  ;;  %v1164_v0 = vmax.f32 %v1010_v46, 0.0  ;;  %4685 = vmatprep.subr.bf16.mxu0 %v4865_v39 }
 0x118   : > { %v1163_v4 = vmax.f32 %v819_v50, 0.0  ;;  %v1165_v5 = vmax.f32 %v1012_v55, 0.0 }
 0x119   : > { %v1274_v52 = vpack.c.bf16 %v1162_v63, %v1158_v62  ;;  %v1276_v6 = vpack.c.bf16 %v1164_v0, %v1160_v44 }
 0x11a   : > { %v822_v7 = vpop.f32.mrb[16].mxu0  ;;  %v1015_v8 = vpop.f32.mrb[16].mxu1  ;;  %v1275_v9 = vpack.c.bf16 %v1163_v4, %v1159_v3  ;;  %v1277_v10 = vpack.c.bf16 %v1165_v5, %v1161_v49  ;;  %4686 = vmatpush3.bf16.msra.mxu0 %v4865_v39 }
 0x11b   : > { %v823_v11 = vadd.f32 %v822_v7, %v5328_v58  ;;  %v1016_v12 = vadd.f32 %v1015_v8, %v5332_v59  ;;  %v824_v13 = vpop.f32.mrb[17].mxu0  ;;  %v1017_v14 = vpop.f32.mrb[17].mxu1  ;;  %4687 = vmatprep.subr.bf16.mxu0 %v4866_v1 }
 0x11c   : > { %v825_v15 = vadd.f32 %v824_v13, %v5336_v60  ;;  %v1018_v16 = vadd.f32 %v1017_v14, %v5340_v61  ;;  %v826_v17 = vpop.f32.mrb[18].mxu0  ;;  %v1019_v18 = vpop.f32.mrb[18].mxu1  ;;  %1645 = vmatprep.mubr.bf16.mxu0 %v1275_v9  ;;  %1806 = vmatprep.mubr.bf16.mxu1 %v1277_v10 }
 0x11d   : > { %v1168_v19 = vmax.f32 %v1016_v12, 0.0  ;;  %v827_v20 = vadd.f32 %v826_v17, %v5328_v58  ;;  %v1020_v21 = vadd.f32 %v1019_v18, %v5332_v59  ;;  %v828_v22 = vpop.f32.mrb[19].mxu0  ;;  %v1021_v23 = vpop.f32.mrb[19].mxu1  ;;  %1646 = vmatmul.mubr.bf16.gmra.mrb[76].mxu0 %v1274_v52  ;;  %1807 = vmatmul.mubr.bf16.gmra.mrb[76].mxu1 %v1276_v6  ;;  %v1166_v27 = vmax.f32 %v823_v11, 0.0 }
 0x11e   : > { %v1169_v24 = vmax.f32 %v1018_v16, 0.0  ;;  %v829_v25 = vadd.f32 %v828_v22, %v5336_v60  ;;  %v1022_v26 = vadd.f32 %v1021_v23, %v5340_v61  ;;  %4688 = vmatpush3.bf16.msra.mxu0 %v4866_v1  ;;  %v1167_v30 = vmax.f32 %v825_v15, 0.0 }
 0x11f   : > { %v1170_v28 = vmax.f32 %v827_v20, 0.0  ;;  %v1172_v29 = vmax.f32 %v1020_v21, 0.0 }
 0x120   : > { %v1171_v31 = vmax.f32 %v829_v25, 0.0  ;;  %v1173_v32 = vmax.f32 %v1022_v26, 0.0 }
 0x121   : > { %v1278_v33 = vpack.c.bf16 %v1170_v28, %v1166_v27  ;;  %v1280_v34 = vpack.c.bf16 %v1172_v29, %v1168_v19 }
 0x122   : > { %v832_v35 = vpop.f32.mrb[20].mxu0  ;;  %v1025_v36 = vpop.f32.mrb[20].mxu1  ;;  %v1279_v37 = vpack.c.bf16 %v1171_v31, %v1167_v30  ;;  %v1281_v38 = vpack.c.bf16 %v1173_v32, %v1169_v24 }
 0x123   : > { %v833_v39 = vadd.f32 %v832_v35, %v5328_v58  ;;  %v1026_v40 = vadd.f32 %v1025_v36, %v5332_v59  ;;  %v834_v41 = vpop.f32.mrb[21].mxu0  ;;  %v1027_v42 = vpop.f32.mrb[21].mxu1 }
 0x124   : > { %v835_v43 = vadd.f32 %v834_v41, %v5336_v60  ;;  %v1028_v44 = vadd.f32 %v1027_v42, %v5340_v61  ;;  %v836_v45 = vpop.f32.mrb[22].mxu0  ;;  %v1029_v46 = vpop.f32.mrb[22].mxu1  ;;  %1653 = vmatprep.mubr.bf16.mxu0 %v1279_v37  ;;  %1814 = vmatprep.mubr.bf16.mxu1 %v1281_v38 }
 0x125   : > { %v1176_v47 = vmax.f32 %v1026_v40, 0.0  ;;  %v837_v48 = vadd.f32 %v836_v45, %v5328_v58  ;;  %v1030_v49 = vadd.f32 %v1029_v46, %v5332_v59  ;;  %v838_v50 = vpop.f32.mrb[23].mxu0  ;;  %v1031_v55 = vpop.f32.mrb[23].mxu1  ;;  %1654 = vmatmul.mubr.bf16.gmra.mrb[80].mxu0 %v1278_v33  ;;  %1815 = vmatmul.mubr.bf16.gmra.mrb[80].mxu1 %v1280_v34  ;;  %v1174_v1 = vmax.f32 %v833_v39, 0.0 }
 0x126   : > { %v1177_v62 = vmax.f32 %v1028_v44, 0.0  ;;  %v839_v63 = vadd.f32 %v838_v50, %v5336_v60  ;;  %v1032_v0 = vadd.f32 %v1031_v55, %v5340_v61  ;;  %v1175_v5 = vmax.f32 %v835_v43, 0.0 }
 0x127   : > { %v1178_v3 = vmax.f32 %v837_v48, 0.0  ;;  %v1180_v4 = vmax.f32 %v1030_v49, 0.0 }
 0x128   : > { %v1179_v52 = vmax.f32 %v839_v63, 0.0  ;;  %v1181_v6 = vmax.f32 %v1032_v0, 0.0 }
 0x129   : > { %v1282_v7 = vpack.c.bf16 %v1178_v3, %v1174_v1  ;;  %v1284_v8 = vpack.c.bf16 %v1180_v4, %v1176_v47 }
 0x12a   : > { %v842_v9 = vpop.f32.mrb[24].mxu0  ;;  %v1035_v10 = vpop.f32.mrb[24].mxu1  ;;  %v1283_v11 = vpack.c.bf16 %v1179_v52, %v1175_v5  ;;  %v1285_v12 = vpack.c.bf16 %v1181_v6, %v1177_v62 }
 0x12b   : > { %v843_v13 = vadd.f32 %v842_v9, %v5328_v58  ;;  %v1036_v14 = vadd.f32 %v1035_v10, %v5332_v59  ;;  %v844_v15 = vpop.f32.mrb[25].mxu0  ;;  %v1037_v16 = vpop.f32.mrb[25].mxu1 }
 0x12c   : > { %v845_v17 = vadd.f32 %v844_v15, %v5336_v60  ;;  %v1038_v18 = vadd.f32 %v1037_v16, %v5340_v61  ;;  %v846_v19 = vpop.f32.mrb[26].mxu0  ;;  %v1039_v20 = vpop.f32.mrb[26].mxu1  ;;  %1661 = vmatprep.mubr.bf16.mxu0 %v1283_v11  ;;  %1822 = vmatprep.mubr.bf16.mxu1 %v1285_v12 }
 0x12d   : > { %v1184_v21 = vmax.f32 %v1036_v14, 0.0  ;;  %v847_v22 = vadd.f32 %v846_v19, %v5328_v58  ;;  %v1040_v23 = vadd.f32 %v1039_v20, %v5332_v59  ;;  %v848_v24 = vpop.f32.mrb[27].mxu0  ;;  %v1041_v25 = vpop.f32.mrb[27].mxu1  ;;  %1662 = vmatmul.mubr.bf16.gmra.mrb[84].mxu0 %v1282_v7  ;;  %1823 = vmatmul.mubr.bf16.gmra.mrb[84].mxu1 %v1284_v8  ;;  %v1182_v29 = vmax.f32 %v843_v13, 0.0 }
 0x12e   : > { %v1185_v26 = vmax.f32 %v1038_v18, 0.0  ;;  %v849_v27 = vadd.f32 %v848_v24, %v5336_v60  ;;  %v1042_v28 = vadd.f32 %v1041_v25, %v5340_v61  ;;  %v1183_v32 = vmax.f32 %v845_v17, 0.0 }
 0x12f   : > { %v1186_v30 = vmax.f32 %v847_v22, 0.0  ;;  %v1188_v31 = vmax.f32 %v1040_v23, 0.0 }
 0x130   : > { %v1187_v33 = vmax.f32 %v849_v27, 0.0  ;;  %v1189_v34 = vmax.f32 %v1042_v28, 0.0 }
 0x131   : > { %v1286_v35 = vpack.c.bf16 %v1186_v30, %v1182_v29  ;;  %v1288_v36 = vpack.c.bf16 %v1188_v31, %v1184_v21 }
 0x132   : > { %v852_v37 = vpop.f32.mrb[28].mxu0  ;;  %v1045_v38 = vpop.f32.mrb[28].mxu1  ;;  %v1287_v39 = vpack.c.bf16 %v1187_v33, %v1183_v32  ;;  %v1289_v40 = vpack.c.bf16 %v1189_v34, %v1185_v26 }
 0x133   : > { %v853_v41 = vadd.f32 %v852_v37, %v5328_v58  ;;  %v1046_v42 = vadd.f32 %v1045_v38, %v5332_v59  ;;  %v854_v43 = vpop.f32.mrb[29].mxu0  ;;  %v1047_v44 = vpop.f32.mrb[29].mxu1 }
 0x134   : > { %v855_v45 = vadd.f32 %v854_v43, %v5336_v60  ;;  %v1048_v46 = vadd.f32 %v1047_v44, %v5340_v61  ;;  %v856_v47 = vpop.f32.mrb[30].mxu0  ;;  %v1049_v48 = vpop.f32.mrb[30].mxu1  ;;  %1669 = vmatprep.mubr.bf16.mxu0 %v1287_v39  ;;  %1830 = vmatprep.mubr.bf16.mxu1 %v1289_v40 }
 0x135   : > { %v1192_v49 = vmax.f32 %v1046_v42, 0.0  ;;  %v857_v50 = vadd.f32 %v856_v47, %v5328_v58  ;;  %v1050_v55 = vadd.f32 %v1049_v48, %v5332_v59  ;;  %v858_v62 = vpop.f32.mrb[31].mxu0  ;;  %v1051_v63 = vpop.f32.mrb[31].mxu1  ;;  %1670 = vmatmul.mubr.bf16.gmra.mrb[88].mxu0 %v1286_v35  ;;  %1831 = vmatmul.mubr.bf16.gmra.mrb[88].mxu1 %v1288_v36  ;;  %v1190_v4 = vmax.f32 %v853_v41, 0.0 }
 0x136   : > { %v1193_v0 = vmax.f32 %v1048_v46, 0.0  ;;  %v859_v1 = vadd.f32 %v858_v62, %v5336_v60  ;;  %v1052_v3 = vadd.f32 %v1051_v63, %v5340_v61  ;;  %v1191_v6 = vmax.f32 %v855_v45, 0.0 }
 0x137   : > { %v1194_v5 = vmax.f32 %v857_v50, 0.0  ;;  %v1196_v52 = vmax.f32 %v1050_v55, 0.0 }
 0x138   : > { %v1195_v7 = vmax.f32 %v859_v1, 0.0  ;;  %v1197_v8 = vmax.f32 %v1052_v3, 0.0 }
 0x139   : > { %v1290_v9 = vpack.c.bf16 %v1194_v5, %v1190_v4  ;;  %v1292_v10 = vpack.c.bf16 %v1196_v52, %v1192_v49 }
 0x13a   : > { %v862_v11 = vpop.f32.mrb[32].mxu0  ;;  %v1055_v12 = vpop.f32.mrb[32].mxu1  ;;  %v1291_v13 = vpack.c.bf16 %v1195_v7, %v1191_v6  ;;  %v1293_v14 = vpack.c.bf16 %v1197_v8, %v1193_v0 }
 0x13b   : > { %v863_v15 = vadd.f32 %v862_v11, %v5328_v58  ;;  %v1056_v16 = vadd.f32 %v1055_v12, %v5332_v59  ;;  %v864_v17 = vpop.f32.mrb[33].mxu0  ;;  %v1057_v18 = vpop.f32.mrb[33].mxu1 }
 0x13c   : > { %v865_v19 = vadd.f32 %v864_v17, %v5336_v60  ;;  %v1058_v20 = vadd.f32 %v1057_v18, %v5340_v61  ;;  %v866_v21 = vpop.f32.mrb[34].mxu0  ;;  %v1059_v22 = vpop.f32.mrb[34].mxu1  ;;  %1677 = vmatprep.mubr.bf16.mxu0 %v1291_v13  ;;  %1838 = vmatprep.mubr.bf16.mxu1 %v1293_v14 }
 0x13d   : > { %v1200_v23 = vmax.f32 %v1056_v16, 0.0  ;;  %v867_v24 = vadd.f32 %v866_v21, %v5328_v58  ;;  %v1060_v25 = vadd.f32 %v1059_v22, %v5332_v59  ;;  %v868_v26 = vpop.f32.mrb[35].mxu0  ;;  %v1061_v27 = vpop.f32.mrb[35].mxu1  ;;  %1678 = vmatmul.mubr.bf16.gmra.mrb[92].mxu0 %v1290_v9  ;;  %1839 = vmatmul.mubr.bf16.gmra.mrb[92].mxu1 %v1292_v10  ;;  %v1198_v31 = vmax.f32 %v863_v15, 0.0 }
 0x13e   : > { %v1201_v28 = vmax.f32 %v1058_v20, 0.0  ;;  %v869_v29 = vadd.f32 %v868_v26, %v5336_v60  ;;  %v1062_v30 = vadd.f32 %v1061_v27, %v5340_v61  ;;  %v1199_v34 = vmax.f32 %v865_v19, 0.0 }
 0x13f   : > { %v1202_v32 = vmax.f32 %v867_v24, 0.0  ;;  %v1204_v33 = vmax.f32 %v1060_v25, 0.0 }
 0x140   : > { %v1203_v35 = vmax.f32 %v869_v29, 0.0  ;;  %v1205_v36 = vmax.f32 %v1062_v30, 0.0 }
 0x141   : > { %v1294_v37 = vpack.c.bf16 %v1202_v32, %v1198_v31  ;;  %v1296_v38 = vpack.c.bf16 %v1204_v33, %v1200_v23 }
 0x142   : > { %v1295_v39 = vpack.c.bf16 %v1203_v35, %v1199_v34  ;;  %v1297_v40 = vpack.c.bf16 %v1205_v36, %v1201_v28  ;;  %v872_v41 = vpop.f32.mrb[36].mxu0  ;;  %v1065_v42 = vpop.f32.mrb[36].mxu1 }
 0x143   : > { %v873_v43 = vadd.f32 %v872_v41, %v5328_v58  ;;  %v1066_v44 = vadd.f32 %v1065_v42, %v5332_v59  ;;  %v874_v45 = vpop.f32.mrb[37].mxu0  ;;  %v1067_v46 = vpop.f32.mrb[37].mxu1 }
 0x144   : > { %v875_v47 = vadd.f32 %v874_v45, %v5336_v60  ;;  %v1068_v48 = vadd.f32 %v1067_v46, %v5340_v61  ;;  %v876_v49 = vpop.f32.mrb[38].mxu0  ;;  %v1069_v50 = vpop.f32.mrb[38].mxu1  ;;  %1685 = vmatprep.mubr.bf16.mxu0 %v1295_v39  ;;  %1846 = vmatprep.mubr.bf16.mxu1 %v1297_v40 }
 0x145   : > { %v1208_v55 = vmax.f32 %v1066_v44, 0.0  ;;  %v877_v62 = vadd.f32 %v876_v49, %v5328_v58  ;;  %v1070_v63 = vadd.f32 %v1069_v50, %v5332_v59  ;;  %v878_v0 = vpop.f32.mrb[39].mxu0  ;;  %v1071_v1 = vpop.f32.mrb[39].mxu1  ;;  %1686 = vmatmul.mubr.bf16.gmra.mrb[96].mxu0 %v1294_v37  ;;  %1847 = vmatmul.mubr.bf16.gmra.mrb[96].mxu1 %v1296_v38  ;;  %v1206_v52 = vmax.f32 %v873_v43, 0.0 }
 0x146   : > { %v1209_v3 = vmax.f32 %v1068_v48, 0.0  ;;  %v879_v4 = vadd.f32 %v878_v0, %v5336_v60  ;;  %v1072_v5 = vadd.f32 %v1071_v1, %v5340_v61  ;;  %v1207_v8 = vmax.f32 %v875_v47, 0.0 }
 0x147   : > { %v1210_v6 = vmax.f32 %v877_v62, 0.0  ;;  %v1212_v7 = vmax.f32 %v1070_v63, 0.0 }
 0x148   : > { %v1211_v9 = vmax.f32 %v879_v4, 0.0  ;;  %v1213_v10 = vmax.f32 %v1072_v5, 0.0 }
 0x149   : > { %v1298_v11 = vpack.c.bf16 %v1210_v6, %v1206_v52  ;;  %v1300_v12 = vpack.c.bf16 %v1212_v7, %v1208_v55 }
 0x14a   : > { %v1299_v13 = vpack.c.bf16 %v1211_v9, %v1207_v8  ;;  %v1301_v14 = vpack.c.bf16 %v1213_v10, %v1209_v3  ;;  %v882_v15 = vpop.f32.mrb[40].mxu0  ;;  %v1075_v16 = vpop.f32.mrb[40].mxu1 }
 0x14b   : > { %v883_v17 = vadd.f32 %v882_v15, %v5328_v58  ;;  %v1076_v18 = vadd.f32 %v1075_v16, %v5332_v59  ;;  %v884_v19 = vpop.f32.mrb[41].mxu0  ;;  %v1077_v20 = vpop.f32.mrb[41].mxu1 }
 0x14c   : > { %v885_v21 = vadd.f32 %v884_v19, %v5336_v60  ;;  %v1078_v22 = vadd.f32 %v1077_v20, %v5340_v61  ;;  %v886_v23 = vpop.f32.mrb[42].mxu0  ;;  %v1079_v24 = vpop.f32.mrb[42].mxu1  ;;  %1693 = vmatprep.mubr.bf16.mxu0 %v1299_v13  ;;  %1854 = vmatprep.mubr.bf16.mxu1 %v1301_v14 }
 0x14d   : > { %v1216_v25 = vmax.f32 %v1076_v18, 0.0  ;;  %v887_v26 = vadd.f32 %v886_v23, %v5328_v58  ;;  %v1080_v27 = vadd.f32 %v1079_v24, %v5332_v59  ;;  %v888_v28 = vpop.f32.mrb[43].mxu0  ;;  %v1081_v29 = vpop.f32.mrb[43].mxu1  ;;  %1694 = vmatmul.mubr.bf16.gmra.mrb[100].mxu0 %v1298_v11  ;;  %1855 = vmatmul.mubr.bf16.gmra.mrb[100].mxu1 %v1300_v12  ;;  %v1214_v33 = vmax.f32 %v883_v17, 0.0 }
 0x14e   : > { %v1217_v30 = vmax.f32 %v1078_v22, 0.0  ;;  %v889_v31 = vadd.f32 %v888_v28, %v5336_v60  ;;  %v1082_v32 = vadd.f32 %v1081_v29, %v5340_v61  ;;  %v1215_v36 = vmax.f32 %v885_v21, 0.0 }
 0x14f   : > { %v1218_v34 = vmax.f32 %v887_v26, 0.0  ;;  %v1220_v35 = vmax.f32 %v1080_v27, 0.0 }
 0x150   : > { %v1219_v37 = vmax.f32 %v889_v31, 0.0  ;;  %v1221_v38 = vmax.f32 %v1082_v32, 0.0 }
 0x151   : > { %v1302_v39 = vpack.c.bf16 %v1218_v34, %v1214_v33  ;;  %v1304_v40 = vpack.c.bf16 %v1220_v35, %v1216_v25 }
 0x152   : > { %v1303_v41 = vpack.c.bf16 %v1219_v37, %v1215_v36  ;;  %v1305_v42 = vpack.c.bf16 %v1221_v38, %v1217_v30  ;;  %v892_v43 = vpop.f32.mrb[44].mxu0  ;;  %v1085_v44 = vpop.f32.mrb[44].mxu1 }
 0x153   : > { %v893_v45 = vadd.f32 %v892_v43, %v5328_v58  ;;  %v1086_v46 = vadd.f32 %v1085_v44, %v5332_v59  ;;  %v894_v47 = vpop.f32.mrb[45].mxu0  ;;  %v1087_v48 = vpop.f32.mrb[45].mxu1 }
 0x154   : > { %v895_v49 = vadd.f32 %v894_v47, %v5336_v60  ;;  %v1088_v50 = vadd.f32 %v1087_v48, %v5340_v61  ;;  %v896_v55 = vpop.f32.mrb[46].mxu0  ;;  %v1089_v62 = vpop.f32.mrb[46].mxu1  ;;  %1701 = vmatprep.mubr.bf16.mxu0 %v1303_v41  ;;  %1862 = vmatprep.mubr.bf16.mxu1 %v1305_v42  ;;  %v4867_v47 = vld [vmem:[%s6118_s5 + $0x38] sm:$0xff]  }
 0x155   : > { %v1224_v63 = vmax.f32 %v1086_v46, 0.0  ;;  %v897_v0 = vadd.f32 %v896_v55, %v5328_v58  ;;  %v1090_v1 = vadd.f32 %v1089_v62, %v5332_v59  ;;  %v898_v3 = vpop.f32.mrb[47].mxu0  ;;  %v1091_v4 = vpop.f32.mrb[47].mxu1  ;;  %1702 = vmatmul.mubr.bf16.gmra.mrb[104].mxu0 %v1302_v39  ;;  %1863 = vmatmul.mubr.bf16.gmra.mrb[104].mxu1 %v1304_v40  ;;  %v1222_v7 = vmax.f32 %v893_v45, 0.0 }
 0x156   : > { %v1225_v5 = vmax.f32 %v1088_v50, 0.0  ;;  %v899_v52 = vadd.f32 %v898_v3, %v5336_v60  ;;  %v1092_v6 = vadd.f32 %v1091_v4, %v5340_v61  ;;  %v1223_v10 = vmax.f32 %v895_v49, 0.0  ;;  %4689 = vmatprep.subr.bf16.mxu0 %v4867_v47 }
 0x157   : > { %v1226_v8 = vmax.f32 %v897_v0, 0.0  ;;  %v1228_v9 = vmax.f32 %v1090_v1, 0.0  ;;  %4690 = vmatpush3.bf16.msra.mxu0 %v4867_v47 }
 0x158   : > { %v1227_v11 = vmax.f32 %v899_v52, 0.0  ;;  %v1229_v12 = vmax.f32 %v1092_v6, 0.0 }
 0x159   : > { %v1306_v13 = vpack.c.bf16 %v1226_v8, %v1222_v7  ;;  %v1308_v14 = vpack.c.bf16 %v1228_v9, %v1224_v63 }
 0x15a   : > { %v1307_v15 = vpack.c.bf16 %v1227_v11, %v1223_v10  ;;  %v1309_v16 = vpack.c.bf16 %v1229_v12, %v1225_v5  ;;  %v902_v17 = vpop.f32.mrb[48].mxu0  ;;  %v1095_v18 = vpop.f32.mrb[48].mxu1 }
 0x15b   : > { %v903_v19 = vadd.f32 %v902_v17, %v5328_v58  ;;  %v1096_v20 = vadd.f32 %v1095_v18, %v5332_v59  ;;  %v904_v21 = vpop.f32.mrb[49].mxu0  ;;  %v1097_v22 = vpop.f32.mrb[49].mxu1 }
 0x15c   : > { %v905_v23 = vadd.f32 %v904_v21, %v5336_v60  ;;  %v1098_v24 = vadd.f32 %v1097_v22, %v5340_v61  ;;  %v906_v25 = vpop.f32.mrb[50].mxu0  ;;  %v1099_v26 = vpop.f32.mrb[50].mxu1  ;;  %1709 = vmatprep.mubr.bf16.mxu0 %v1307_v15  ;;  %1870 = vmatprep.mubr.bf16.mxu1 %v1309_v16 }
 0x15d   : > { %v1232_v27 = vmax.f32 %v1096_v20, 0.0  ;;  %v907_v28 = vadd.f32 %v906_v25, %v5328_v58  ;;  %v1100_v29 = vadd.f32 %v1099_v26, %v5332_v59  ;;  %v908_v30 = vpop.f32.mrb[51].mxu0  ;;  %v1101_v31 = vpop.f32.mrb[51].mxu1  ;;  %1710 = vmatmul.mubr.bf16.gmra.mrb[108].mxu0 %v1306_v13  ;;  %1871 = vmatmul.mubr.bf16.gmra.mrb[108].mxu1 %v1308_v14  ;;  %v1230_v35 = vmax.f32 %v903_v19, 0.0 }
 0x15e   : > { %v1233_v32 = vmax.f32 %v1098_v24, 0.0  ;;  %v909_v33 = vadd.f32 %v908_v30, %v5336_v60  ;;  %v1102_v34 = vadd.f32 %v1101_v31, %v5340_v61  ;;  %v1231_v38 = vmax.f32 %v905_v23, 0.0 }
 0x15f   : > { %v1234_v36 = vmax.f32 %v907_v28, 0.0  ;;  %v1236_v37 = vmax.f32 %v1100_v29, 0.0 }
 0x160   : > { %v1235_v39 = vmax.f32 %v909_v33, 0.0  ;;  %v1237_v40 = vmax.f32 %v1102_v34, 0.0 }
 0x161   : > { %v1310_v41 = vpack.c.bf16 %v1234_v36, %v1230_v35  ;;  %v1312_v42 = vpack.c.bf16 %v1236_v37, %v1232_v27 }
 0x162   : > { %v1311_v43 = vpack.c.bf16 %v1235_v39, %v1231_v38  ;;  %v1313_v44 = vpack.c.bf16 %v1237_v40, %v1233_v32  ;;  %v912_v45 = vpop.f32.mrb[52].mxu0  ;;  %v1105_v46 = vpop.f32.mrb[52].mxu1 }
 0x163   : > { %v913_v48 = vadd.f32 %v912_v45, %v5328_v58  ;;  %v1106_v49 = vadd.f32 %v1105_v46, %v5332_v59  ;;  %v914_v50 = vpop.f32.mrb[53].mxu0  ;;  %v1107_v55 = vpop.f32.mrb[53].mxu1 }
 0x164   : > { %v915_v62 = vadd.f32 %v914_v50, %v5336_v60  ;;  %v1108_v63 = vadd.f32 %v1107_v55, %v5340_v61  ;;  %v916_v0 = vpop.f32.mrb[54].mxu0  ;;  %v1109_v1 = vpop.f32.mrb[54].mxu1  ;;  %1717 = vmatprep.mubr.bf16.mxu0 %v1311_v43  ;;  %1878 = vmatprep.mubr.bf16.mxu1 %v1313_v44 }
 0x165   : > { %v1240_v3 = vmax.f32 %v1106_v49, 0.0  ;;  %v917_v4 = vadd.f32 %v916_v0, %v5328_v58  ;;  %v1110_v5 = vadd.f32 %v1109_v1, %v5332_v59  ;;  %v918_v52 = vpop.f32.mrb[55].mxu0  ;;  %v1111_v6 = vpop.f32.mrb[55].mxu1  ;;  %1718 = vmatmul.mubr.bf16.gmra.mrb[112].mxu0 %v1310_v41  ;;  %1879 = vmatmul.mubr.bf16.gmra.mrb[112].mxu1 %v1312_v42  ;;  %v1238_v10 = vmax.f32 %v913_v48, 0.0 }
 0x166   : > { %v1241_v7 = vmax.f32 %v1108_v63, 0.0  ;;  %v919_v8 = vadd.f32 %v918_v52, %v5336_v60  ;;  %v1112_v9 = vadd.f32 %v1111_v6, %v5340_v61  ;;  %v1239_v13 = vmax.f32 %v915_v62, 0.0 }
 0x167   : > { %v1242_v11 = vmax.f32 %v917_v4, 0.0  ;;  %v1244_v12 = vmax.f32 %v1110_v5, 0.0 }
 0x168   : > { %v1243_v14 = vmax.f32 %v919_v8, 0.0  ;;  %v1245_v15 = vmax.f32 %v1112_v9, 0.0 }
 0x169   : > { %v1314_v16 = vpack.c.bf16 %v1242_v11, %v1238_v10  ;;  %v1316_v17 = vpack.c.bf16 %v1244_v12, %v1240_v3 }
 0x16a   : > { %v1315_v18 = vpack.c.bf16 %v1243_v14, %v1239_v13  ;;  %v1317_v19 = vpack.c.bf16 %v1245_v15, %v1241_v7  ;;  %v922_v20 = vpop.f32.mrb[56].mxu0  ;;  %v1115_v21 = vpop.f32.mrb[56].mxu1 }
 0x16b   : > { %v923_v22 = vadd.f32 %v922_v20, %v5328_v58  ;;  %v1116_v23 = vadd.f32 %v1115_v21, %v5332_v59  ;;  %v924_v24 = vpop.f32.mrb[57].mxu0  ;;  %v1117_v25 = vpop.f32.mrb[57].mxu1  ;;  %v5497_v21 = vld [vmem:[%s6117_s4] ss:$0 sm:$0xff] }
 0x16c   : > { %v925_v26 = vadd.f32 %v924_v24, %v5336_v60  ;;  %v1118_v27 = vadd.f32 %v1117_v25, %v5340_v61  ;;  %v926_v28 = vpop.f32.mrb[58].mxu0  ;;  %v1119_v29 = vpop.f32.mrb[58].mxu1  ;;  %1725 = vmatprep.mubr.bf16.mxu0 %v1315_v18  ;;  %1886 = vmatprep.mubr.bf16.mxu1 %v1317_v19 }
 0x16d   : > { %v1248_v30 = vmax.f32 %v1116_v23, 0.0  ;;  %v927_v31 = vadd.f32 %v926_v28, %v5328_v58  ;;  %v1120_v32 = vadd.f32 %v1119_v29, %v5332_v59  ;;  %v928_v33 = vpop.f32.mrb[59].mxu0  ;;  %v1121_v34 = vpop.f32.mrb[59].mxu1  ;;  %1726 = vmatmul.mubr.bf16.gmra.mrb[116].mxu0 %v1314_v16  ;;  %1887 = vmatmul.mubr.bf16.gmra.mrb[116].mxu1 %v1316_v17  ;;  %v1246_v38 = vmax.f32 %v923_v22, 0.0  ;;  %v4869_v28 = vld [vmem:[%s6120_s7 + $0x8] sm:$0xff]  }
 0x16e   : > { %v1249_v35 = vmax.f32 %v1118_v27, 0.0  ;;  %v929_v36 = vadd.f32 %v928_v33, %v5336_v60  ;;  %v1122_v37 = vadd.f32 %v1121_v34, %v5340_v61  ;;  %v1247_v41 = vmax.f32 %v925_v26, 0.0 }
 0x16f   : > { %v1250_v39 = vmax.f32 %v927_v31, 0.0  ;;  %v1252_v40 = vmax.f32 %v1120_v32, 0.0 }
 0x170   : > { %v1251_v42 = vmax.f32 %v929_v36, 0.0  ;;  %v1253_v43 = vmax.f32 %v1122_v37, 0.0  ;;  %v4870_v36 = vld [vmem:[%s6120_s7 + $0x10] sm:$0xff]   ;;  %v4871_v37 = vld [vmem:[%s6120_s7 + $0x18] sm:$0xff]  }
 0x171   : > { %v1318_v44 = vpack.c.bf16 %v1250_v39, %v1246_v38  ;;  %v1320_v45 = vpack.c.bf16 %v1252_v40, %v1248_v30 }
 0x172   : > { %v1319_v46 = vpack.c.bf16 %v1251_v42, %v1247_v41  ;;  %v1321_v47 = vpack.c.bf16 %v1253_v43, %v1249_v35  ;;  %v932_v48 = vpop.f32.mrb[60].mxu0  ;;  %v1125_v49 = vpop.f32.mrb[60].mxu1 }
 0x173   : > { %v933_v50 = vadd.f32 %v932_v48, %v5328_v58  ;;  %v1126_v55 = vadd.f32 %v1125_v49, %v5332_v59  ;;  %v934_v62 = vpop.f32.mrb[61].mxu0  ;;  %v1127_v63 = vpop.f32.mrb[61].mxu1  ;;  %v4872_v49 = vld [vmem:[%s6120_s7 + $0x20] sm:$0xff]  }
 0x174   : > { %v935_v0 = vadd.f32 %v934_v62, %v5336_v60  ;;  %v1128_v1 = vadd.f32 %v1127_v63, %v5340_v61  ;;  %v936_v3 = vpop.f32.mrb[62].mxu0  ;;  %v1129_v4 = vpop.f32.mrb[62].mxu1  ;;  %1733 = vmatprep.mubr.bf16.mxu0 %v1319_v46  ;;  %1894 = vmatprep.mubr.bf16.mxu1 %v1321_v47 }
 0x175   : > { %v1256_v5 = vmax.f32 %v1126_v55, 0.0  ;;  %v937_v52 = vadd.f32 %v936_v3, %v5328_v58  ;;  %v1130_v6 = vadd.f32 %v1129_v4, %v5332_v59  ;;  %v938_v7 = vpop.f32.mrb[63].mxu0  ;;  %v1131_v8 = vpop.f32.mrb[63].mxu1  ;;  %1734 = vmatmul.mubr.bf16.gmra.mrb[120].mxu0 %v1318_v44  ;;  %1895 = vmatmul.mubr.bf16.gmra.mrb[120].mxu1 %v1320_v45  ;;  %v1254_v12 = vmax.f32 %v933_v50, 0.0  ;;  %v4868_v59 = vld [vmem:[%s6120_s7] sm:$0xff]  }
 0x176   : > { %v1257_v9 = vmax.f32 %v1128_v1, 0.0  ;;  %v939_v10 = vadd.f32 %v938_v7, %v5336_v60  ;;  %v1132_v11 = vadd.f32 %v1131_v8, %v5340_v61  ;;  %v1255_v15 = vmax.f32 %v935_v0, 0.0  ;;  %4723 = vmatprep.subr.bf16.mxu1 %v4868_v59 }
 0x177   : > { %v1258_v13 = vmax.f32 %v937_v52, 0.0  ;;  %v1260_v14 = vmax.f32 %v1130_v6, 0.0  ;;  %4724 = vmatpush3.bf16.msra.mxu1 %v4868_v59 }
 0x178   : > { %v1259_v16 = vmax.f32 %v939_v10, 0.0  ;;  %v1261_v17 = vmax.f32 %v1132_v11, 0.0  ;;  %4725 = vmatprep.subr.bf16.mxu1 %v4869_v28 }
 0x179   : > { %v1322_v18 = vpack.c.bf16 %v1258_v13, %v1254_v12  ;;  %v1324_v19 = vpack.c.bf16 %v1260_v14, %v1256_v5  ;;  %v4873_v5 = vld [vmem:[%s6120_s7 + $0x28] sm:$0xff]  }
 0x17a   : > { %v1323_v58 = vpack.c.bf16 %v1259_v16, %v1255_v15  ;;  %v1325_v20 = vpack.c.bf16 %v1261_v17, %v1257_v9  ;;  %v4874_v16 = vld [vmem:[%s6120_s7 + $0x30] sm:$0xff]  }
 0x17b   : > { %4726 = vmatpush3.bf16.msra.mxu1 %v4869_v28 }
 0x17c   : > { %1741 = vmatprep.mubr.bf16.mxu0 %v1323_v58  ;;  %1902 = vmatprep.mubr.bf16.mxu1 %v1325_v20 }
 0x17d   : > { %1742 = vmatmul.mubr.bf16.gmra.mrb[124].mxu0 %v1322_v18  ;;  %1903 = vmatmul.mubr.bf16.gmra.mrb[124].mxu1 %v1324_v19 }
 0x17e   : > { %4727 = vmatprep.subr.bf16.mxu1 %v4870_v36 }
 0x17f   : > { %4728 = vmatpush3.bf16.msra.mxu1 %v4870_v36 }
 0x180   : > { %4729 = vmatprep.subr.bf16.mxu1 %v4871_v37 }
 0x183   : > { %4730 = vmatpush3.bf16.msra.mxu1 %v4871_v37 }
 0x184   : > { %4731 = vmatprep.subr.bf16.mxu1 %v4872_v49 }
 0x187   : > { %4732 = vmatpush3.bf16.msra.mxu1 %v4872_v49 }
 0x188   : > { %4733 = vmatprep.subr.bf16.mxu1 %v4873_v5 }
 0x18b   : > { %4734 = vmatpush3.bf16.msra.mxu1 %v4873_v5 }
 0x18c   : > { %4735 = vmatprep.subr.bf16.mxu1 %v4874_v16 }
 0x18f   : > { %4736 = vmatpush3.bf16.msra.mxu1 %v4874_v16 }
 0x1d8   : > { %v4195_v60 = vpop.f32.mrb[64].mxu0  ;;  %v4307_v61 = vpop.f32.mrb[64].mxu1 }
 0x1d9   : > { %v4196_v22 = vpop.f32.mrb[65].mxu0  ;;  %v4308_v23 = vpop.f32.mrb[65].mxu1 }
 0x1da   : > { %v4197_v24 = vadd.f32 %v4196_v22, %v4195_v60  ;;  %v4309_v25 = vadd.f32 %v4308_v23, %v4307_v61  ;;  %v4198_v26 = vpop.f32.mrb[66].mxu0  ;;  %v4310_v27 = vpop.f32.mrb[66].mxu1  ;;  %v4875_v22 = vld [vmem:[%s6120_s7 + $0x38] sm:$0xff]  }
 0x1db   : > { %v4199_v29 = vpop.f32.mrb[67].mxu0  ;;  %v4311_v30 = vpop.f32.mrb[67].mxu1  ;;  %4737 = vmatprep.subr.bf16.mxu1 %v4875_v22 }
 0x1dc   : > { %v1624_v31 = vadd.f32 %v4197_v24, %v5497_v21  ;;  %v4200_v32 = vadd.f32 %v4199_v29, %v4198_v26  ;;  %v4312_v33 = vadd.f32 %v4311_v30, %v4310_v27  ;;  %4738 = vmatpush3.bf16.msra.mxu1 %v4875_v22 }
 0x1de   : > { %v1785_v34 = vadd.f32 %v4309_v25, %v1624_v31  ;;  %v1627_v35 = vadd.f32 %v4200_v32, %v5497_v21 }
 0x1e0   : > { %v1788_v38 = vadd.f32 %v4312_v33, %v1627_v35  ;;  %v4201_v39 = vpop.f32.mrb[68].mxu0  ;;  %v4313_v40 = vpop.f32.mrb[68].mxu1  ;;  %v1911_v43 = vmax.f32 %v1785_v34, 0.0 }
 0x1e1   : > { %v4202_v41 = vpop.f32.mrb[69].mxu0  ;;  %v4314_v42 = vpop.f32.mrb[69].mxu1 }
 0x1e2   : > { %v1912_v44 = vmax.f32 %v1788_v38, 0.0  ;;  %v4203_v45 = vadd.f32 %v4202_v41, %v4201_v39  ;;  %v4315_v46 = vadd.f32 %v4314_v42, %v4313_v40  ;;  %v4204_v47 = vpop.f32.mrb[70].mxu0  ;;  %v4316_v48 = vpop.f32.mrb[70].mxu1 }
 0x1e3   : > { %v4205_v50 = vpop.f32.mrb[71].mxu0  ;;  %v4317_v55 = vpop.f32.mrb[71].mxu1 }
 0x1e4   : > { %v1632_v62 = vadd.f32 %v4203_v45, %v5497_v21  ;;  %v4206_v63 = vadd.f32 %v4205_v50, %v4204_v47  ;;  %v4318_v0 = vadd.f32 %v4317_v55, %v4316_v48  ;;  %v1943_v1 = vpack.c.bf16 %v1912_v44, %v1911_v43 }
 0x1e6   : > { %v1793_v3 = vadd.f32 %v4315_v46, %v1632_v62  ;;  %v1635_v4 = vadd.f32 %v4206_v63, %v5497_v21  ;;  %4691 = vmatprep.mubr.bf16.mxu0 %v1943_v1 }
 0x1e8   : > { %v1796_v52 = vadd.f32 %v4318_v0, %v1635_v4  ;;  %v4207_v6 = vpop.f32.mrb[72].mxu0  ;;  %v4319_v7 = vpop.f32.mrb[72].mxu1  ;;  %v1913_v10 = vmax.f32 %v1793_v3, 0.0 }
 0x1e9   : > { %v4208_v8 = vpop.f32.mrb[73].mxu0  ;;  %v4320_v9 = vpop.f32.mrb[73].mxu1 }
 0x1ea   : > { %v1914_v11 = vmax.f32 %v1796_v52, 0.0  ;;  %v4209_v12 = vadd.f32 %v4208_v8, %v4207_v6  ;;  %v4321_v13 = vadd.f32 %v4320_v9, %v4319_v7  ;;  %v4210_v14 = vpop.f32.mrb[74].mxu0  ;;  %v4322_v15 = vpop.f32.mrb[74].mxu1 }
 0x1eb   : > { %v4211_v17 = vpop.f32.mrb[75].mxu0  ;;  %v4323_v18 = vpop.f32.mrb[75].mxu1 }
 0x1ec   : > { %v1944_v19 = vpack.c.bf16 %v1914_v11, %v1913_v10  ;;  %v1640_v58 = vadd.f32 %v4209_v12, %v5497_v21  ;;  %v4212_v20 = vadd.f32 %v4211_v17, %v4210_v14  ;;  %v4324_v59 = vadd.f32 %v4323_v18, %v4322_v15 }
 0x1ee   : > { %v1801_v60 = vadd.f32 %v4321_v13, %v1640_v58  ;;  %v1643_v61 = vadd.f32 %v4212_v20, %v5497_v21  ;;  %4692 = vmatmul.mubr.bf16.vlgmr.msra.gmra.mrb[128].mxu0 %v1944_v19 }
 0x1f0   : > { %v1804_v23 = vadd.f32 %v4324_v59, %v1643_v61  ;;  %v4213_v24 = vpop.f32.mrb[76].mxu0  ;;  %v4325_v25 = vpop.f32.mrb[76].mxu1  ;;  %v1915_v28 = vmax.f32 %v1801_v60, 0.0 }
 0x1f1   : > { %v4214_v26 = vpop.f32.mrb[77].mxu0  ;;  %v4326_v27 = vpop.f32.mrb[77].mxu1 }
 0x1f2   : > { %v1916_v29 = vmax.f32 %v1804_v23, 0.0  ;;  %v4215_v30 = vadd.f32 %v4214_v26, %v4213_v24  ;;  %v4327_v31 = vadd.f32 %v4326_v27, %v4325_v25  ;;  %v4216_v32 = vpop.f32.mrb[78].mxu0  ;;  %v4328_v33 = vpop.f32.mrb[78].mxu1 }
 0x1f3   : > { %v4217_v34 = vpop.f32.mrb[79].mxu0  ;;  %v4329_v35 = vpop.f32.mrb[79].mxu1 }
 0x1f4   : > { %v1648_v36 = vadd.f32 %v4215_v30, %v5497_v21  ;;  %v4218_v37 = vadd.f32 %v4217_v34, %v4216_v32  ;;  %v4330_v38 = vadd.f32 %v4329_v35, %v4328_v33  ;;  %v1945_v39 = vpack.c.bf16 %v1916_v29, %v1915_v28 }
 0x1f6   : > { %v1809_v40 = vadd.f32 %v4327_v31, %v1648_v36  ;;  %v1651_v41 = vadd.f32 %v4218_v37, %v5497_v21  ;;  %4695 = vmatprep.mubr.bf16.mxu0 %v1945_v39 }
 0x1f8   : > { %v1812_v42 = vadd.f32 %v4330_v38, %v1651_v41  ;;  %v4219_v43 = vpop.f32.mrb[80].mxu0  ;;  %v4331_v44 = vpop.f32.mrb[80].mxu1  ;;  %v1917_v47 = vmax.f32 %v1809_v40, 0.0 }
 0x1f9   : > { %v4220_v45 = vpop.f32.mrb[81].mxu0  ;;  %v4332_v46 = vpop.f32.mrb[81].mxu1 }
 0x1fa   : > { %v1918_v48 = vmax.f32 %v1812_v42, 0.0  ;;  %v4221_v49 = vadd.f32 %v4220_v45, %v4219_v43  ;;  %v4333_v50 = vadd.f32 %v4332_v46, %v4331_v44  ;;  %v4222_v55 = vpop.f32.mrb[82].mxu0  ;;  %v4334_v62 = vpop.f32.mrb[82].mxu1 }
 0x1fb   : > { %v4223_v63 = vpop.f32.mrb[83].mxu0  ;;  %v4335_v0 = vpop.f32.mrb[83].mxu1 }
 0x1fc   : > { %v1656_v1 = vadd.f32 %v4221_v49, %v5497_v21  ;;  %v4224_v3 = vadd.f32 %v4223_v63, %v4222_v55  ;;  %v4336_v4 = vadd.f32 %v4335_v0, %v4334_v62  ;;  %v1946_v5 = vpack.c.bf16 %v1918_v48, %v1917_v47 }
 0x1fe   : > { %v1817_v52 = vadd.f32 %v4333_v50, %v1656_v1  ;;  %v1659_v6 = vadd.f32 %v4224_v3, %v5497_v21  ;;  %4696 = vmatmul.mubr.bf16.gmra.mrb[132].mxu0 %v1946_v5 }
 0x200   : > { %v1820_v7 = vadd.f32 %v4336_v4, %v1659_v6  ;;  %v4225_v8 = vpop.f32.mrb[84].mxu0  ;;  %v4337_v9 = vpop.f32.mrb[84].mxu1  ;;  %v1919_v12 = vmax.f32 %v1817_v52, 0.0 }
 0x201   : > { %v4226_v10 = vpop.f32.mrb[85].mxu0  ;;  %v4338_v11 = vpop.f32.mrb[85].mxu1 }
 0x202   : > { %v1920_v13 = vmax.f32 %v1820_v7, 0.0  ;;  %v4227_v14 = vadd.f32 %v4226_v10, %v4225_v8  ;;  %v4339_v15 = vadd.f32 %v4338_v11, %v4337_v9  ;;  %v4228_v16 = vpop.f32.mrb[86].mxu0  ;;  %v4340_v17 = vpop.f32.mrb[86].mxu1 }
 0x203   : > { %v4229_v18 = vpop.f32.mrb[87].mxu0  ;;  %v4341_v19 = vpop.f32.mrb[87].mxu1 }
 0x204   : > { %v1664_v58 = vadd.f32 %v4227_v14, %v5497_v21  ;;  %v4230_v20 = vadd.f32 %v4229_v18, %v4228_v16  ;;  %v4342_v59 = vadd.f32 %v4341_v19, %v4340_v17  ;;  %v1947_v60 = vpack.c.bf16 %v1920_v13, %v1919_v12 }
 0x206   : > { %v1825_v61 = vadd.f32 %v4339_v15, %v1664_v58  ;;  %v1667_v22 = vadd.f32 %v4230_v20, %v5497_v21  ;;  %4699 = vmatprep.mubr.bf16.mxu0 %v1947_v60 }
 0x208   : > { %v1828_v23 = vadd.f32 %v4342_v59, %v1667_v22  ;;  %v4231_v24 = vpop.f32.mrb[88].mxu0  ;;  %v4343_v25 = vpop.f32.mrb[88].mxu1  ;;  %v1921_v28 = vmax.f32 %v1825_v61, 0.0 }
 0x209   : > { %v4232_v26 = vpop.f32.mrb[89].mxu0  ;;  %v4344_v27 = vpop.f32.mrb[89].mxu1 }
 0x20a   : > { %v1922_v29 = vmax.f32 %v1828_v23, 0.0  ;;  %v4233_v30 = vadd.f32 %v4232_v26, %v4231_v24  ;;  %v4345_v31 = vadd.f32 %v4344_v27, %v4343_v25  ;;  %v4234_v32 = vpop.f32.mrb[90].mxu0  ;;  %v4346_v33 = vpop.f32.mrb[90].mxu1 }
 0x20b   : > { %v4235_v34 = vpop.f32.mrb[91].mxu0  ;;  %v4347_v35 = vpop.f32.mrb[91].mxu1 }
 0x20c   : > { %v1672_v36 = vadd.f32 %v4233_v30, %v5497_v21  ;;  %v4236_v37 = vadd.f32 %v4235_v34, %v4234_v32  ;;  %v4348_v38 = vadd.f32 %v4347_v35, %v4346_v33  ;;  %v1948_v39 = vpack.c.bf16 %v1922_v29, %v1921_v28 }
 0x20e   : > { %v1833_v40 = vadd.f32 %v4345_v31, %v1672_v36  ;;  %v1675_v41 = vadd.f32 %v4236_v37, %v5497_v21  ;;  %4700 = vmatmul.mubr.bf16.gmra.mrb[136].mxu0 %v1948_v39 }
 0x210   : > { %v1836_v42 = vadd.f32 %v4348_v38, %v1675_v41  ;;  %v4237_v43 = vpop.f32.mrb[92].mxu0  ;;  %v4349_v44 = vpop.f32.mrb[92].mxu1  ;;  %v1923_v47 = vmax.f32 %v1833_v40, 0.0 }
 0x211   : > { %v4238_v45 = vpop.f32.mrb[93].mxu0  ;;  %v4350_v46 = vpop.f32.mrb[93].mxu1 }
 0x212   : > { %v1924_v48 = vmax.f32 %v1836_v42, 0.0  ;;  %v4239_v49 = vadd.f32 %v4238_v45, %v4237_v43  ;;  %v4351_v50 = vadd.f32 %v4350_v46, %v4349_v44  ;;  %v4240_v55 = vpop.f32.mrb[94].mxu0  ;;  %v4352_v62 = vpop.f32.mrb[94].mxu1 }
 0x213   : > { %v4241_v63 = vpop.f32.mrb[95].mxu0  ;;  %v4353_v0 = vpop.f32.mrb[95].mxu1 }
 0x214   : > { %v1680_v1 = vadd.f32 %v4239_v49, %v5497_v21  ;;  %v4242_v3 = vadd.f32 %v4241_v63, %v4240_v55  ;;  %v4354_v4 = vadd.f32 %v4353_v0, %v4352_v62  ;;  %v1949_v5 = vpack.c.bf16 %v1924_v48, %v1923_v47 }
 0x216   : > { %v1841_v52 = vadd.f32 %v4351_v50, %v1680_v1  ;;  %v1683_v6 = vadd.f32 %v4242_v3, %v5497_v21  ;;  %4703 = vmatprep.mubr.bf16.mxu0 %v1949_v5 }
 0x218   : > { %v1844_v7 = vadd.f32 %v4354_v4, %v1683_v6  ;;  %v4243_v8 = vpop.f32.mrb[96].mxu0  ;;  %v4355_v9 = vpop.f32.mrb[96].mxu1  ;;  %v1925_v12 = vmax.f32 %v1841_v52, 0.0 }
 0x219   : > { %v4244_v10 = vpop.f32.mrb[97].mxu0  ;;  %v4356_v11 = vpop.f32.mrb[97].mxu1 }
 0x21a   : > { %v1926_v13 = vmax.f32 %v1844_v7, 0.0  ;;  %v4245_v14 = vadd.f32 %v4244_v10, %v4243_v8  ;;  %v4357_v15 = vadd.f32 %v4356_v11, %v4355_v9  ;;  %v4246_v16 = vpop.f32.mrb[98].mxu0  ;;  %v4358_v17 = vpop.f32.mrb[98].mxu1 }
 0x21b   : > { %v4247_v18 = vpop.f32.mrb[99].mxu0  ;;  %v4359_v19 = vpop.f32.mrb[99].mxu1 }
 0x21c   : > { %v1688_v58 = vadd.f32 %v4245_v14, %v5497_v21  ;;  %v4248_v20 = vadd.f32 %v4247_v18, %v4246_v16  ;;  %v4360_v59 = vadd.f32 %v4359_v19, %v4358_v17  ;;  %v1950_v60 = vpack.c.bf16 %v1926_v13, %v1925_v12 }
 0x21e   : > { %v1849_v61 = vadd.f32 %v4357_v15, %v1688_v58  ;;  %v1691_v22 = vadd.f32 %v4248_v20, %v5497_v21  ;;  %4704 = vmatmul.mubr.bf16.gmra.mrb[140].mxu0 %v1950_v60 }
 0x220   : > { %v1852_v23 = vadd.f32 %v4360_v59, %v1691_v22  ;;  %v4249_v24 = vpop.f32.mrb[100].mxu0  ;;  %v4361_v25 = vpop.f32.mrb[100].mxu1  ;;  %v1927_v28 = vmax.f32 %v1849_v61, 0.0 }
 0x221   : > { %v4250_v26 = vpop.f32.mrb[101].mxu0  ;;  %v4362_v27 = vpop.f32.mrb[101].mxu1 }
 0x222   : > { %v1928_v29 = vmax.f32 %v1852_v23, 0.0  ;;  %v4251_v30 = vadd.f32 %v4250_v26, %v4249_v24  ;;  %v4363_v31 = vadd.f32 %v4362_v27, %v4361_v25  ;;  %v4252_v32 = vpop.f32.mrb[102].mxu0  ;;  %v4364_v33 = vpop.f32.mrb[102].mxu1 }
 0x223   : > { %v4253_v34 = vpop.f32.mrb[103].mxu0  ;;  %v4365_v35 = vpop.f32.mrb[103].mxu1 }
 0x224   : > { %v1696_v36 = vadd.f32 %v4251_v30, %v5497_v21  ;;  %v4254_v37 = vadd.f32 %v4253_v34, %v4252_v32  ;;  %v4366_v38 = vadd.f32 %v4365_v35, %v4364_v33  ;;  %v1951_v39 = vpack.c.bf16 %v1928_v29, %v1927_v28 }
 0x226   : > { %v1857_v40 = vadd.f32 %v4363_v31, %v1696_v36  ;;  %v1699_v41 = vadd.f32 %v4254_v37, %v5497_v21  ;;  %4707 = vmatprep.mubr.bf16.mxu0 %v1951_v39 }
 0x228   : > { %v1860_v42 = vadd.f32 %v4366_v38, %v1699_v41  ;;  %v4255_v43 = vpop.f32.mrb[104].mxu0  ;;  %v4367_v44 = vpop.f32.mrb[104].mxu1  ;;  %v1929_v47 = vmax.f32 %v1857_v40, 0.0 }
 0x229   : > { %v4256_v45 = vpop.f32.mrb[105].mxu0  ;;  %v4368_v46 = vpop.f32.mrb[105].mxu1 }
 0x22a   : > { %v1930_v48 = vmax.f32 %v1860_v42, 0.0  ;;  %v4257_v49 = vadd.f32 %v4256_v45, %v4255_v43  ;;  %v4369_v50 = vadd.f32 %v4368_v46, %v4367_v44  ;;  %v4258_v55 = vpop.f32.mrb[106].mxu0  ;;  %v4370_v62 = vpop.f32.mrb[106].mxu1 }
 0x22b   : > { %v4259_v63 = vpop.f32.mrb[107].mxu0  ;;  %v4371_v0 = vpop.f32.mrb[107].mxu1 }
 0x22c   : > { %v1704_v1 = vadd.f32 %v4257_v49, %v5497_v21  ;;  %v4260_v3 = vadd.f32 %v4259_v63, %v4258_v55  ;;  %v4372_v4 = vadd.f32 %v4371_v0, %v4370_v62  ;;  %v1952_v5 = vpack.c.bf16 %v1930_v48, %v1929_v47 }
 0x22e   : > { %v1865_v52 = vadd.f32 %v4369_v50, %v1704_v1  ;;  %v1707_v6 = vadd.f32 %v4260_v3, %v5497_v21  ;;  %4708 = vmatmul.mubr.bf16.gmra.mrb[144].mxu0 %v1952_v5 }
 0x230   : > { %v1868_v7 = vadd.f32 %v4372_v4, %v1707_v6  ;;  %v4261_v8 = vpop.f32.mrb[108].mxu0  ;;  %v4373_v9 = vpop.f32.mrb[108].mxu1  ;;  %v1931_v12 = vmax.f32 %v1865_v52, 0.0 }
 0x231   : > { %v4262_v10 = vpop.f32.mrb[109].mxu0  ;;  %v4374_v11 = vpop.f32.mrb[109].mxu1 }
 0x232   : > { %v1932_v13 = vmax.f32 %v1868_v7, 0.0  ;;  %v4263_v14 = vadd.f32 %v4262_v10, %v4261_v8  ;;  %v4375_v15 = vadd.f32 %v4374_v11, %v4373_v9  ;;  %v4264_v16 = vpop.f32.mrb[110].mxu0  ;;  %v4376_v17 = vpop.f32.mrb[110].mxu1 }
 0x233   : > { %v4265_v18 = vpop.f32.mrb[111].mxu0  ;;  %v4377_v19 = vpop.f32.mrb[111].mxu1 }
 0x234   : > { %v1712_v58 = vadd.f32 %v4263_v14, %v5497_v21  ;;  %v4266_v20 = vadd.f32 %v4265_v18, %v4264_v16  ;;  %v4378_v59 = vadd.f32 %v4377_v19, %v4376_v17  ;;  %v1953_v60 = vpack.c.bf16 %v1932_v13, %v1931_v12 }
 0x236   : > { %v1873_v61 = vadd.f32 %v4375_v15, %v1712_v58  ;;  %v1715_v22 = vadd.f32 %v4266_v20, %v5497_v21  ;;  %4711 = vmatprep.mubr.bf16.mxu0 %v1953_v60 }
 0x238   : > { %v1876_v23 = vadd.f32 %v4378_v59, %v1715_v22  ;;  %v4267_v24 = vpop.f32.mrb[112].mxu0  ;;  %v4379_v25 = vpop.f32.mrb[112].mxu1  ;;  %v1933_v28 = vmax.f32 %v1873_v61, 0.0 }
 0x239   : > { %v4268_v26 = vpop.f32.mrb[113].mxu0  ;;  %v4380_v27 = vpop.f32.mrb[113].mxu1 }
 0x23a   : > { %v1934_v29 = vmax.f32 %v1876_v23, 0.0  ;;  %v4269_v30 = vadd.f32 %v4268_v26, %v4267_v24  ;;  %v4381_v31 = vadd.f32 %v4380_v27, %v4379_v25  ;;  %v4270_v32 = vpop.f32.mrb[114].mxu0  ;;  %v4382_v33 = vpop.f32.mrb[114].mxu1 }
 0x23b   : > { %v4271_v34 = vpop.f32.mrb[115].mxu0  ;;  %v4383_v35 = vpop.f32.mrb[115].mxu1 }
 0x23c   : > { %v1720_v36 = vadd.f32 %v4269_v30, %v5497_v21  ;;  %v4272_v37 = vadd.f32 %v4271_v34, %v4270_v32  ;;  %v4384_v38 = vadd.f32 %v4383_v35, %v4382_v33  ;;  %v1954_v39 = vpack.c.bf16 %v1934_v29, %v1933_v28 }
 0x23e   : > { %v1881_v40 = vadd.f32 %v4381_v31, %v1720_v36  ;;  %v1723_v41 = vadd.f32 %v4272_v37, %v5497_v21  ;;  %4712 = vmatmul.mubr.bf16.gmra.mrb[148].mxu0 %v1954_v39 }
 0x240   : > { %v1884_v42 = vadd.f32 %v4384_v38, %v1723_v41  ;;  %v4273_v43 = vpop.f32.mrb[116].mxu0  ;;  %v4385_v44 = vpop.f32.mrb[116].mxu1  ;;  %v1935_v47 = vmax.f32 %v1881_v40, 0.0 }
 0x241   : > { %v4274_v45 = vpop.f32.mrb[117].mxu0  ;;  %v4386_v46 = vpop.f32.mrb[117].mxu1 }
 0x242   : > { %v1936_v48 = vmax.f32 %v1884_v42, 0.0  ;;  %v4275_v49 = vadd.f32 %v4274_v45, %v4273_v43  ;;  %v4387_v50 = vadd.f32 %v4386_v46, %v4385_v44  ;;  %v4276_v55 = vpop.f32.mrb[118].mxu0  ;;  %v4388_v62 = vpop.f32.mrb[118].mxu1  ;;  %v4876_v46 = vld [vmem:[%s6122_s9] ss:$16 sps:$4 sm:$0xff]  }
 0x243   : > { %v4277_v63 = vpop.f32.mrb[119].mxu0  ;;  %v4389_v0 = vpop.f32.mrb[119].mxu1 }
 0x244   : > { %v1728_v1 = vadd.f32 %v4275_v49, %v5497_v21  ;;  %v4278_v3 = vadd.f32 %v4277_v63, %v4276_v55  ;;  %v4390_v4 = vadd.f32 %v4389_v0, %v4388_v62  ;;  %v1955_v5 = vpack.c.bf16 %v1936_v48, %v1935_v47  ;;  %v4878_v47 = vld [vmem:[%s6122_s9 + $0x4] ss:$16 sps:$4 sm:$0xff]   ;;  %v4882_v49 = vld [vmem:[%s6122_s9 + $0x20] ss:$16 sps:$4 sm:$0xff]  }
 0x245   : > { %v4884_v48 = vld [vmem:[%s6122_s9 + $0x24] ss:$16 sps:$4 sm:$0xff]   ;;  %2701 = vmatprep.subr.bf16.mxu0 %v4878_v47  ;;  %v5574_v55 = vld [vmem:[%s6119_s6] ss:$0 sm:$0xff] }
 0x246   : > { %v1889_v52 = vadd.f32 %v4387_v50, %v1728_v1  ;;  %v1731_v6 = vadd.f32 %v4278_v3, %v5497_v21  ;;  %4715 = vmatprep.mubr.bf16.mxu0 %v1955_v5  ;;  %2702 = vmatpush1.bf16.msra.mxu0 %v4876_v46  ;;  %v4890_v50 = vld [vmem:[%s6122_s9 + $0x44] ss:$16 sps:$4 sm:$0xff]   ;;  %v4888_v63 = vld [vmem:[%s6122_s9 + $0x40] ss:$16 sps:$4 sm:$0xff]  }
 0x247   : > { %2703 = vmatprep.subr.bf16.mxu0 %v4884_v48  ;;  %v4896_v3 = vld [vmem:[%s6122_s9 + $0x64] ss:$16 sps:$4 sm:$0xff]  }
 0x248   : > { %v1892_v7 = vadd.f32 %v4390_v4, %v1731_v6  ;;  %v4279_v8 = vpop.f32.mrb[120].mxu0  ;;  %v4391_v9 = vpop.f32.mrb[120].mxu1  ;;  %v1937_v12 = vmax.f32 %v1889_v52, 0.0 }
 0x249   : > { %v4280_v10 = vpop.f32.mrb[121].mxu0  ;;  %v4392_v11 = vpop.f32.mrb[121].mxu1 }
 0x24a   : > { %v1938_v13 = vmax.f32 %v1892_v7, 0.0  ;;  %v4281_v14 = vadd.f32 %v4280_v10, %v4279_v8  ;;  %v4393_v15 = vadd.f32 %v4392_v11, %v4391_v9  ;;  %v4282_v16 = vpop.f32.mrb[122].mxu0  ;;  %v4394_v17 = vpop.f32.mrb[122].mxu1  ;;  %2704 = vmatpush1.bf16.msra.mxu0 %v4882_v49  ;;  %v4894_v8 = vld [vmem:[%s6122_s9 + $0x60] ss:$16 sps:$4 sm:$0xff]  }
 0x24b   : > { %v4283_v18 = vpop.f32.mrb[123].mxu0  ;;  %v4395_v19 = vpop.f32.mrb[123].mxu1  ;;  %2705 = vmatprep.subr.bf16.mxu0 %v4890_v50  ;;  %v4902_v10 = vld [vmem:[%s6122_s9 + $0x84] ss:$16 sps:$4 sm:$0xff]  }
 0x24c   : > { %v1736_v58 = vadd.f32 %v4281_v14, %v5497_v21  ;;  %v4284_v20 = vadd.f32 %v4283_v18, %v4282_v16  ;;  %v4396_v59 = vadd.f32 %v4395_v19, %v4394_v17  ;;  %v1956_v60 = vpack.c.bf16 %v1938_v13, %v1937_v12  ;;  %v4879_v12 = vld [vmem:[%s6122_s9 + $0x8] ss:$16 sps:$4 sm:$0xff]   ;;  %v4887_v13 = vld [vmem:[%s6122_s9 + $0x2c] ss:$16 sps:$4 sm:$0xff]   ;;  %v4900_v14 = vld [vmem:[%s6122_s9 + $0x80] ss:$16 sps:$4 sm:$0xff]  }
 0x24d   : > { %v4885_v16 = vld [vmem:[%s6122_s9 + $0x28] ss:$16 sps:$4 sm:$0xff]   ;;  %v4893_v17 = vld [vmem:[%s6122_s9 + $0x4c] ss:$16 sps:$4 sm:$0xff]   ;;  %v4906_v18 = vld [vmem:[%s6122_s9 + $0xa0] ss:$16 sps:$4 sm:$0xff]  }
 0x24e   : > { %v1897_v61 = vadd.f32 %v4393_v15, %v1736_v58  ;;  %v1739_v22 = vadd.f32 %v4284_v20, %v5497_v21  ;;  %4716 = vmatmul.mubr.bf16.gmra.mrb[152].mxu0 %v1956_v60  ;;  %v4908_v15 = vld [vmem:[%s6122_s9 + $0xa4] ss:$16 sps:$4 sm:$0xff]   ;;  %v4891_v58 = vld [vmem:[%s6122_s9 + $0x48] ss:$16 sps:$4 sm:$0xff]   ;;  %v4899_v20 = vld [vmem:[%s6122_s9 + $0x6c] ss:$16 sps:$4 sm:$0xff]  }
 0x24f   : > { %2706 = vmatpush1.bf16.msra.mxu0 %v4888_v63  ;;  %v4914_v19 = vld [vmem:[%s6122_s9 + $0xc4] ss:$16 sps:$4 sm:$0xff]   ;;  %v4912_v60 = vld [vmem:[%s6122_s9 + $0xc0] ss:$16 sps:$4 sm:$0xff]  }
 0x250   : > { %v1900_v23 = vadd.f32 %v4396_v59, %v1739_v22  ;;  %v4285_v24 = vpop.f32.mrb[124].mxu0  ;;  %v4397_v25 = vpop.f32.mrb[124].mxu1  ;;  %v1939_v28 = vmax.f32 %v1897_v61, 0.0  ;;  %2707 = vmatprep.subr.bf16.mxu0 %v4896_v3 }
 0x251   : > { %v4286_v26 = vpop.f32.mrb[125].mxu0  ;;  %v4398_v27 = vpop.f32.mrb[125].mxu1 }
 0x252   : > { %v1940_v29 = vmax.f32 %v1900_v23, 0.0  ;;  %v4287_v30 = vadd.f32 %v4286_v26, %v4285_v24  ;;  %v4399_v31 = vadd.f32 %v4398_v27, %v4397_v25  ;;  %v4288_v32 = vpop.f32.mrb[126].mxu0  ;;  %v4400_v33 = vpop.f32.mrb[126].mxu1  ;;  %v4897_v25 = vld [vmem:[%s6122_s9 + $0x68] ss:$16 sps:$4 sm:$0xff]  }
 0x253   : > { %v4289_v34 = vpop.f32.mrb[127].mxu0  ;;  %v4401_v35 = vpop.f32.mrb[127].mxu1  ;;  %2708 = vmatpush1.bf16.msra.mxu0 %v4894_v8 }
 0x254   : > { %v1744_v36 = vadd.f32 %v4287_v30, %v5497_v21  ;;  %v4290_v37 = vadd.f32 %v4289_v34, %v4288_v32  ;;  %v4402_v38 = vadd.f32 %v4401_v35, %v4400_v33  ;;  %v1957_v39 = vpack.c.bf16 %v1940_v29, %v1939_v28  ;;  %2709 = vmatprep.subr.bf16.mxu0 %v4902_v10  ;;  %v4905_v28 = vld [vmem:[%s6122_s9 + $0x8c] ss:$16 sps:$4 sm:$0xff]   ;;  %v4903_v32 = vld [vmem:[%s6122_s9 + $0x88] ss:$16 sps:$4 sm:$0xff]  }
 0x255   : > { %v4911_v33 = vld [vmem:[%s6122_s9 + $0xac] ss:$16 sps:$4 sm:$0xff]   ;;  %v4909_v34 = vld [vmem:[%s6122_s9 + $0xa8] ss:$16 sps:$4 sm:$0xff]  }
 0x256   : > { %v1905_v40 = vadd.f32 %v4399_v31, %v1744_v36  ;;  %v1747_v41 = vadd.f32 %v4290_v37, %v5497_v21  ;;  %4719 = vmatprep.mubr.bf16.mxu0 %v1957_v39  ;;  %v4881_v21 = vld [vmem:[%s6122_s9 + $0xc] ss:$16 sps:$4 sm:$0xff]   ;;  %v4915_v36 = vld [vmem:[%s6122_s9 + $0xc8] ss:$16 sps:$4 sm:$0xff]  }
 0x257   : > { %2894 = vmatprep.subr.bf16.mxu1 %v4881_v21  ;;  %2710 = vmatpush1.bf16.msra.mxu0 %v4900_v14  ;;  %v4917_v35 = vld [vmem:[%s6122_s9 + $0xcc] ss:$16 sps:$4 sm:$0xff]  }
 0x258   : > { %v1908_v42 = vadd.f32 %v4402_v38, %v1747_v41  ;;  %v1941_v43 = vmax.f32 %v1905_v40, 0.0  ;;  %2711 = vmatprep.subr.bf16.mxu0 %v4908_v15 }
 0x25a   : > { %v1942_v44 = vmax.f32 %v1908_v42, 0.0 }
 0x25b   : > { %2712 = vmatpush1.bf16.msra.mxu0 %v4906_v18 }
 0x25c   : > { %v1958_v45 = vpack.c.bf16 %v1942_v44, %v1941_v43  ;;  %2713 = vmatprep.subr.bf16.mxu0 %v4914_v19 }
 0x25e   : > { %4720 = vmatmul.mubr.bf16.gmra.mrb[156].mxu0 %v1958_v45 }
 0x25f   : > { %2733 = vmatprep.mubr.bf16.mxu0 %v4964_v2  ;;  %2714 = vmatpush1.bf16.msra.mxu0 %v4912_v60 }
 0x2c1   : > { %v4693_v62 = vpop.f32.mrb[128].mxu0 }
 0x2c2   : > { %v2073_v0 = vadd.f32 %v4693_v62, %v5574_v55  ;;  %v2064_v1 = vpop.f32.mrb[129].mxu0 }
 0x2c3   : > { %v2065_v4 = vadd.f32 %v5574_v55, %v2064_v1  ;;  %v4694_v5 = vpop.f32.mrb[130].mxu0 }
 0x2c4   : > { %3866 = vst [vmem:[%s5580_s21 + $0x10] sm:$0xff] %v2073_v0  ;;  %v2076_v52 = vadd.f32 %v4694_v5, %v5574_v55  ;;  %v2067_v6 = vpop.f32.mrb[131].mxu0 }
 0x2c5   : > { %3864 = vst [vmem:[%s5580_s21] sm:$0xff] %v2065_v4  ;;  %v2068_v7 = vadd.f32 %v5574_v55, %v2067_v6 }
 0x2c6   : > { %v2192_v9 = vpack.c.bf16 %v2076_v52, %v2073_v0  ;;  %3867 = vst [vmem:[%s5580_s21 + $0x18] sm:$0xff] %v2076_v52 }
 0x2c7   : > { %v2191_v11 = vpack.c.bf16 %v2068_v7, %v2065_v4  ;;  %3865 = vst [vmem:[%s5580_s21 + $0x8] sm:$0xff] %v2068_v7 }
 0x2c9   : > { %4739 = vmatprep.mubr.bf16.mxu1 %v2191_v11 }
 0x2ca   : > { %4740 = vmatmul.mubr.bf16.vlgmr.msra.gmra.mrb[128].mxu1 %v2192_v9 }
 0x2cb   : > { %2895 = vmatpush1.bf16.msra.mxu1 %v4879_v12 }
 0x2cc   : > { %2896 = vmatprep.subr.bf16.mxu1 %v4887_v13 }
 0x2cf   : > { %2897 = vmatpush1.bf16.msra.mxu1 %v4885_v16 }
 0x2d0   : > { %2898 = vmatprep.subr.bf16.mxu1 %v4893_v17 }
 0x2d1   : > { %v4697_v59 = vpop.f32.mrb[132].mxu0 }
 0x2d2   : > { %v2089_v61 = vadd.f32 %v4697_v59, %v5574_v55  ;;  %v2080_v22 = vpop.f32.mrb[133].mxu0 }
 0x2d3   : > { %v2081_v23 = vadd.f32 %v5574_v55, %v2080_v22  ;;  %v4698_v24 = vpop.f32.mrb[134].mxu0  ;;  %2899 = vmatpush1.bf16.msra.mxu1 %v4891_v58  ;;  %v4920_v22 = vld [vmem:[%s6122_s9 + $0xe4] ss:$16 sps:$4 sm:$0xff]  }
 0x2d4   : > { %3870 = vst [vmem:[%s5580_s21 + $0x30] sm:$0xff] %v2089_v61  ;;  %v2092_v26 = vadd.f32 %v4698_v24, %v5574_v55  ;;  %v2083_v27 = vpop.f32.mrb[135].mxu0  ;;  %2900 = vmatprep.subr.bf16.mxu1 %v4899_v20  ;;  %2715 = vmatprep.subr.bf16.mxu0 %v4920_v22 }
 0x2d5   : > { %3868 = vst [vmem:[%s5580_s21 + $0x20] sm:$0xff] %v2081_v23  ;;  %v2084_v29 = vadd.f32 %v5574_v55, %v2083_v27 }
 0x2d6   : > { %v2194_v30 = vpack.c.bf16 %v2092_v26, %v2089_v61  ;;  %3871 = vst [vmem:[%s5580_s21 + $0x38] sm:$0xff] %v2092_v26  ;;  %v4918_v61 = vld [vmem:[%s6122_s9 + $0xe0] ss:$16 sps:$4 sm:$0xff]   ;;  %v4923_v26 = vld [vmem:[%s6122_s9 + $0xec] ss:$16 sps:$4 sm:$0xff]  }
 0x2d7   : > { %v2193_v31 = vpack.c.bf16 %v2084_v29, %v2081_v23  ;;  %3869 = vst [vmem:[%s5580_s21 + $0x28] sm:$0xff] %v2084_v29  ;;  %2901 = vmatpush1.bf16.msra.mxu1 %v4897_v25  ;;  %v4921_v25 = vld [vmem:[%s6122_s9 + $0xe8] ss:$16 sps:$4 sm:$0xff]   ;;  %2716 = vmatpush1.bf16.msra.mxu0 %v4918_v61 }
 0x2d8   : > { %2902 = vmatprep.subr.bf16.mxu1 %v4905_v28 }
 0x2d9   : > { %4743 = vmatprep.mubr.bf16.mxu1 %v2193_v31 }
 0x2da   : > { %4744 = vmatmul.mubr.bf16.gmra.mrb[132].mxu1 %v2194_v30 }
 0x2db   : > { %2903 = vmatpush1.bf16.msra.mxu1 %v4903_v32 }
 0x2dc   : > { %2904 = vmatprep.subr.bf16.mxu1 %v4911_v33 }
 0x2df   : > { %2905 = vmatpush1.bf16.msra.mxu1 %v4909_v34 }
 0x2e0   : > { %2906 = vmatprep.subr.bf16.mxu1 %v4917_v35 }
 0x2e1   : > { %v4701_v37 = vpop.f32.mrb[136].mxu0 }
 0x2e2   : > { %v2105_v38 = vadd.f32 %v4701_v37, %v5574_v55  ;;  %v2096_v39 = vpop.f32.mrb[137].mxu0 }
 0x2e3   : > { %v2097_v40 = vadd.f32 %v5574_v55, %v2096_v39  ;;  %v4702_v41 = vpop.f32.mrb[138].mxu0  ;;  %2907 = vmatpush1.bf16.msra.mxu1 %v4915_v36 }
 0x2e4   : > { %3874 = vst [vmem:[%s5580_s21 + $0x50] sm:$0xff] %v2105_v38  ;;  %v2108_v42 = vadd.f32 %v4702_v41, %v5574_v55  ;;  %v2099_v43 = vpop.f32.mrb[139].mxu0  ;;  %2908 = vmatprep.subr.bf16.mxu1 %v4923_v26 }
 0x2e5   : > { %3872 = vst [vmem:[%s5580_s21 + $0x40] sm:$0xff] %v2097_v40  ;;  %v2100_v44 = vadd.f32 %v5574_v55, %v2099_v43 }
 0x2e6   : > { %v2196_v45 = vpack.c.bf16 %v2108_v42, %v2105_v38  ;;  %3875 = vst [vmem:[%s5580_s21 + $0x58] sm:$0xff] %v2108_v42 }
 0x2e7   : > { %v2195_v46 = vpack.c.bf16 %v2100_v44, %v2097_v40  ;;  %3873 = vst [vmem:[%s5580_s21 + $0x48] sm:$0xff] %v2100_v44  ;;  %2909 = vmatpush1.bf16.msra.mxu1 %v4921_v25  ;;  %v4924_v44 = vld [vmem:[%s6124_s11 + $0x40] sm:$0xff]  }
 0x2e8   : > { %4451 = vmatprep.subr.bf16.mxu0 %v4924_v44 }
 0x2e9   : > { %4747 = vmatprep.mubr.bf16.mxu1 %v2195_v46 }
 0x2ea   : > { %4748 = vmatmul.mubr.bf16.gmra.mrb[136].mxu1 %v2196_v45  ;;  %v4926_v45 = vld [vmem:[%s6124_s11 + $0xc0] sm:$0xff]  }
 0x2eb   : > { %4563 = vmatprep.subr.bf16.mxu1 %v4926_v45 }
 0x2f1   : > { %v4705_v47 = vpop.f32.mrb[140].mxu0 }
 0x2f2   : > { %v2121_v21 = vadd.f32 %v4705_v47, %v5574_v55  ;;  %v2112_v48 = vpop.f32.mrb[141].mxu0 }
 0x2f3   : > { %v2113_v49 = vadd.f32 %v5574_v55, %v2112_v48  ;;  %v4706_v50 = vpop.f32.mrb[142].mxu0 }
 0x2f4   : > { %3878 = vst [vmem:[%s5580_s21 + $0x70] sm:$0xff] %v2121_v21  ;;  %v2124_v62 = vadd.f32 %v4706_v50, %v5574_v55  ;;  %v2115_v63 = vpop.f32.mrb[143].mxu0 }
 0x2f5   : > { %3876 = vst [vmem:[%s5580_s21 + $0x60] sm:$0xff] %v2113_v49  ;;  %v2116_v0 = vadd.f32 %v5574_v55, %v2115_v63 }
 0x2f6   : > { %v2198_v1 = vpack.c.bf16 %v2124_v62, %v2121_v21  ;;  %3879 = vst [vmem:[%s5580_s21 + $0x78] sm:$0xff] %v2124_v62 }
 0x2f7   : > { %v2197_v3 = vpack.c.bf16 %v2116_v0, %v2113_v49  ;;  %3877 = vst [vmem:[%s5580_s21 + $0x68] sm:$0xff] %v2116_v0 }
 0x2f9   : > { %4751 = vmatprep.mubr.bf16.mxu1 %v2197_v3 }
 0x2fa   : > { %4752 = vmatmul.mubr.bf16.gmra.mrb[140].mxu1 %v2198_v1 }
 0x301   : > { %v4709_v4 = vpop.f32.mrb[144].mxu0 }
 0x302   : > { %v2137_v5 = vadd.f32 %v4709_v4, %v5574_v55  ;;  %v2128_v52 = vpop.f32.mrb[145].mxu0 }
 0x303   : > { %v2129_v6 = vadd.f32 %v5574_v55, %v2128_v52  ;;  %v4710_v7 = vpop.f32.mrb[146].mxu0 }
 0x304   : > { %3882 = vst [vmem:[%s5580_s21 + $0x90] sm:$0xff] %v2137_v5  ;;  %v2140_v8 = vadd.f32 %v4710_v7, %v5574_v55  ;;  %v2131_v9 = vpop.f32.mrb[147].mxu0  ;;  %v4927_v7 = vld [vmem:[%s6124_s11 + $0x80] sm:$0xff]  }
 0x305   : > { %3880 = vst [vmem:[%s5580_s21 + $0x80] sm:$0xff] %v2129_v6  ;;  %v2132_v10 = vadd.f32 %v5574_v55, %v2131_v9  ;;  %v4930_v9 = vld [vmem:[%s6124_s11 + $0xc8] sm:$0xff]  }
 0x306   : > { %v2200_v11 = vpack.c.bf16 %v2140_v8, %v2137_v5  ;;  %3883 = vst [vmem:[%s5580_s21 + $0x98] sm:$0xff] %v2140_v8  ;;  %v4928_v8 = vld [vmem:[%s6124_s11 + $0x48] sm:$0xff]  }
 0x307   : > { %v2199_v12 = vpack.c.bf16 %v2132_v10, %v2129_v6  ;;  %3881 = vst [vmem:[%s5580_s21 + $0x88] sm:$0xff] %v2132_v10  ;;  %v4925_v6 = vld [vmem:[%s6124_s11] sm:$0xff]   ;;  %v4929_v10 = vld [vmem:[%s6124_s11 + $0x8] sm:$0xff]  }
 0x309   : > { %4755 = vmatprep.mubr.bf16.mxu1 %v2199_v12  ;;  %v4932_v12 = vld [vmem:[%s6124_s11 + $0x50] sm:$0xff]  }
 0x30a   : > { %4756 = vmatmul.mubr.bf16.gmra.mrb[144].mxu1 %v2200_v11  ;;  %v4931_v11 = vld [vmem:[%s6124_s11 + $0x88] sm:$0xff]  }
 0x311   : > { %v4713_v13 = vpop.f32.mrb[148].mxu0 }
 0x312   : > { %v2153_v14 = vadd.f32 %v4713_v13, %v5574_v55  ;;  %v2144_v15 = vpop.f32.mrb[149].mxu0  ;;  %v4934_v13 = vld [vmem:[%s6124_s11 + $0xd0] sm:$0xff]  }
 0x313   : > { %v2145_v16 = vadd.f32 %v5574_v55, %v2144_v15  ;;  %v4714_v17 = vpop.f32.mrb[150].mxu0  ;;  %v4933_v15 = vld [vmem:[%s6124_s11 + $0x10] sm:$0xff]  }
 0x314   : > { %3886 = vst [vmem:[%s5580_s21 + $0xb0] sm:$0xff] %v2153_v14  ;;  %v2156_v18 = vadd.f32 %v4714_v17, %v5574_v55  ;;  %v2147_v19 = vpop.f32.mrb[151].mxu0 }
 0x315   : > { %3884 = vst [vmem:[%s5580_s21 + $0xa0] sm:$0xff] %v2145_v16  ;;  %v2148_v58 = vadd.f32 %v5574_v55, %v2147_v19  ;;  %v4936_v19 = vld [vmem:[%s6124_s11 + $0x58] sm:$0xff]  }
 0x316   : > { %v2202_v20 = vpack.c.bf16 %v2156_v18, %v2153_v14  ;;  %3887 = vst [vmem:[%s5580_s21 + $0xb8] sm:$0xff] %v2156_v18 }
 0x317   : > { %v2201_v59 = vpack.c.bf16 %v2148_v58, %v2145_v16  ;;  %3885 = vst [vmem:[%s5580_s21 + $0xa8] sm:$0xff] %v2148_v58  ;;  %v4935_v16 = vld [vmem:[%s6124_s11 + $0x90] sm:$0xff]   ;;  %v4938_v58 = vld [vmem:[%s6124_s11 + $0xd8] sm:$0xff]  }
 0x319   : > { %4759 = vmatprep.mubr.bf16.mxu1 %v2201_v59 }
 0x31a   : > { %4760 = vmatmul.mubr.bf16.gmra.mrb[148].mxu1 %v2202_v20 }
 0x321   : > { %v4717_v60 = vpop.f32.mrb[152].mxu0 }
 0x322   : > { %v2169_v23 = vadd.f32 %v4717_v60, %v5574_v55  ;;  %v2160_v24 = vpop.f32.mrb[153].mxu0 }
 0x323   : > { %v2161_v27 = vadd.f32 %v5574_v55, %v2160_v24  ;;  %v4718_v28 = vpop.f32.mrb[154].mxu0  ;;  %v4939_v24 = vld [vmem:[%s6124_s11 + $0x98] sm:$0xff]  }
 0x324   : > { %3890 = vst [vmem:[%s5580_s21 + $0xd0] sm:$0xff] %v2169_v23  ;;  %v2172_v29 = vadd.f32 %v4718_v28, %v5574_v55  ;;  %v2163_v30 = vpop.f32.mrb[155].mxu0  ;;  %v4942_v28 = vld [vmem:[%s6124_s11 + $0xe0] sm:$0xff]  }
 0x325   : > { %3888 = vst [vmem:[%s5580_s21 + $0xc0] sm:$0xff] %v2161_v27  ;;  %v2164_v31 = vadd.f32 %v5574_v55, %v2163_v30 }
 0x326   : > { %v2204_v32 = vpack.c.bf16 %v2172_v29, %v2169_v23  ;;  %3891 = vst [vmem:[%s5580_s21 + $0xd8] sm:$0xff] %v2172_v29  ;;  %v4937_v23 = vld [vmem:[%s6124_s11 + $0x18] sm:$0xff]  }
 0x327   : > { %v2203_v33 = vpack.c.bf16 %v2164_v31, %v2161_v27  ;;  %3889 = vst [vmem:[%s5580_s21 + $0xc8] sm:$0xff] %v2164_v31  ;;  %v4940_v27 = vld [vmem:[%s6124_s11 + $0x60] sm:$0xff]  }
 0x329   : > { %4763 = vmatprep.mubr.bf16.mxu1 %v2203_v33  ;;  %v4941_v33 = vld [vmem:[%s6124_s11 + $0x20] sm:$0xff]  }
 0x32a   : > { %4764 = vmatmul.mubr.bf16.gmra.mrb[152].mxu1 %v2204_v32 }
 0x331   : > { %v4721_v34 = vpop.f32.mrb[156].mxu0 }
 0x332   : > { %v2185_v35 = vadd.f32 %v4721_v34, %v5574_v55  ;;  %v2176_v36 = vpop.f32.mrb[157].mxu0  ;;  %v4943_v34 = vld [vmem:[%s6124_s11 + $0xa0] sm:$0xff]  }
 0x333   : > { %v2177_v37 = vadd.f32 %v5574_v55, %v2176_v36  ;;  %v4722_v38 = vpop.f32.mrb[158].mxu0  ;;  %v4946_v36 = vld [vmem:[%s6124_s11 + $0xe8] sm:$0xff]  }
 0x334   : > { %3894 = vst [vmem:[%s5580_s21 + $0xf0] sm:$0xff] %v2185_v35  ;;  %v2188_v39 = vadd.f32 %v4722_v38, %v5574_v55  ;;  %v2179_v40 = vpop.f32.mrb[159].mxu0  ;;  %v4947_v38 = vld [vmem:[%s6124_s11 + $0xa8] sm:$0xff]  }
 0x335   : > { %3892 = vst [vmem:[%s5580_s21 + $0xe0] sm:$0xff] %v2177_v37  ;;  %v2180_v41 = vadd.f32 %v5574_v55, %v2179_v40  ;;  %v5734_v55 = vld [vmem:[%s6121_s8] ss:$0 sm:$0xff]  ;;  %v4950_v40 = vld [vmem:[%s6124_s11 + $0xf0] sm:$0xff]  }
 0x336   : > { %v2206_v42 = vpack.c.bf16 %v2188_v39, %v2185_v35  ;;  %3895 = vst [vmem:[%s5580_s21 + $0xf8] sm:$0xff] %v2188_v39  ;;  %v4944_v35 = vld [vmem:[%s6124_s11 + $0x68] sm:$0xff]   ;;  %v4948_v39 = vld [vmem:[%s6124_s11 + $0x70] sm:$0xff]  }
 0x337   : > { %v2205_v43 = vpack.c.bf16 %v2180_v41, %v2177_v37  ;;  %3893 = vst [vmem:[%s5580_s21 + $0xe8] sm:$0xff] %v2180_v41  ;;  %v4945_v37 = vld [vmem:[%s6124_s11 + $0x28] sm:$0xff]  }
 0x339   : > { %4767 = vmatprep.mubr.bf16.mxu1 %v2205_v43  ;;  %v4951_v43 = vld [vmem:[%s6124_s11 + $0xb0] sm:$0xff]  }
 0x33a   : > { %4768 = vmatmul.mubr.bf16.gmra.mrb[156].mxu1 %v2206_v42  ;;  %v4949_v42 = vld [vmem:[%s6124_s11 + $0x30] sm:$0xff]  }
 0x33b   : > { %2926 = vmatprep.mubr.bf16.mxu1 %v4964_v2 }
 0x39d   : > { %v4741_v46 = vpop.f32.mrb[128].mxu1 }
 0x39e   : > { %v2321_v47 = vadd.f32 %v4741_v46, %v5734_v55  ;;  %v2312_v21 = vpop.f32.mrb[129].mxu1  ;;  %v4952_v46 = vld [vmem:[%s6124_s11 + $0x78] sm:$0xff]  }
 0x39f   : > { %v2313_v48 = vadd.f32 %v5734_v55, %v2312_v21  ;;  %v4742_v49 = vpop.f32.mrb[130].mxu1 }
 0x3a0   : > { %v2324_v50 = vadd.f32 %v4742_v49, %v5734_v55  ;;  %v2315_v62 = vpop.f32.mrb[131].mxu1  ;;  %v2441_v0 = vmax.f32 %v2321_v47, 0.0  ;;  %v4954_v47 = vld [vmem:[%s6124_s11 + $0xf8] sm:$0xff]  }
 0x3a1   : > { %v2316_v63 = vadd.f32 %v5734_v55, %v2315_v62  ;;  %v2439_v3 = vmax.f32 %v2313_v48, 0.0 }
 0x3a2   : > { %v2442_v1 = vmax.f32 %v2324_v50, 0.0 }
 0x3a3   : > { %v2440_v4 = vmax.f32 %v2316_v63, 0.0  ;;  %v4953_v63 = vld [vmem:[%s6124_s11 + $0x38] sm:$0xff]  }
 0x3a4   : > { %v2472_v5 = vpack.c.bf16 %v2442_v1, %v2441_v0  ;;  %v4955_v0 = vld [vmem:[%s6124_s11 + $0xb8] sm:$0xff]  }
 0x3a5   : > { %v2471_v52 = vpack.c.bf16 %v2440_v4, %v2439_v3 }
 0x3a7   : > { %2734 = vmatmul.mubr.bf16.vlgmr.msra.gmra.mrb[160].mxu0 %v2471_v52  ;;  %2927 = vmatmul.mubr.bf16.vlgmr.msra.gmra.mrb[160].mxu1 %v2471_v52 }
 0x3a8   : > { %2743 = vmatprep.mubr.bf16.mxu0 %v4964_v2  ;;  %2936 = vmatprep.mubr.bf16.mxu1 %v4964_v2 }
 0x3a9   : > { %4452 = vmatpush3.bf16.msra.mxu0 %v4925_v6  ;;  %4564 = vmatpush3.bf16.msra.mxu1 %v4927_v7 }
 0x3aa   : > { %4453 = vmatprep.subr.bf16.mxu0 %v4928_v8  ;;  %4565 = vmatprep.subr.bf16.mxu1 %v4930_v9 }
 0x3ad   : > { %v4745_v14 = vpop.f32.mrb[132].mxu1  ;;  %4454 = vmatpush3.bf16.msra.mxu0 %v4929_v10  ;;  %4566 = vmatpush3.bf16.msra.mxu1 %v4931_v11 }
 0x3ae   : > { %v2337_v17 = vadd.f32 %v4745_v14, %v5734_v55  ;;  %v2328_v18 = vpop.f32.mrb[133].mxu1  ;;  %4455 = vmatprep.subr.bf16.mxu0 %v4932_v12  ;;  %4567 = vmatprep.subr.bf16.mxu1 %v4934_v13 }
 0x3af   : > { %v2329_v20 = vadd.f32 %v5734_v55, %v2328_v18  ;;  %v4746_v59 = vpop.f32.mrb[134].mxu1  ;;  %2744 = vmatmul.mubr.bf16.gmra.mrb[164].mxu0 %v2472_v5  ;;  %2937 = vmatmul.mubr.bf16.gmra.mrb[164].mxu1 %v2472_v5 }
 0x3b0   : > { %v2340_v60 = vadd.f32 %v4746_v59, %v5734_v55  ;;  %v2331_v61 = vpop.f32.mrb[135].mxu1  ;;  %2753 = vmatprep.mubr.bf16.mxu0 %v4964_v2  ;;  %2946 = vmatprep.mubr.bf16.mxu1 %v4964_v2  ;;  %v2445_v25 = vmax.f32 %v2337_v17, 0.0 }
 0x3b1   : > { %v2332_v22 = vadd.f32 %v5734_v55, %v2331_v61  ;;  %4456 = vmatpush3.bf16.msra.mxu0 %v4933_v15  ;;  %4568 = vmatpush3.bf16.msra.mxu1 %v4935_v16  ;;  %v2443_v29 = vmax.f32 %v2329_v20, 0.0 }
 0x3b2   : > { %v2446_v26 = vmax.f32 %v2340_v60, 0.0  ;;  %4457 = vmatprep.subr.bf16.mxu0 %v4936_v19  ;;  %4569 = vmatprep.subr.bf16.mxu1 %v4938_v58 }
 0x3b3   : > { %v2444_v30 = vmax.f32 %v2332_v22, 0.0 }
 0x3b4   : > { %v2474_v31 = vpack.c.bf16 %v2446_v26, %v2445_v25 }
 0x3b5   : > { %v2473_v32 = vpack.c.bf16 %v2444_v30, %v2443_v29  ;;  %4458 = vmatpush3.bf16.msra.mxu0 %v4937_v23  ;;  %4570 = vmatpush3.bf16.msra.mxu1 %v4939_v24 }
 0x3b6   : > { %4459 = vmatprep.subr.bf16.mxu0 %v4940_v27  ;;  %4571 = vmatprep.subr.bf16.mxu1 %v4942_v28 }
 0x3b7   : > { %2754 = vmatmul.mubr.bf16.gmra.mrb[168].mxu0 %v2473_v32  ;;  %2947 = vmatmul.mubr.bf16.gmra.mrb[168].mxu1 %v2473_v32 }
 0x3b8   : > { %2763 = vmatprep.mubr.bf16.mxu0 %v4964_v2  ;;  %2956 = vmatprep.mubr.bf16.mxu1 %v4964_v2 }
 0x3b9   : > { %4460 = vmatpush3.bf16.msra.mxu0 %v4941_v33  ;;  %4572 = vmatpush3.bf16.msra.mxu1 %v4943_v34 }
 0x3ba   : > { %4461 = vmatprep.subr.bf16.mxu0 %v4944_v35  ;;  %4573 = vmatprep.subr.bf16.mxu1 %v4946_v36 }
 0x3bd   : > { %v4749_v41 = vpop.f32.mrb[136].mxu1  ;;  %4462 = vmatpush3.bf16.msra.mxu0 %v4945_v37  ;;  %4574 = vmatpush3.bf16.msra.mxu1 %v4947_v38 }
 0x3be   : > { %v2353_v44 = vadd.f32 %v4749_v41, %v5734_v55  ;;  %v2344_v45 = vpop.f32.mrb[137].mxu1  ;;  %4463 = vmatprep.subr.bf16.mxu0 %v4948_v39  ;;  %4575 = vmatprep.subr.bf16.mxu1 %v4950_v40 }
 0x3bf   : > { %v2345_v21 = vadd.f32 %v5734_v55, %v2344_v45  ;;  %v4750_v48 = vpop.f32.mrb[138].mxu1  ;;  %2764 = vmatmul.mubr.bf16.gmra.mrb[172].mxu0 %v2474_v31  ;;  %2957 = vmatmul.mubr.bf16.gmra.mrb[172].mxu1 %v2474_v31 }
 0x3c0   : > { %v2356_v49 = vadd.f32 %v4750_v48, %v5734_v55  ;;  %v2347_v50 = vpop.f32.mrb[139].mxu1  ;;  %2773 = vmatprep.mubr.bf16.mxu0 %v4964_v2  ;;  %2966 = vmatprep.mubr.bf16.mxu1 %v4964_v2  ;;  %v2449_v1 = vmax.f32 %v2353_v44, 0.0 }
 0x3c1   : > { %v2348_v62 = vadd.f32 %v5734_v55, %v2347_v50  ;;  %4464 = vmatpush3.bf16.msra.mxu0 %v4949_v42  ;;  %4576 = vmatpush3.bf16.msra.mxu1 %v4951_v43  ;;  %v2447_v4 = vmax.f32 %v2345_v21, 0.0 }
 0x3c2   : > { %v2450_v3 = vmax.f32 %v2356_v49, 0.0  ;;  %4465 = vmatprep.subr.bf16.mxu0 %v4952_v46  ;;  %4577 = vmatprep.subr.bf16.mxu1 %v4954_v47 }
 0x3c3   : > { %v2448_v5 = vmax.f32 %v2348_v62, 0.0 }
 0x3c4   : > { %v2476_v52 = vpack.c.bf16 %v2450_v3, %v2449_v1 }
 0x3c5   : > { %v2475_v6 = vpack.c.bf16 %v2448_v5, %v2447_v4  ;;  %4466 = vmatpush3.bf16.msra.mxu0 %v4953_v63  ;;  %4578 = vmatpush3.bf16.msra.mxu1 %v4955_v0 }
 0x3c7   : > { %2774 = vmatmul.mubr.bf16.gmra.mrb[176].mxu0 %v2475_v6  ;;  %2967 = vmatmul.mubr.bf16.gmra.mrb[176].mxu1 %v2475_v6 }
 0x3c8   : > { %2783 = vmatprep.mubr.bf16.mxu0 %v4964_v2  ;;  %2976 = vmatprep.mubr.bf16.mxu1 %v4964_v2 }
 0x3cd   : > { %v4753_v7 = vpop.f32.mrb[140].mxu1 }
 0x3ce   : > { %v2369_v8 = vadd.f32 %v4753_v7, %v5734_v55  ;;  %v2360_v9 = vpop.f32.mrb[141].mxu1 }
 0x3cf   : > { %v2361_v10 = vadd.f32 %v5734_v55, %v2360_v9  ;;  %v4754_v11 = vpop.f32.mrb[142].mxu1  ;;  %2784 = vmatmul.mubr.bf16.gmra.mrb[180].mxu0 %v2476_v52  ;;  %2977 = vmatmul.mubr.bf16.gmra.mrb[180].mxu1 %v2476_v52 }
 0x3d0   : > { %v2372_v12 = vadd.f32 %v4754_v11, %v5734_v55  ;;  %v2363_v13 = vpop.f32.mrb[143].mxu1  ;;  %2793 = vmatprep.mubr.bf16.mxu0 %v4964_v2  ;;  %2986 = vmatprep.mubr.bf16.mxu1 %v4964_v2  ;;  %v2453_v15 = vmax.f32 %v2369_v8, 0.0 }
 0x3d1   : > { %v2364_v14 = vadd.f32 %v5734_v55, %v2363_v13  ;;  %v2451_v17 = vmax.f32 %v2361_v10, 0.0 }
 0x3d2   : > { %v2454_v16 = vmax.f32 %v2372_v12, 0.0 }
 0x3d3   : > { %v2452_v18 = vmax.f32 %v2364_v14, 0.0 }
 0x3d4   : > { %v2478_v19 = vpack.c.bf16 %v2454_v16, %v2453_v15 }
 0x3d5   : > { %v2477_v58 = vpack.c.bf16 %v2452_v18, %v2451_v17 }
 0x3d7   : > { %2794 = vmatmul.mubr.bf16.gmra.mrb[184].mxu0 %v2477_v58  ;;  %2987 = vmatmul.mubr.bf16.gmra.mrb[184].mxu1 %v2477_v58  ;;  %v2519_v58 = vld [vmem:[%s6123_s10] sm:$0xf] }
 0x3d8   : > { %2803 = vmatprep.mubr.bf16.mxu0 %v4964_v2  ;;  %2996 = vmatprep.mubr.bf16.mxu1 %v4964_v2 }
 0x3dd   : > { %v4757_v20 = vpop.f32.mrb[144].mxu1 }
 0x3de   : > { %v2385_v59 = vadd.f32 %v4757_v20, %v5734_v55  ;;  %v2376_v60 = vpop.f32.mrb[145].mxu1  ;;  %v5897_v20 = vrot.slane %v2519_v58, %v578_v54 }
 0x3df   : > { %v2377_v61 = vadd.f32 %v5734_v55, %v2376_v60  ;;  %v4758_v22 = vpop.f32.mrb[146].mxu1  ;;  %2804 = vmatmul.mubr.bf16.gmra.mrb[188].mxu0 %v2478_v19  ;;  %2997 = vmatmul.mubr.bf16.gmra.mrb[188].mxu1 %v2478_v19 }
 0x3e0   : > { %v2388_v23 = vadd.f32 %v4758_v22, %v5734_v55  ;;  %v2379_v24 = vpop.f32.mrb[147].mxu1  ;;  %2813 = vmatprep.mubr.bf16.mxu0 %v4964_v2  ;;  %3006 = vmatprep.mubr.bf16.mxu1 %v4964_v2  ;;  %v2457_v26 = vmax.f32 %v2385_v59, 0.0  ;;  %v5901_v59 = vrot.slane %v2519_v58, %v574_v56 }
 0x3e1   : > { %v2380_v25 = vadd.f32 %v5734_v55, %v2379_v24  ;;  %v2455_v28 = vmax.f32 %v2377_v61, 0.0 }
 0x3e2   : > { %v2458_v27 = vmax.f32 %v2388_v23, 0.0 }
 0x3e3   : > { %v2456_v29 = vmax.f32 %v2380_v25, 0.0 }
 0x3e4   : > { %v2480_v30 = vpack.c.bf16 %v2458_v27, %v2457_v26 }
 0x3e5   : > { %v2479_v31 = vpack.c.bf16 %v2456_v29, %v2455_v28 }
 0x3e7   : > { %2814 = vmatmul.mubr.bf16.gmra.mrb[192].mxu0 %v2479_v31  ;;  %3007 = vmatmul.mubr.bf16.gmra.mrb[192].mxu1 %v2479_v31 }
 0x3e8   : > { %2823 = vmatprep.mubr.bf16.mxu0 %v4964_v2  ;;  %3016 = vmatprep.mubr.bf16.mxu1 %v4964_v2 }
 0x3ed   : > { %v4761_v32 = vpop.f32.mrb[148].mxu1 }
 0x3ee   : > { %v2401_v33 = vadd.f32 %v4761_v32, %v5734_v55  ;;  %v2392_v34 = vpop.f32.mrb[149].mxu1 }
 0x3ef   : > { %v2393_v35 = vadd.f32 %v5734_v55, %v2392_v34  ;;  %v4762_v36 = vpop.f32.mrb[150].mxu1  ;;  %2824 = vmatmul.mubr.bf16.gmra.mrb[196].mxu0 %v2480_v30  ;;  %3017 = vmatmul.mubr.bf16.gmra.mrb[196].mxu1 %v2480_v30 }
 0x3f0   : > { %v2404_v37 = vadd.f32 %v4762_v36, %v5734_v55  ;;  %v2395_v38 = vpop.f32.mrb[151].mxu1  ;;  %2833 = vmatprep.mubr.bf16.mxu0 %v4964_v2  ;;  %3026 = vmatprep.mubr.bf16.mxu1 %v4964_v2  ;;  %v2461_v40 = vmax.f32 %v2401_v33, 0.0 }
 0x3f1   : > { %v2396_v39 = vadd.f32 %v5734_v55, %v2395_v38  ;;  %v2459_v42 = vmax.f32 %v2393_v35, 0.0 }
 0x3f2   : > { %v2462_v41 = vmax.f32 %v2404_v37, 0.0 }
 0x3f3   : > { %v2460_v43 = vmax.f32 %v2396_v39, 0.0 }
 0x3f4   : > { %v2482_v44 = vpack.c.bf16 %v2462_v41, %v2461_v40 }
 0x3f5   : > { %v2481_v45 = vpack.c.bf16 %v2460_v43, %v2459_v42 }
 0x3f7   : > { %2834 = vmatmul.mubr.bf16.gmra.mrb[200].mxu0 %v2481_v45  ;;  %3027 = vmatmul.mubr.bf16.gmra.mrb[200].mxu1 %v2481_v45 }
 0x3f8   : > { %2843 = vmatprep.mubr.bf16.mxu0 %v4964_v2  ;;  %3036 = vmatprep.mubr.bf16.mxu1 %v4964_v2 }
 0x3fd   : > { %v4765_v46 = vpop.f32.mrb[152].mxu1 }
 0x3fe   : > { %v2417_v47 = vadd.f32 %v4765_v46, %v5734_v55  ;;  %v2408_v21 = vpop.f32.mrb[153].mxu1 }
 0x3ff   : > { %v2409_v48 = vadd.f32 %v5734_v55, %v2408_v21  ;;  %v4766_v49 = vpop.f32.mrb[154].mxu1  ;;  %2844 = vmatmul.mubr.bf16.gmra.mrb[204].mxu0 %v2482_v44  ;;  %3037 = vmatmul.mubr.bf16.gmra.mrb[204].mxu1 %v2482_v44 }
 0x400   : > { %v2420_v50 = vadd.f32 %v4766_v49, %v5734_v55  ;;  %v2411_v62 = vpop.f32.mrb[155].mxu1  ;;  %2853 = vmatprep.mubr.bf16.mxu0 %v4964_v2  ;;  %3046 = vmatprep.mubr.bf16.mxu1 %v4964_v2  ;;  %v2465_v0 = vmax.f32 %v2417_v47, 0.0 }
 0x401   : > { %v2412_v63 = vadd.f32 %v5734_v55, %v2411_v62  ;;  %v2463_v3 = vmax.f32 %v2409_v48, 0.0 }
 0x402   : > { %v2466_v1 = vmax.f32 %v2420_v50, 0.0 }
 0x403   : > { %v2464_v4 = vmax.f32 %v2412_v63, 0.0 }
 0x404   : > { %v2484_v5 = vpack.c.bf16 %v2466_v1, %v2465_v0 }
 0x405   : > { %v2483_v52 = vpack.c.bf16 %v2464_v4, %v2463_v3 }
 0x407   : > { %2854 = vmatmul.mubr.bf16.gmra.mrb[208].mxu0 %v2483_v52  ;;  %3047 = vmatmul.mubr.bf16.gmra.mrb[208].mxu1 %v2483_v52 }
 0x408   : > { %2863 = vmatprep.mubr.bf16.mxu0 %v4964_v2  ;;  %3056 = vmatprep.mubr.bf16.mxu1 %v4964_v2 }
 0x40d   : > { %v4769_v6 = vpop.f32.mrb[156].mxu1 }
 0x40e   : > { %v2433_v7 = vadd.f32 %v4769_v6, %v5734_v55  ;;  %v2424_v8 = vpop.f32.mrb[157].mxu1 }
 0x40f   : > { %v2425_v9 = vadd.f32 %v5734_v55, %v2424_v8  ;;  %v4770_v10 = vpop.f32.mrb[158].mxu1  ;;  %2864 = vmatmul.mubr.bf16.gmra.mrb[212].mxu0 %v2484_v5  ;;  %3057 = vmatmul.mubr.bf16.gmra.mrb[212].mxu1 %v2484_v5 }
 0x410   : > { %v2436_v11 = vadd.f32 %v4770_v10, %v5734_v55  ;;  %v2427_v12 = vpop.f32.mrb[159].mxu1  ;;  %2873 = vmatprep.mubr.bf16.mxu0 %v4964_v2  ;;  %3066 = vmatprep.mubr.bf16.mxu1 %v4964_v2  ;;  %v2469_v14 = vmax.f32 %v2433_v7, 0.0 }
 0x411   : > { %v2428_v13 = vadd.f32 %v5734_v55, %v2427_v12  ;;  %v2467_v16 = vmax.f32 %v2425_v9, 0.0  ;;  %v5893_v55 = vrot.slane %v2519_v58, %v570_v53 }
 0x412   : > { %v2470_v15 = vmax.f32 %v2436_v11, 0.0 }
 0x413   : > { %v2468_v17 = vmax.f32 %v2428_v13, 0.0 }
 0x414   : > { %v2486_v18 = vpack.c.bf16 %v2470_v15, %v2469_v14 }
 0x415   : > { %v2485_v19 = vpack.c.bf16 %v2468_v17, %v2467_v16 }
 0x417   : > { %2874 = vmatmul.mubr.bf16.gmra.mrb[216].mxu0 %v2485_v19  ;;  %3067 = vmatmul.mubr.bf16.gmra.mrb[216].mxu1 %v2485_v19 }
 0x418   : > { %2883 = vmatprep.mubr.bf16.mxu0 %v4964_v2  ;;  %3076 = vmatprep.mubr.bf16.mxu1 %v4964_v2  ;;  %v5905_v2 = vrot.slane %v2519_v58, %v582_v57 }
 0x41f   : > { %2884 = vmatmul.mubr.bf16.gmra.mrb[220].mxu0 %v2486_v18  ;;  %3077 = vmatmul.mubr.bf16.gmra.mrb[220].mxu1 %v2486_v18 }
 0x47a   : > { %v2735_v60 = vpop.f32.mrb[160].mxu0  ;;  %v2928_v61 = vpop.f32.mrb[160].mxu1 }
 0x47b   : > { %v2736_v22 = vadd.f32 %v2735_v60, %v5893_v55  ;;  %v2929_v23 = vadd.f32 %v2928_v61, %v5897_v20  ;;  %v2737_v53 = vpop.f32.mrb[161].mxu0  ;;  %v2930_v24 = vpop.f32.mrb[161].mxu1 }
 0x47c   : > { %v2738_v25 = vadd.f32 %v2737_v53, %v5901_v59  ;;  %v2931_v54 = vadd.f32 %v2930_v24, %v5905_v2  ;;  %v2739_v26 = vpop.f32.mrb[162].mxu0  ;;  %v2932_v27 = vpop.f32.mrb[162].mxu1 }
 0x47d   : > { %v2740_v56 = vadd.f32 %v2739_v26, %v5893_v55  ;;  %v2933_v51 = vadd.f32 %v2932_v27, %v5897_v20  ;;  %v2741_v57 = vpop.f32.mrb[163].mxu0  ;;  %v2934_v28 = vpop.f32.mrb[163].mxu1  ;;  %v3087_v31 = vmax.f32 %v2736_v22, 0.0  ;;  %v3089_v32 = vmax.f32 %v2929_v23, 0.0 }
 0x47e   : > { %v2742_v29 = vadd.f32 %v2741_v57, %v5901_v59  ;;  %v2935_v30 = vadd.f32 %v2934_v28, %v5905_v2  ;;  %v3088_v35 = vmax.f32 %v2738_v25, 0.0  ;;  %v3090_v36 = vmax.f32 %v2931_v54, 0.0 }
 0x47f   : > { %v3091_v33 = vmax.f32 %v2740_v56, 0.0  ;;  %v3093_v34 = vmax.f32 %v2933_v51, 0.0 }
 0x480   : > { %v3092_v37 = vmax.f32 %v2742_v29, 0.0  ;;  %v3094_v38 = vmax.f32 %v2935_v30, 0.0 }
 0x481   : > { %v3215_v39 = vpack.c.bf16 %v3091_v33, %v3087_v31  ;;  %v3217_v40 = vpack.c.bf16 %v3093_v34, %v3089_v32 }
 0x482   : > { %v3216_v41 = vpack.c.bf16 %v3092_v37, %v3088_v35  ;;  %v3218_v42 = vpack.c.bf16 %v3094_v38, %v3090_v36  ;;  %v2745_v43 = vpop.f32.mrb[164].mxu0  ;;  %v2938_v44 = vpop.f32.mrb[164].mxu1 }
 0x483   : > { %v2746_v45 = vadd.f32 %v2745_v43, %v5893_v55  ;;  %v2939_v46 = vadd.f32 %v2938_v44, %v5897_v20  ;;  %v2747_v47 = vpop.f32.mrb[165].mxu0  ;;  %v2940_v21 = vpop.f32.mrb[165].mxu1 }
 0x484   : > { %v2748_v48 = vadd.f32 %v2747_v47, %v5901_v59  ;;  %v2941_v49 = vadd.f32 %v2940_v21, %v5905_v2  ;;  %v2749_v50 = vpop.f32.mrb[166].mxu0  ;;  %v2942_v62 = vpop.f32.mrb[166].mxu1  ;;  %3574 = vmatprep.mubr.bf16.mxu0 %v3216_v41  ;;  %3735 = vmatprep.mubr.bf16.mxu1 %v3218_v42 }
 0x485   : > { %v2750_v63 = vadd.f32 %v2749_v50, %v5893_v55  ;;  %v2943_v0 = vadd.f32 %v2942_v62, %v5897_v20  ;;  %v2751_v1 = vpop.f32.mrb[167].mxu0  ;;  %v2944_v3 = vpop.f32.mrb[167].mxu1  ;;  %3575 = vmatmul.mubr.bf16.vlgmr.msra.gmra.mrb[224].mxu0 %v3215_v39  ;;  %3736 = vmatmul.mubr.bf16.vlgmr.msra.gmra.mrb[224].mxu1 %v3217_v40  ;;  %v3095_v52 = vmax.f32 %v2746_v45, 0.0  ;;  %v3097_v6 = vmax.f32 %v2939_v46, 0.0 }
 0x486   : > { %v2752_v4 = vadd.f32 %v2751_v1, %v5901_v59  ;;  %v2945_v5 = vadd.f32 %v2944_v3, %v5905_v2  ;;  %v3096_v9 = vmax.f32 %v2748_v48, 0.0  ;;  %v3098_v10 = vmax.f32 %v2941_v49, 0.0 }
 0x487   : > { %v3099_v7 = vmax.f32 %v2750_v63, 0.0  ;;  %v3101_v8 = vmax.f32 %v2943_v0, 0.0 }
 0x488   : > { %v3100_v11 = vmax.f32 %v2752_v4, 0.0  ;;  %v3102_v12 = vmax.f32 %v2945_v5, 0.0 }
 0x489   : > { %v3219_v13 = vpack.c.bf16 %v3099_v7, %v3095_v52  ;;  %v3221_v14 = vpack.c.bf16 %v3101_v8, %v3097_v6 }
 0x48a   : > { %v3220_v15 = vpack.c.bf16 %v3100_v11, %v3096_v9  ;;  %v3222_v16 = vpack.c.bf16 %v3102_v12, %v3098_v10  ;;  %v2755_v17 = vpop.f32.mrb[168].mxu0  ;;  %v2948_v18 = vpop.f32.mrb[168].mxu1 }
 0x48b   : > { %v2756_v19 = vadd.f32 %v2755_v17, %v5893_v55  ;;  %v2949_v58 = vadd.f32 %v2948_v18, %v5897_v20  ;;  %v2757_v60 = vpop.f32.mrb[169].mxu0  ;;  %v2950_v61 = vpop.f32.mrb[169].mxu1 }
 0x48c   : > { %v2758_v22 = vadd.f32 %v2757_v60, %v5901_v59  ;;  %v2951_v23 = vadd.f32 %v2950_v61, %v5905_v2  ;;  %v2759_v53 = vpop.f32.mrb[170].mxu0  ;;  %v2952_v24 = vpop.f32.mrb[170].mxu1  ;;  %3582 = vmatprep.mubr.bf16.mxu0 %v3220_v15  ;;  %3743 = vmatprep.mubr.bf16.mxu1 %v3222_v16 }
 0x48d   : > { %v2760_v25 = vadd.f32 %v2759_v53, %v5893_v55  ;;  %v2953_v54 = vadd.f32 %v2952_v24, %v5897_v20  ;;  %v2761_v26 = vpop.f32.mrb[171].mxu0  ;;  %v2954_v27 = vpop.f32.mrb[171].mxu1  ;;  %3583 = vmatmul.mubr.bf16.gmra.mrb[228].mxu0 %v3219_v13  ;;  %3744 = vmatmul.mubr.bf16.gmra.mrb[228].mxu1 %v3221_v14  ;;  %v3103_v57 = vmax.f32 %v2756_v19, 0.0  ;;  %v3105_v28 = vmax.f32 %v2949_v58, 0.0 }
 0x48e   : > { %v2762_v56 = vadd.f32 %v2761_v26, %v5901_v59  ;;  %v2955_v51 = vadd.f32 %v2954_v27, %v5905_v2  ;;  %v3104_v31 = vmax.f32 %v2758_v22, 0.0  ;;  %v3106_v32 = vmax.f32 %v2951_v23, 0.0 }
 0x48f   : > { %v3107_v29 = vmax.f32 %v2760_v25, 0.0  ;;  %v3109_v30 = vmax.f32 %v2953_v54, 0.0 }
 0x490   : > { %v3108_v33 = vmax.f32 %v2762_v56, 0.0  ;;  %v3110_v34 = vmax.f32 %v2955_v51, 0.0 }
 0x491   : > { %v3223_v35 = vpack.c.bf16 %v3107_v29, %v3103_v57  ;;  %v3225_v36 = vpack.c.bf16 %v3109_v30, %v3105_v28 }
 0x492   : > { %v3224_v37 = vpack.c.bf16 %v3108_v33, %v3104_v31  ;;  %v3226_v38 = vpack.c.bf16 %v3110_v34, %v3106_v32  ;;  %v2765_v39 = vpop.f32.mrb[172].mxu0  ;;  %v2958_v40 = vpop.f32.mrb[172].mxu1 }
 0x493   : > { %v2766_v41 = vadd.f32 %v2765_v39, %v5893_v55  ;;  %v2959_v42 = vadd.f32 %v2958_v40, %v5897_v20  ;;  %v2767_v43 = vpop.f32.mrb[173].mxu0  ;;  %v2960_v44 = vpop.f32.mrb[173].mxu1 }
 0x494   : > { %v2768_v45 = vadd.f32 %v2767_v43, %v5901_v59  ;;  %v2961_v46 = vadd.f32 %v2960_v44, %v5905_v2  ;;  %v2769_v47 = vpop.f32.mrb[174].mxu0  ;;  %v2962_v21 = vpop.f32.mrb[174].mxu1  ;;  %3590 = vmatprep.mubr.bf16.mxu0 %v3224_v37  ;;  %3751 = vmatprep.mubr.bf16.mxu1 %v3226_v38 }
 0x495   : > { %v2770_v48 = vadd.f32 %v2769_v47, %v5893_v55  ;;  %v2963_v49 = vadd.f32 %v2962_v21, %v5897_v20  ;;  %v2771_v50 = vpop.f32.mrb[175].mxu0  ;;  %v2964_v62 = vpop.f32.mrb[175].mxu1  ;;  %3591 = vmatmul.mubr.bf16.gmra.mrb[232].mxu0 %v3223_v35  ;;  %3752 = vmatmul.mubr.bf16.gmra.mrb[232].mxu1 %v3225_v36  ;;  %v3111_v1 = vmax.f32 %v2766_v41, 0.0  ;;  %v3113_v3 = vmax.f32 %v2959_v42, 0.0 }
 0x496   : > { %v2772_v63 = vadd.f32 %v2771_v50, %v5901_v59  ;;  %v2965_v0 = vadd.f32 %v2964_v62, %v5905_v2  ;;  %v3112_v52 = vmax.f32 %v2768_v45, 0.0  ;;  %v3114_v6 = vmax.f32 %v2961_v46, 0.0 }
 0x497   : > { %v3115_v4 = vmax.f32 %v2770_v48, 0.0  ;;  %v3117_v5 = vmax.f32 %v2963_v49, 0.0 }
 0x498   : > { %v3116_v7 = vmax.f32 %v2772_v63, 0.0  ;;  %v3118_v8 = vmax.f32 %v2965_v0, 0.0 }
 0x499   : > { %v3227_v9 = vpack.c.bf16 %v3115_v4, %v3111_v1  ;;  %v3229_v10 = vpack.c.bf16 %v3117_v5, %v3113_v3 }
 0x49a   : > { %v3228_v11 = vpack.c.bf16 %v3116_v7, %v3112_v52  ;;  %v3230_v12 = vpack.c.bf16 %v3118_v8, %v3114_v6  ;;  %v2775_v13 = vpop.f32.mrb[176].mxu0  ;;  %v2968_v14 = vpop.f32.mrb[176].mxu1 }
 0x49b   : > { %v2776_v15 = vadd.f32 %v2775_v13, %v5893_v55  ;;  %v2969_v16 = vadd.f32 %v2968_v14, %v5897_v20  ;;  %v2777_v17 = vpop.f32.mrb[177].mxu0  ;;  %v2970_v18 = vpop.f32.mrb[177].mxu1 }
 0x49c   : > { %v2778_v19 = vadd.f32 %v2777_v17, %v5901_v59  ;;  %v2971_v58 = vadd.f32 %v2970_v18, %v5905_v2  ;;  %v2779_v60 = vpop.f32.mrb[178].mxu0  ;;  %v2972_v61 = vpop.f32.mrb[178].mxu1  ;;  %3598 = vmatprep.mubr.bf16.mxu0 %v3228_v11  ;;  %3759 = vmatprep.mubr.bf16.mxu1 %v3230_v12 }
 0x49d   : > { %v2780_v22 = vadd.f32 %v2779_v60, %v5893_v55  ;;  %v2973_v23 = vadd.f32 %v2972_v61, %v5897_v20  ;;  %v2781_v53 = vpop.f32.mrb[179].mxu0  ;;  %v2974_v24 = vpop.f32.mrb[179].mxu1  ;;  %3599 = vmatmul.mubr.bf16.gmra.mrb[236].mxu0 %v3227_v9  ;;  %3760 = vmatmul.mubr.bf16.gmra.mrb[236].mxu1 %v3229_v10  ;;  %v3119_v26 = vmax.f32 %v2776_v15, 0.0  ;;  %v3121_v27 = vmax.f32 %v2969_v16, 0.0 }
 0x49e   : > { %v2782_v25 = vadd.f32 %v2781_v53, %v5901_v59  ;;  %v2975_v54 = vadd.f32 %v2974_v24, %v5905_v2  ;;  %v3120_v57 = vmax.f32 %v2778_v19, 0.0  ;;  %v3122_v28 = vmax.f32 %v2971_v58, 0.0 }
 0x49f   : > { %v3123_v56 = vmax.f32 %v2780_v22, 0.0  ;;  %v3125_v51 = vmax.f32 %v2973_v23, 0.0 }
 0x4a0   : > { %v3124_v29 = vmax.f32 %v2782_v25, 0.0  ;;  %v3126_v30 = vmax.f32 %v2975_v54, 0.0 }
 0x4a1   : > { %v3231_v31 = vpack.c.bf16 %v3123_v56, %v3119_v26  ;;  %v3233_v32 = vpack.c.bf16 %v3125_v51, %v3121_v27 }
 0x4a2   : > { %v3232_v33 = vpack.c.bf16 %v3124_v29, %v3120_v57  ;;  %v3234_v34 = vpack.c.bf16 %v3126_v30, %v3122_v28  ;;  %v2785_v35 = vpop.f32.mrb[180].mxu0  ;;  %v2978_v36 = vpop.f32.mrb[180].mxu1 }
 0x4a3   : > { %v2786_v37 = vadd.f32 %v2785_v35, %v5893_v55  ;;  %v2979_v38 = vadd.f32 %v2978_v36, %v5897_v20  ;;  %v2787_v39 = vpop.f32.mrb[181].mxu0  ;;  %v2980_v40 = vpop.f32.mrb[181].mxu1 }
 0x4a4   : > { %v2788_v41 = vadd.f32 %v2787_v39, %v5901_v59  ;;  %v2981_v42 = vadd.f32 %v2980_v40, %v5905_v2  ;;  %v2789_v43 = vpop.f32.mrb[182].mxu0  ;;  %v2982_v44 = vpop.f32.mrb[182].mxu1  ;;  %3606 = vmatprep.mubr.bf16.mxu0 %v3232_v33  ;;  %3767 = vmatprep.mubr.bf16.mxu1 %v3234_v34 }
 0x4a5   : > { %v2790_v45 = vadd.f32 %v2789_v43, %v5893_v55  ;;  %v2983_v46 = vadd.f32 %v2982_v44, %v5897_v20  ;;  %v2791_v47 = vpop.f32.mrb[183].mxu0  ;;  %v2984_v21 = vpop.f32.mrb[183].mxu1  ;;  %3607 = vmatmul.mubr.bf16.gmra.mrb[240].mxu0 %v3231_v31  ;;  %3768 = vmatmul.mubr.bf16.gmra.mrb[240].mxu1 %v3233_v32  ;;  %v3127_v50 = vmax.f32 %v2786_v37, 0.0  ;;  %v3129_v62 = vmax.f32 %v2979_v38, 0.0 }
 0x4a6   : > { %v2792_v48 = vadd.f32 %v2791_v47, %v5901_v59  ;;  %v2985_v49 = vadd.f32 %v2984_v21, %v5905_v2  ;;  %v3128_v1 = vmax.f32 %v2788_v41, 0.0  ;;  %v3130_v3 = vmax.f32 %v2981_v42, 0.0 }
 0x4a7   : > { %v3131_v63 = vmax.f32 %v2790_v45, 0.0  ;;  %v3133_v0 = vmax.f32 %v2983_v46, 0.0 }
 0x4a8   : > { %v3132_v4 = vmax.f32 %v2792_v48, 0.0  ;;  %v3134_v5 = vmax.f32 %v2985_v49, 0.0 }
 0x4a9   : > { %v3235_v52 = vpack.c.bf16 %v3131_v63, %v3127_v50  ;;  %v3237_v6 = vpack.c.bf16 %v3133_v0, %v3129_v62 }
 0x4aa   : > { %v3236_v7 = vpack.c.bf16 %v3132_v4, %v3128_v1  ;;  %v3238_v8 = vpack.c.bf16 %v3134_v5, %v3130_v3  ;;  %v2795_v9 = vpop.f32.mrb[184].mxu0  ;;  %v2988_v10 = vpop.f32.mrb[184].mxu1 }
 0x4ab   : > { %v2796_v11 = vadd.f32 %v2795_v9, %v5893_v55  ;;  %v2989_v12 = vadd.f32 %v2988_v10, %v5897_v20  ;;  %v2797_v13 = vpop.f32.mrb[185].mxu0  ;;  %v2990_v14 = vpop.f32.mrb[185].mxu1 }
 0x4ac   : > { %v2798_v15 = vadd.f32 %v2797_v13, %v5901_v59  ;;  %v2991_v16 = vadd.f32 %v2990_v14, %v5905_v2  ;;  %v2799_v17 = vpop.f32.mrb[186].mxu0  ;;  %v2992_v18 = vpop.f32.mrb[186].mxu1  ;;  %3614 = vmatprep.mubr.bf16.mxu0 %v3236_v7  ;;  %3775 = vmatprep.mubr.bf16.mxu1 %v3238_v8 }
 0x4ad   : > { %v2800_v19 = vadd.f32 %v2799_v17, %v5893_v55  ;;  %v2993_v58 = vadd.f32 %v2992_v18, %v5897_v20  ;;  %v2801_v60 = vpop.f32.mrb[187].mxu0  ;;  %v2994_v61 = vpop.f32.mrb[187].mxu1  ;;  %3615 = vmatmul.mubr.bf16.gmra.mrb[244].mxu0 %v3235_v52  ;;  %3776 = vmatmul.mubr.bf16.gmra.mrb[244].mxu1 %v3237_v6  ;;  %v3135_v53 = vmax.f32 %v2796_v11, 0.0  ;;  %v3137_v24 = vmax.f32 %v2989_v12, 0.0 }
 0x4ae   : > { %v2802_v22 = vadd.f32 %v2801_v60, %v5901_v59  ;;  %v2995_v23 = vadd.f32 %v2994_v61, %v5905_v2  ;;  %v3136_v26 = vmax.f32 %v2798_v15, 0.0  ;;  %v3138_v27 = vmax.f32 %v2991_v16, 0.0 }
 0x4af   : > { %v3139_v25 = vmax.f32 %v2800_v19, 0.0  ;;  %v3141_v54 = vmax.f32 %v2993_v58, 0.0 }
 0x4b0   : > { %v3140_v56 = vmax.f32 %v2802_v22, 0.0  ;;  %v3142_v51 = vmax.f32 %v2995_v23, 0.0 }
 0x4b1   : > { %v3239_v57 = vpack.c.bf16 %v3139_v25, %v3135_v53  ;;  %v3241_v28 = vpack.c.bf16 %v3141_v54, %v3137_v24 }
 0x4b2   : > { %v3240_v29 = vpack.c.bf16 %v3140_v56, %v3136_v26  ;;  %v3242_v30 = vpack.c.bf16 %v3142_v51, %v3138_v27  ;;  %v2805_v31 = vpop.f32.mrb[188].mxu0  ;;  %v2998_v32 = vpop.f32.mrb[188].mxu1 }
 0x4b3   : > { %v2806_v33 = vadd.f32 %v2805_v31, %v5893_v55  ;;  %v2999_v34 = vadd.f32 %v2998_v32, %v5897_v20  ;;  %v2807_v35 = vpop.f32.mrb[189].mxu0  ;;  %v3000_v36 = vpop.f32.mrb[189].mxu1 }
 0x4b4   : > { %v2808_v37 = vadd.f32 %v2807_v35, %v5901_v59  ;;  %v3001_v38 = vadd.f32 %v3000_v36, %v5905_v2  ;;  %v2809_v39 = vpop.f32.mrb[190].mxu0  ;;  %v3002_v40 = vpop.f32.mrb[190].mxu1  ;;  %3622 = vmatprep.mubr.bf16.mxu0 %v3240_v29  ;;  %3783 = vmatprep.mubr.bf16.mxu1 %v3242_v30 }
 0x4b5   : > { %v2810_v41 = vadd.f32 %v2809_v39, %v5893_v55  ;;  %v3003_v42 = vadd.f32 %v3002_v40, %v5897_v20  ;;  %v2811_v43 = vpop.f32.mrb[191].mxu0  ;;  %v3004_v44 = vpop.f32.mrb[191].mxu1  ;;  %3623 = vmatmul.mubr.bf16.gmra.mrb[248].mxu0 %v3239_v57  ;;  %3784 = vmatmul.mubr.bf16.gmra.mrb[248].mxu1 %v3241_v28  ;;  %v3143_v47 = vmax.f32 %v2806_v33, 0.0  ;;  %v3145_v21 = vmax.f32 %v2999_v34, 0.0 }
 0x4b6   : > { %v2812_v45 = vadd.f32 %v2811_v43, %v5901_v59  ;;  %v3005_v46 = vadd.f32 %v3004_v44, %v5905_v2  ;;  %v3144_v50 = vmax.f32 %v2808_v37, 0.0  ;;  %v3146_v62 = vmax.f32 %v3001_v38, 0.0 }
 0x4b7   : > { %v3147_v48 = vmax.f32 %v2810_v41, 0.0  ;;  %v3149_v49 = vmax.f32 %v3003_v42, 0.0 }
 0x4b8   : > { %v3148_v63 = vmax.f32 %v2812_v45, 0.0  ;;  %v3150_v0 = vmax.f32 %v3005_v46, 0.0 }
 0x4b9   : > { %v3243_v1 = vpack.c.bf16 %v3147_v48, %v3143_v47  ;;  %v3245_v3 = vpack.c.bf16 %v3149_v49, %v3145_v21 }
 0x4ba   : > { %v3244_v4 = vpack.c.bf16 %v3148_v63, %v3144_v50  ;;  %v3246_v5 = vpack.c.bf16 %v3150_v0, %v3146_v62  ;;  %v2815_v52 = vpop.f32.mrb[192].mxu0  ;;  %v3008_v6 = vpop.f32.mrb[192].mxu1 }
 0x4bb   : > { %v2816_v7 = vadd.f32 %v2815_v52, %v5893_v55  ;;  %v3009_v8 = vadd.f32 %v3008_v6, %v5897_v20  ;;  %v2817_v9 = vpop.f32.mrb[193].mxu0  ;;  %v3010_v10 = vpop.f32.mrb[193].mxu1 }
 0x4bc   : > { %v2818_v11 = vadd.f32 %v2817_v9, %v5901_v59  ;;  %v3011_v12 = vadd.f32 %v3010_v10, %v5905_v2  ;;  %v2819_v13 = vpop.f32.mrb[194].mxu0  ;;  %v3012_v14 = vpop.f32.mrb[194].mxu1  ;;  %3630 = vmatprep.mubr.bf16.mxu0 %v3244_v4  ;;  %3791 = vmatprep.mubr.bf16.mxu1 %v3246_v5 }
 0x4bd   : > { %v2820_v15 = vadd.f32 %v2819_v13, %v5893_v55  ;;  %v3013_v16 = vadd.f32 %v3012_v14, %v5897_v20  ;;  %v2821_v17 = vpop.f32.mrb[195].mxu0  ;;  %v3014_v18 = vpop.f32.mrb[195].mxu1  ;;  %3631 = vmatmul.mubr.bf16.gmra.mrb[252].mxu0 %v3243_v1  ;;  %3792 = vmatmul.mubr.bf16.gmra.mrb[252].mxu1 %v3245_v3  ;;  %v3151_v60 = vmax.f32 %v2816_v7, 0.0  ;;  %v3153_v61 = vmax.f32 %v3009_v8, 0.0 }
 0x4be   : > { %v2822_v19 = vadd.f32 %v2821_v17, %v5901_v59  ;;  %v3015_v58 = vadd.f32 %v3014_v18, %v5905_v2  ;;  %v3152_v53 = vmax.f32 %v2818_v11, 0.0  ;;  %v3154_v24 = vmax.f32 %v3011_v12, 0.0 }
 0x4bf   : > { %v3155_v22 = vmax.f32 %v2820_v15, 0.0  ;;  %v3157_v23 = vmax.f32 %v3013_v16, 0.0 }
 0x4c0   : > { %v3156_v25 = vmax.f32 %v2822_v19, 0.0  ;;  %v3158_v54 = vmax.f32 %v3015_v58, 0.0 }
 0x4c1   : > { %v3247_v26 = vpack.c.bf16 %v3155_v22, %v3151_v60  ;;  %v3249_v27 = vpack.c.bf16 %v3157_v23, %v3153_v61 }
 0x4c2   : > { %v3248_v56 = vpack.c.bf16 %v3156_v25, %v3152_v53  ;;  %v3250_v51 = vpack.c.bf16 %v3158_v54, %v3154_v24  ;;  %v2825_v57 = vpop.f32.mrb[196].mxu0  ;;  %v3018_v28 = vpop.f32.mrb[196].mxu1 }
 0x4c3   : > { %v2826_v29 = vadd.f32 %v2825_v57, %v5893_v55  ;;  %v3019_v30 = vadd.f32 %v3018_v28, %v5897_v20  ;;  %v2827_v31 = vpop.f32.mrb[197].mxu0  ;;  %v3020_v32 = vpop.f32.mrb[197].mxu1 }
 0x4c4   : > { %v2828_v33 = vadd.f32 %v2827_v31, %v5901_v59  ;;  %v3021_v34 = vadd.f32 %v3020_v32, %v5905_v2  ;;  %v2829_v35 = vpop.f32.mrb[198].mxu0  ;;  %v3022_v36 = vpop.f32.mrb[198].mxu1  ;;  %3638 = vmatprep.mubr.bf16.mxu0 %v3248_v56  ;;  %3799 = vmatprep.mubr.bf16.mxu1 %v3250_v51 }
 0x4c5   : > { %v2830_v37 = vadd.f32 %v2829_v35, %v5893_v55  ;;  %v3023_v38 = vadd.f32 %v3022_v36, %v5897_v20  ;;  %v2831_v39 = vpop.f32.mrb[199].mxu0  ;;  %v3024_v40 = vpop.f32.mrb[199].mxu1  ;;  %3639 = vmatmul.mubr.bf16.gmra.mrb[0].mxu0 %v3247_v26  ;;  %3800 = vmatmul.mubr.bf16.gmra.mrb[0].mxu1 %v3249_v27  ;;  %v3159_v43 = vmax.f32 %v2826_v29, 0.0  ;;  %v3161_v44 = vmax.f32 %v3019_v30, 0.0 }
 0x4c6   : > { %v2832_v41 = vadd.f32 %v2831_v39, %v5901_v59  ;;  %v3025_v42 = vadd.f32 %v3024_v40, %v5905_v2  ;;  %v3160_v47 = vmax.f32 %v2828_v33, 0.0  ;;  %v3162_v21 = vmax.f32 %v3021_v34, 0.0 }
 0x4c7   : > { %v3163_v45 = vmax.f32 %v2830_v37, 0.0  ;;  %v3165_v46 = vmax.f32 %v3023_v38, 0.0 }
 0x4c8   : > { %v3164_v48 = vmax.f32 %v2832_v41, 0.0  ;;  %v3166_v49 = vmax.f32 %v3025_v42, 0.0 }
 0x4c9   : > { %v3251_v50 = vpack.c.bf16 %v3163_v45, %v3159_v43  ;;  %v3253_v62 = vpack.c.bf16 %v3165_v46, %v3161_v44 }
 0x4ca   : > { %v3252_v63 = vpack.c.bf16 %v3164_v48, %v3160_v47  ;;  %v3254_v0 = vpack.c.bf16 %v3166_v49, %v3162_v21  ;;  %v2835_v1 = vpop.f32.mrb[200].mxu0  ;;  %v3028_v3 = vpop.f32.mrb[200].mxu1 }
 0x4cb   : > { %v2836_v4 = vadd.f32 %v2835_v1, %v5893_v55  ;;  %v3029_v5 = vadd.f32 %v3028_v3, %v5897_v20  ;;  %v2837_v52 = vpop.f32.mrb[201].mxu0  ;;  %v3030_v6 = vpop.f32.mrb[201].mxu1 }
 0x4cc   : > { %v2838_v7 = vadd.f32 %v2837_v52, %v5901_v59  ;;  %v3031_v8 = vadd.f32 %v3030_v6, %v5905_v2  ;;  %v2839_v9 = vpop.f32.mrb[202].mxu0  ;;  %v3032_v10 = vpop.f32.mrb[202].mxu1  ;;  %3646 = vmatprep.mubr.bf16.mxu0 %v3252_v63  ;;  %3807 = vmatprep.mubr.bf16.mxu1 %v3254_v0 }
 0x4cd   : > { %v2840_v11 = vadd.f32 %v2839_v9, %v5893_v55  ;;  %v3033_v12 = vadd.f32 %v3032_v10, %v5897_v20  ;;  %v2841_v13 = vpop.f32.mrb[203].mxu0  ;;  %v3034_v14 = vpop.f32.mrb[203].mxu1  ;;  %3647 = vmatmul.mubr.bf16.gmra.mrb[4].mxu0 %v3251_v50  ;;  %3808 = vmatmul.mubr.bf16.gmra.mrb[4].mxu1 %v3253_v62  ;;  %v3167_v17 = vmax.f32 %v2836_v4, 0.0  ;;  %v3169_v18 = vmax.f32 %v3029_v5, 0.0 }
 0x4ce   : > { %v2842_v15 = vadd.f32 %v2841_v13, %v5901_v59  ;;  %v3035_v16 = vadd.f32 %v3034_v14, %v5905_v2  ;;  %v3168_v60 = vmax.f32 %v2838_v7, 0.0  ;;  %v3170_v61 = vmax.f32 %v3031_v8, 0.0 }
 0x4cf   : > { %v3171_v19 = vmax.f32 %v2840_v11, 0.0  ;;  %v3173_v58 = vmax.f32 %v3033_v12, 0.0 }
 0x4d0   : > { %v3172_v22 = vmax.f32 %v2842_v15, 0.0  ;;  %v3174_v23 = vmax.f32 %v3035_v16, 0.0 }
 0x4d1   : > { %v3255_v53 = vpack.c.bf16 %v3171_v19, %v3167_v17  ;;  %v3257_v24 = vpack.c.bf16 %v3173_v58, %v3169_v18 }
 0x4d2   : > { %v3256_v25 = vpack.c.bf16 %v3172_v22, %v3168_v60  ;;  %v3258_v54 = vpack.c.bf16 %v3174_v23, %v3170_v61  ;;  %v2845_v26 = vpop.f32.mrb[204].mxu0  ;;  %v3038_v27 = vpop.f32.mrb[204].mxu1 }
 0x4d3   : > { %v2846_v56 = vadd.f32 %v2845_v26, %v5893_v55  ;;  %v3039_v51 = vadd.f32 %v3038_v27, %v5897_v20  ;;  %v2847_v57 = vpop.f32.mrb[205].mxu0  ;;  %v3040_v28 = vpop.f32.mrb[205].mxu1 }
 0x4d4   : > { %v2848_v29 = vadd.f32 %v2847_v57, %v5901_v59  ;;  %v3041_v30 = vadd.f32 %v3040_v28, %v5905_v2  ;;  %v2849_v31 = vpop.f32.mrb[206].mxu0  ;;  %v3042_v32 = vpop.f32.mrb[206].mxu1  ;;  %3654 = vmatprep.mubr.bf16.mxu0 %v3256_v25  ;;  %3815 = vmatprep.mubr.bf16.mxu1 %v3258_v54 }
 0x4d5   : > { %v2850_v33 = vadd.f32 %v2849_v31, %v5893_v55  ;;  %v3043_v34 = vadd.f32 %v3042_v32, %v5897_v20  ;;  %v2851_v35 = vpop.f32.mrb[207].mxu0  ;;  %v3044_v36 = vpop.f32.mrb[207].mxu1  ;;  %3655 = vmatmul.mubr.bf16.gmra.mrb[8].mxu0 %v3255_v53  ;;  %3816 = vmatmul.mubr.bf16.gmra.mrb[8].mxu1 %v3257_v24  ;;  %v3175_v39 = vmax.f32 %v2846_v56, 0.0  ;;  %v3177_v40 = vmax.f32 %v3039_v51, 0.0 }
 0x4d6   : > { %v2852_v37 = vadd.f32 %v2851_v35, %v5901_v59  ;;  %v3045_v38 = vadd.f32 %v3044_v36, %v5905_v2  ;;  %v3176_v43 = vmax.f32 %v2848_v29, 0.0  ;;  %v3178_v44 = vmax.f32 %v3041_v30, 0.0 }
 0x4d7   : > { %v3179_v41 = vmax.f32 %v2850_v33, 0.0  ;;  %v3181_v42 = vmax.f32 %v3043_v34, 0.0 }
 0x4d8   : > { %v3180_v45 = vmax.f32 %v2852_v37, 0.0  ;;  %v3182_v46 = vmax.f32 %v3045_v38, 0.0 }
 0x4d9   : > { %v3259_v47 = vpack.c.bf16 %v3179_v41, %v3175_v39  ;;  %v3261_v21 = vpack.c.bf16 %v3181_v42, %v3177_v40 }
 0x4da   : > { %v3260_v48 = vpack.c.bf16 %v3180_v45, %v3176_v43  ;;  %v3262_v49 = vpack.c.bf16 %v3182_v46, %v3178_v44  ;;  %v2855_v50 = vpop.f32.mrb[208].mxu0  ;;  %v3048_v62 = vpop.f32.mrb[208].mxu1 }
 0x4db   : > { %v2856_v63 = vadd.f32 %v2855_v50, %v5893_v55  ;;  %v3049_v0 = vadd.f32 %v3048_v62, %v5897_v20  ;;  %v2857_v1 = vpop.f32.mrb[209].mxu0  ;;  %v3050_v3 = vpop.f32.mrb[209].mxu1 }
 0x4dc   : > { %v2858_v4 = vadd.f32 %v2857_v1, %v5901_v59  ;;  %v3051_v5 = vadd.f32 %v3050_v3, %v5905_v2  ;;  %v2859_v52 = vpop.f32.mrb[210].mxu0  ;;  %v3052_v6 = vpop.f32.mrb[210].mxu1  ;;  %3662 = vmatprep.mubr.bf16.mxu0 %v3260_v48  ;;  %3823 = vmatprep.mubr.bf16.mxu1 %v3262_v49 }
 0x4dd   : > { %v2860_v7 = vadd.f32 %v2859_v52, %v5893_v55  ;;  %v3053_v8 = vadd.f32 %v3052_v6, %v5897_v20  ;;  %v2861_v9 = vpop.f32.mrb[211].mxu0  ;;  %v3054_v10 = vpop.f32.mrb[211].mxu1  ;;  %3663 = vmatmul.mubr.bf16.gmra.mrb[12].mxu0 %v3259_v47  ;;  %3824 = vmatmul.mubr.bf16.gmra.mrb[12].mxu1 %v3261_v21  ;;  %v3183_v13 = vmax.f32 %v2856_v63, 0.0  ;;  %v3185_v14 = vmax.f32 %v3049_v0, 0.0 }
 0x4de   : > { %v2862_v11 = vadd.f32 %v2861_v9, %v5901_v59  ;;  %v3055_v12 = vadd.f32 %v3054_v10, %v5905_v2  ;;  %v3184_v17 = vmax.f32 %v2858_v4, 0.0  ;;  %v3186_v18 = vmax.f32 %v3051_v5, 0.0 }
 0x4df   : > { %v3187_v15 = vmax.f32 %v2860_v7, 0.0  ;;  %v3189_v16 = vmax.f32 %v3053_v8, 0.0 }
 0x4e0   : > { %v3188_v19 = vmax.f32 %v2862_v11, 0.0  ;;  %v3190_v58 = vmax.f32 %v3055_v12, 0.0 }
 0x4e1   : > { %v3263_v60 = vpack.c.bf16 %v3187_v15, %v3183_v13  ;;  %v3265_v61 = vpack.c.bf16 %v3189_v16, %v3185_v14 }
 0x4e2   : > { %v3264_v22 = vpack.c.bf16 %v3188_v19, %v3184_v17  ;;  %v3266_v23 = vpack.c.bf16 %v3190_v58, %v3186_v18  ;;  %v2865_v53 = vpop.f32.mrb[212].mxu0  ;;  %v3058_v24 = vpop.f32.mrb[212].mxu1 }
 0x4e3   : > { %v2866_v25 = vadd.f32 %v2865_v53, %v5893_v55  ;;  %v3059_v54 = vadd.f32 %v3058_v24, %v5897_v20  ;;  %v2867_v26 = vpop.f32.mrb[213].mxu0  ;;  %v3060_v27 = vpop.f32.mrb[213].mxu1 }
 0x4e4   : > { %v2868_v56 = vadd.f32 %v2867_v26, %v5901_v59  ;;  %v3061_v51 = vadd.f32 %v3060_v27, %v5905_v2  ;;  %v2869_v57 = vpop.f32.mrb[214].mxu0  ;;  %v3062_v28 = vpop.f32.mrb[214].mxu1  ;;  %3670 = vmatprep.mubr.bf16.mxu0 %v3264_v22  ;;  %3831 = vmatprep.mubr.bf16.mxu1 %v3266_v23 }
 0x4e5   : > { %v2870_v29 = vadd.f32 %v2869_v57, %v5893_v55  ;;  %v3063_v30 = vadd.f32 %v3062_v28, %v5897_v20  ;;  %v2871_v31 = vpop.f32.mrb[215].mxu0  ;;  %v3064_v32 = vpop.f32.mrb[215].mxu1  ;;  %3671 = vmatmul.mubr.bf16.gmra.mrb[16].mxu0 %v3263_v60  ;;  %3832 = vmatmul.mubr.bf16.gmra.mrb[16].mxu1 %v3265_v61  ;;  %v3191_v35 = vmax.f32 %v2866_v25, 0.0  ;;  %v3193_v36 = vmax.f32 %v3059_v54, 0.0 }
 0x4e6   : > { %v2872_v33 = vadd.f32 %v2871_v31, %v5901_v59  ;;  %v3065_v34 = vadd.f32 %v3064_v32, %v5905_v2  ;;  %v3192_v39 = vmax.f32 %v2868_v56, 0.0  ;;  %v3194_v40 = vmax.f32 %v3061_v51, 0.0 }
 0x4e7   : > { %v3195_v37 = vmax.f32 %v2870_v29, 0.0  ;;  %v3197_v38 = vmax.f32 %v3063_v30, 0.0 }
 0x4e8   : > { %v3196_v41 = vmax.f32 %v2872_v33, 0.0  ;;  %v3198_v42 = vmax.f32 %v3065_v34, 0.0 }
 0x4e9   : > { %v3267_v43 = vpack.c.bf16 %v3195_v37, %v3191_v35  ;;  %v3269_v44 = vpack.c.bf16 %v3197_v38, %v3193_v36 }
 0x4ea   : > { %v3268_v45 = vpack.c.bf16 %v3196_v41, %v3192_v39  ;;  %v3270_v46 = vpack.c.bf16 %v3198_v42, %v3194_v40  ;;  %v2875_v47 = vpop.f32.mrb[216].mxu0  ;;  %v3068_v21 = vpop.f32.mrb[216].mxu1 }
 0x4eb   : > { %v2876_v48 = vadd.f32 %v2875_v47, %v5893_v55  ;;  %v3069_v49 = vadd.f32 %v3068_v21, %v5897_v20  ;;  %v2877_v50 = vpop.f32.mrb[217].mxu0  ;;  %v3070_v62 = vpop.f32.mrb[217].mxu1 }
 0x4ec   : > { %v2878_v63 = vadd.f32 %v2877_v50, %v5901_v59  ;;  %v3071_v0 = vadd.f32 %v3070_v62, %v5905_v2  ;;  %v2879_v1 = vpop.f32.mrb[218].mxu0  ;;  %v3072_v3 = vpop.f32.mrb[218].mxu1  ;;  %3678 = vmatprep.mubr.bf16.mxu0 %v3268_v45  ;;  %3839 = vmatprep.mubr.bf16.mxu1 %v3270_v46 }
 0x4ed   : > { %v2880_v4 = vadd.f32 %v2879_v1, %v5893_v55  ;;  %v3073_v5 = vadd.f32 %v3072_v3, %v5897_v20  ;;  %v2881_v52 = vpop.f32.mrb[219].mxu0  ;;  %v3074_v6 = vpop.f32.mrb[219].mxu1  ;;  %3679 = vmatmul.mubr.bf16.gmra.mrb[20].mxu0 %v3267_v43  ;;  %3840 = vmatmul.mubr.bf16.gmra.mrb[20].mxu1 %v3269_v44  ;;  %v3199_v9 = vmax.f32 %v2876_v48, 0.0  ;;  %v3201_v10 = vmax.f32 %v3069_v49, 0.0 }
 0x4ee   : > { %v2882_v7 = vadd.f32 %v2881_v52, %v5901_v59  ;;  %v3075_v8 = vadd.f32 %v3074_v6, %v5905_v2  ;;  %v3200_v13 = vmax.f32 %v2878_v63, 0.0  ;;  %v3202_v14 = vmax.f32 %v3071_v0, 0.0 }
 0x4ef   : > { %v3203_v11 = vmax.f32 %v2880_v4, 0.0  ;;  %v3205_v12 = vmax.f32 %v3073_v5, 0.0 }
 0x4f0   : > { %v3204_v15 = vmax.f32 %v2882_v7, 0.0  ;;  %v3206_v16 = vmax.f32 %v3075_v8, 0.0 }
 0x4f1   : > { %v3271_v17 = vpack.c.bf16 %v3203_v11, %v3199_v9  ;;  %v3273_v18 = vpack.c.bf16 %v3205_v12, %v3201_v10 }
 0x4f2   : > { %v3272_v19 = vpack.c.bf16 %v3204_v15, %v3200_v13  ;;  %v3274_v58 = vpack.c.bf16 %v3206_v16, %v3202_v14  ;;  %v2885_v60 = vpop.f32.mrb[220].mxu0  ;;  %v3078_v61 = vpop.f32.mrb[220].mxu1 }
 0x4f3   : > { %v2886_v22 = vadd.f32 %v2885_v60, %v5893_v55  ;;  %v3079_v23 = vadd.f32 %v3078_v61, %v5897_v20  ;;  %v2887_v53 = vpop.f32.mrb[221].mxu0  ;;  %v3080_v24 = vpop.f32.mrb[221].mxu1 }
 0x4f4   : > { %v2888_v25 = vadd.f32 %v2887_v53, %v5901_v59  ;;  %v3081_v54 = vadd.f32 %v3080_v24, %v5905_v2  ;;  %v2889_v26 = vpop.f32.mrb[222].mxu0  ;;  %v3082_v27 = vpop.f32.mrb[222].mxu1  ;;  %3686 = vmatprep.mubr.bf16.mxu0 %v3272_v19  ;;  %3847 = vmatprep.mubr.bf16.mxu1 %v3274_v58 }
 0x4f5   : > { %v2890_v56 = vadd.f32 %v2889_v26, %v5893_v55  ;;  %v3083_v51 = vadd.f32 %v3082_v27, %v5897_v20  ;;  %v2891_v57 = vpop.f32.mrb[223].mxu0  ;;  %v3084_v28 = vpop.f32.mrb[223].mxu1  ;;  %3687 = vmatmul.mubr.bf16.gmra.mrb[24].mxu0 %v3271_v17  ;;  %3848 = vmatmul.mubr.bf16.gmra.mrb[24].mxu1 %v3273_v18  ;;  %v3207_v31 = vmax.f32 %v2886_v22, 0.0  ;;  %v3209_v32 = vmax.f32 %v3079_v23, 0.0 }
 0x4f6   : > { %v2892_v29 = vadd.f32 %v2891_v57, %v5901_v59  ;;  %v3085_v30 = vadd.f32 %v3084_v28, %v5905_v2  ;;  %v3208_v35 = vmax.f32 %v2888_v25, 0.0  ;;  %v3210_v36 = vmax.f32 %v3081_v54, 0.0  ;;  %v6038_v2 = vld [vmem:[%s6125_s12] ss:$0 sm:$0xff] }
 0x4f7   : > { %v3211_v33 = vmax.f32 %v2890_v56, 0.0  ;;  %v3213_v34 = vmax.f32 %v3083_v51, 0.0 }
 0x4f8   : > { %v3212_v37 = vmax.f32 %v2892_v29, 0.0  ;;  %v3214_v38 = vmax.f32 %v3085_v30, 0.0 }
 0x4f9   : > { %v3275_v39 = vpack.c.bf16 %v3211_v33, %v3207_v31  ;;  %v3277_v55 = vpack.c.bf16 %v3213_v34, %v3209_v32 }
 0x4fa   : > { %v3276_v40 = vpack.c.bf16 %v3212_v37, %v3208_v35  ;;  %v3278_v20 = vpack.c.bf16 %v3214_v38, %v3210_v36 }
 0x4fc   : > { %3694 = vmatprep.mubr.bf16.mxu0 %v3276_v40  ;;  %3855 = vmatprep.mubr.bf16.mxu1 %v3278_v20 }
 0x4fd   : > { %3695 = vmatmul.mubr.bf16.gmra.mrb[28].mxu0 %v3275_v39  ;;  %3856 = vmatmul.mubr.bf16.gmra.mrb[28].mxu1 %v3277_v55 }
 0x558   : > { %v4467_v59 = vpop.f32.mrb[224].mxu0  ;;  %v4579_v41 = vpop.f32.mrb[224].mxu1 }
 0x559   : > { %v4468_v42 = vpop.f32.mrb[225].mxu0  ;;  %v4580_v43 = vpop.f32.mrb[225].mxu1 }
 0x55a   : > { %v4469_v44 = vadd.f32 %v4468_v42, %v4467_v59  ;;  %v4581_v45 = vadd.f32 %v4580_v43, %v4579_v41  ;;  %v4470_v46 = vpop.f32.mrb[226].mxu0  ;;  %v4582_v47 = vpop.f32.mrb[226].mxu1 }
 0x55b   : > { %v4471_v21 = vpop.f32.mrb[227].mxu0  ;;  %v4583_v48 = vpop.f32.mrb[227].mxu1 }
 0x55c   : > { %v3577_v49 = vadd.f32 %v4469_v44, %v6038_v2  ;;  %v4472_v50 = vadd.f32 %v4471_v21, %v4470_v46  ;;  %v4584_v62 = vadd.f32 %v4583_v48, %v4582_v47 }
 0x55e   : > { %v3738_v63 = vadd.f32 %v4581_v45, %v3577_v49  ;;  %v3580_v0 = vadd.f32 %v4472_v50, %v6038_v2 }
 0x560   : > { %3896 = vst [vmem:[%s6045_s25] sm:$0xff] %v3738_v63  ;;  %v3741_v1 = vadd.f32 %v4584_v62, %v3580_v0  ;;  %v4473_v3 = vpop.f32.mrb[228].mxu0  ;;  %v4585_v4 = vpop.f32.mrb[228].mxu1 }
 0x561   : > { %v4474_v5 = vpop.f32.mrb[229].mxu0  ;;  %v4586_v52 = vpop.f32.mrb[229].mxu1 }
 0x562   : > { %3897 = vst [vmem:[%s6045_s25 + $0x8] sm:$0xff] %v3741_v1  ;;  %v4475_v6 = vadd.f32 %v4474_v5, %v4473_v3  ;;  %v4587_v7 = vadd.f32 %v4586_v52, %v4585_v4  ;;  %v4476_v8 = vpop.f32.mrb[230].mxu0  ;;  %v4588_v9 = vpop.f32.mrb[230].mxu1 }
 0x563   : > { %v4477_v10 = vpop.f32.mrb[231].mxu0  ;;  %v4589_v11 = vpop.f32.mrb[231].mxu1 }
 0x564   : > { %v3585_v12 = vadd.f32 %v4475_v6, %v6038_v2  ;;  %v4478_v13 = vadd.f32 %v4477_v10, %v4476_v8  ;;  %v4590_v14 = vadd.f32 %v4589_v11, %v4588_v9 }
 0x566   : > { %v3746_v15 = vadd.f32 %v4587_v7, %v3585_v12  ;;  %v3588_v16 = vadd.f32 %v4478_v13, %v6038_v2 }
 0x568   : > { %3898 = vst [vmem:[%s6045_s25 + $0x10] sm:$0xff] %v3746_v15  ;;  %v3749_v17 = vadd.f32 %v4590_v14, %v3588_v16  ;;  %v4479_v18 = vpop.f32.mrb[232].mxu0  ;;  %v4591_v19 = vpop.f32.mrb[232].mxu1 }
 0x569   : > { %v4480_v58 = vpop.f32.mrb[233].mxu0  ;;  %v4592_v60 = vpop.f32.mrb[233].mxu1 }
 0x56a   : > { %3899 = vst [vmem:[%s6045_s25 + $0x18] sm:$0xff] %v3749_v17  ;;  %v4481_v61 = vadd.f32 %v4480_v58, %v4479_v18  ;;  %v4593_v22 = vadd.f32 %v4592_v60, %v4591_v19  ;;  %v4482_v23 = vpop.f32.mrb[234].mxu0  ;;  %v4594_v53 = vpop.f32.mrb[234].mxu1 }
 0x56b   : > { %v4483_v24 = vpop.f32.mrb[235].mxu0  ;;  %v4595_v25 = vpop.f32.mrb[235].mxu1 }
 0x56c   : > { %v3593_v54 = vadd.f32 %v4481_v61, %v6038_v2  ;;  %v4484_v26 = vadd.f32 %v4483_v24, %v4482_v23  ;;  %v4596_v27 = vadd.f32 %v4595_v25, %v4594_v53 }
 0x56e   : > { %v3754_v56 = vadd.f32 %v4593_v22, %v3593_v54  ;;  %v3596_v51 = vadd.f32 %v4484_v26, %v6038_v2 }
 0x570   : > { %3900 = vst [vmem:[%s6045_s25 + $0x20] sm:$0xff] %v3754_v56  ;;  %v3757_v57 = vadd.f32 %v4596_v27, %v3596_v51  ;;  %v4485_v28 = vpop.f32.mrb[236].mxu0  ;;  %v4597_v29 = vpop.f32.mrb[236].mxu1 }
 0x571   : > { %v4486_v30 = vpop.f32.mrb[237].mxu0  ;;  %v4598_v31 = vpop.f32.mrb[237].mxu1 }
 0x572   : > { %3901 = vst [vmem:[%s6045_s25 + $0x28] sm:$0xff] %v3757_v57  ;;  %v4487_v32 = vadd.f32 %v4486_v30, %v4485_v28  ;;  %v4599_v33 = vadd.f32 %v4598_v31, %v4597_v29  ;;  %v4488_v34 = vpop.f32.mrb[238].mxu0  ;;  %v4600_v35 = vpop.f32.mrb[238].mxu1 }
 0x573   : > { %v4489_v36 = vpop.f32.mrb[239].mxu0  ;;  %v4601_v37 = vpop.f32.mrb[239].mxu1 }
 0x574   : > { %v3601_v38 = vadd.f32 %v4487_v32, %v6038_v2  ;;  %v4490_v39 = vadd.f32 %v4489_v36, %v4488_v34  ;;  %v4602_v55 = vadd.f32 %v4601_v37, %v4600_v35 }
 0x576   : > { %v3762_v40 = vadd.f32 %v4599_v33, %v3601_v38  ;;  %v3604_v20 = vadd.f32 %v4490_v39, %v6038_v2 }
 0x578   : > { %3902 = vst [vmem:[%s6045_s25 + $0x30] sm:$0xff] %v3762_v40  ;;  %v3765_v59 = vadd.f32 %v4602_v55, %v3604_v20  ;;  %v4491_v41 = vpop.f32.mrb[240].mxu0  ;;  %v4603_v42 = vpop.f32.mrb[240].mxu1 }
 0x579   : > { %v4492_v43 = vpop.f32.mrb[241].mxu0  ;;  %v4604_v44 = vpop.f32.mrb[241].mxu1 }
 0x57a   : > { %3903 = vst [vmem:[%s6045_s25 + $0x38] sm:$0xff] %v3765_v59  ;;  %v4493_v45 = vadd.f32 %v4492_v43, %v4491_v41  ;;  %v4605_v46 = vadd.f32 %v4604_v44, %v4603_v42  ;;  %v4494_v47 = vpop.f32.mrb[242].mxu0  ;;  %v4606_v21 = vpop.f32.mrb[242].mxu1 }
 0x57b   : > { %v4495_v48 = vpop.f32.mrb[243].mxu0  ;;  %v4607_v49 = vpop.f32.mrb[243].mxu1 }
 0x57c   : > { %v3609_v50 = vadd.f32 %v4493_v45, %v6038_v2  ;;  %v4496_v62 = vadd.f32 %v4495_v48, %v4494_v47  ;;  %v4608_v63 = vadd.f32 %v4607_v49, %v4606_v21 }
 0x57e   : > { %v3770_v0 = vadd.f32 %v4605_v46, %v3609_v50  ;;  %v3612_v1 = vadd.f32 %v4496_v62, %v6038_v2 }
 0x580   : > { %3904 = vst [vmem:[%s6045_s25 + $0x40] sm:$0xff] %v3770_v0  ;;  %v3773_v3 = vadd.f32 %v4608_v63, %v3612_v1  ;;  %v4497_v4 = vpop.f32.mrb[244].mxu0  ;;  %v4609_v5 = vpop.f32.mrb[244].mxu1 }
 0x581   : > { %v4498_v52 = vpop.f32.mrb[245].mxu0  ;;  %v4610_v6 = vpop.f32.mrb[245].mxu1 }
 0x582   : > { %3905 = vst [vmem:[%s6045_s25 + $0x48] sm:$0xff] %v3773_v3  ;;  %v4499_v7 = vadd.f32 %v4498_v52, %v4497_v4  ;;  %v4611_v8 = vadd.f32 %v4610_v6, %v4609_v5  ;;  %v4500_v9 = vpop.f32.mrb[246].mxu0  ;;  %v4612_v10 = vpop.f32.mrb[246].mxu1 }
 0x583   : > { %v4501_v11 = vpop.f32.mrb[247].mxu0  ;;  %v4613_v12 = vpop.f32.mrb[247].mxu1 }
 0x584   : > { %v3617_v13 = vadd.f32 %v4499_v7, %v6038_v2  ;;  %v4502_v14 = vadd.f32 %v4501_v11, %v4500_v9  ;;  %v4614_v15 = vadd.f32 %v4613_v12, %v4612_v10 }
 0x586   : > { %v3778_v16 = vadd.f32 %v4611_v8, %v3617_v13  ;;  %v3620_v17 = vadd.f32 %v4502_v14, %v6038_v2 }
 0x588   : > { %3906 = vst [vmem:[%s6045_s25 + $0x50] sm:$0xff] %v3778_v16  ;;  %v3781_v18 = vadd.f32 %v4614_v15, %v3620_v17  ;;  %v4503_v19 = vpop.f32.mrb[248].mxu0  ;;  %v4615_v58 = vpop.f32.mrb[248].mxu1 }
 0x589   : > { %v4504_v60 = vpop.f32.mrb[249].mxu0  ;;  %v4616_v61 = vpop.f32.mrb[249].mxu1 }
 0x58a   : > { %3907 = vst [vmem:[%s6045_s25 + $0x58] sm:$0xff] %v3781_v18  ;;  %v4505_v22 = vadd.f32 %v4504_v60, %v4503_v19  ;;  %v4617_v23 = vadd.f32 %v4616_v61, %v4615_v58  ;;  %v4506_v53 = vpop.f32.mrb[250].mxu0  ;;  %v4618_v24 = vpop.f32.mrb[250].mxu1 }
 0x58b   : > { %v4507_v25 = vpop.f32.mrb[251].mxu0  ;;  %v4619_v54 = vpop.f32.mrb[251].mxu1 }
 0x58c   : > { %v3625_v26 = vadd.f32 %v4505_v22, %v6038_v2  ;;  %v4508_v27 = vadd.f32 %v4507_v25, %v4506_v53  ;;  %v4620_v56 = vadd.f32 %v4619_v54, %v4618_v24 }
 0x58e   : > { %v3786_v51 = vadd.f32 %v4617_v23, %v3625_v26  ;;  %v3628_v57 = vadd.f32 %v4508_v27, %v6038_v2 }
 0x590   : > { %3908 = vst [vmem:[%s6045_s25 + $0x60] sm:$0xff] %v3786_v51  ;;  %v3789_v28 = vadd.f32 %v4620_v56, %v3628_v57  ;;  %v4509_v29 = vpop.f32.mrb[252].mxu0  ;;  %v4621_v30 = vpop.f32.mrb[252].mxu1 }
 0x591   : > { %v4510_v31 = vpop.f32.mrb[253].mxu0  ;;  %v4622_v32 = vpop.f32.mrb[253].mxu1 }
 0x592   : > { %3909 = vst [vmem:[%s6045_s25 + $0x68] sm:$0xff] %v3789_v28  ;;  %v4511_v33 = vadd.f32 %v4510_v31, %v4509_v29  ;;  %v4623_v34 = vadd.f32 %v4622_v32, %v4621_v30  ;;  %v4512_v35 = vpop.f32.mrb[254].mxu0  ;;  %v4624_v36 = vpop.f32.mrb[254].mxu1 }
 0x593   : > { %v4513_v37 = vpop.f32.mrb[255].mxu0  ;;  %v4625_v38 = vpop.f32.mrb[255].mxu1 }
 0x594   : > { %v3633_v39 = vadd.f32 %v4511_v33, %v6038_v2  ;;  %v4514_v55 = vadd.f32 %v4513_v37, %v4512_v35  ;;  %v4626_v40 = vadd.f32 %v4625_v38, %v4624_v36 }
 0x596   : > { %v3794_v20 = vadd.f32 %v4623_v34, %v3633_v39  ;;  %v3636_v59 = vadd.f32 %v4514_v55, %v6038_v2 }
 0x598   : > { %3910 = vst [vmem:[%s6045_s25 + $0x70] sm:$0xff] %v3794_v20  ;;  %v3797_v41 = vadd.f32 %v4626_v40, %v3636_v59  ;;  %v4515_v42 = vpop.f32.mrb[0].mxu0  ;;  %v4627_v43 = vpop.f32.mrb[0].mxu1 }
 0x599   : > { %v4516_v44 = vpop.f32.mrb[1].mxu0  ;;  %v4628_v45 = vpop.f32.mrb[1].mxu1 }
 0x59a   : > { %3911 = vst [vmem:[%s6045_s25 + $0x78] sm:$0xff] %v3797_v41  ;;  %v4517_v46 = vadd.f32 %v4516_v44, %v4515_v42  ;;  %v4629_v47 = vadd.f32 %v4628_v45, %v4627_v43  ;;  %v4518_v21 = vpop.f32.mrb[2].mxu0  ;;  %v4630_v48 = vpop.f32.mrb[2].mxu1 }
 0x59b   : > { %v4519_v49 = vpop.f32.mrb[3].mxu0  ;;  %v4631_v50 = vpop.f32.mrb[3].mxu1 }
 0x59c   : > { %v3641_v62 = vadd.f32 %v4517_v46, %v6038_v2  ;;  %v4520_v63 = vadd.f32 %v4519_v49, %v4518_v21  ;;  %v4632_v0 = vadd.f32 %v4631_v50, %v4630_v48 }
 0x59e   : > { %v3802_v1 = vadd.f32 %v4629_v47, %v3641_v62  ;;  %v3644_v3 = vadd.f32 %v4520_v63, %v6038_v2 }
 0x5a0   : > { %3912 = vst [vmem:[%s6045_s25 + $0x80] sm:$0xff] %v3802_v1  ;;  %v3805_v4 = vadd.f32 %v4632_v0, %v3644_v3  ;;  %v4521_v5 = vpop.f32.mrb[4].mxu0  ;;  %v4633_v52 = vpop.f32.mrb[4].mxu1 }
 0x5a1   : > { %v4522_v6 = vpop.f32.mrb[5].mxu0  ;;  %v4634_v7 = vpop.f32.mrb[5].mxu1 }
 0x5a2   : > { %3913 = vst [vmem:[%s6045_s25 + $0x88] sm:$0xff] %v3805_v4  ;;  %v4523_v8 = vadd.f32 %v4522_v6, %v4521_v5  ;;  %v4635_v9 = vadd.f32 %v4634_v7, %v4633_v52  ;;  %v4524_v10 = vpop.f32.mrb[6].mxu0  ;;  %v4636_v11 = vpop.f32.mrb[6].mxu1 }
 0x5a3   : > { %v4525_v12 = vpop.f32.mrb[7].mxu0  ;;  %v4637_v13 = vpop.f32.mrb[7].mxu1 }
 0x5a4   : > { %v3649_v14 = vadd.f32 %v4523_v8, %v6038_v2  ;;  %v4526_v15 = vadd.f32 %v4525_v12, %v4524_v10  ;;  %v4638_v16 = vadd.f32 %v4637_v13, %v4636_v11 }
 0x5a6   : > { %v3810_v17 = vadd.f32 %v4635_v9, %v3649_v14  ;;  %v3652_v18 = vadd.f32 %v4526_v15, %v6038_v2 }
 0x5a8   : > { %3914 = vst [vmem:[%s6045_s25 + $0x90] sm:$0xff] %v3810_v17  ;;  %v3813_v19 = vadd.f32 %v4638_v16, %v3652_v18  ;;  %v4527_v58 = vpop.f32.mrb[8].mxu0  ;;  %v4639_v60 = vpop.f32.mrb[8].mxu1 }
 0x5a9   : > { %v4528_v61 = vpop.f32.mrb[9].mxu0  ;;  %v4640_v22 = vpop.f32.mrb[9].mxu1 }
 0x5aa   : > { %3915 = vst [vmem:[%s6045_s25 + $0x98] sm:$0xff] %v3813_v19  ;;  %v4529_v23 = vadd.f32 %v4528_v61, %v4527_v58  ;;  %v4641_v53 = vadd.f32 %v4640_v22, %v4639_v60  ;;  %v4530_v24 = vpop.f32.mrb[10].mxu0  ;;  %v4642_v25 = vpop.f32.mrb[10].mxu1 }
 0x5ab   : > { %v4531_v54 = vpop.f32.mrb[11].mxu0  ;;  %v4643_v26 = vpop.f32.mrb[11].mxu1 }
 0x5ac   : > { %v3657_v27 = vadd.f32 %v4529_v23, %v6038_v2  ;;  %v4532_v56 = vadd.f32 %v4531_v54, %v4530_v24  ;;  %v4644_v51 = vadd.f32 %v4643_v26, %v4642_v25 }
 0x5ae   : > { %v3818_v57 = vadd.f32 %v4641_v53, %v3657_v27  ;;  %v3660_v28 = vadd.f32 %v4532_v56, %v6038_v2 }
 0x5b0   : > { %3916 = vst [vmem:[%s6045_s25 + $0xa0] sm:$0xff] %v3818_v57  ;;  %v3821_v29 = vadd.f32 %v4644_v51, %v3660_v28  ;;  %v4533_v30 = vpop.f32.mrb[12].mxu0  ;;  %v4645_v31 = vpop.f32.mrb[12].mxu1 }
 0x5b1   : > { %v4534_v32 = vpop.f32.mrb[13].mxu0  ;;  %v4646_v33 = vpop.f32.mrb[13].mxu1 }
 0x5b2   : > { %3917 = vst [vmem:[%s6045_s25 + $0xa8] sm:$0xff] %v3821_v29  ;;  %v4535_v34 = vadd.f32 %v4534_v32, %v4533_v30  ;;  %v4647_v35 = vadd.f32 %v4646_v33, %v4645_v31  ;;  %v4536_v36 = vpop.f32.mrb[14].mxu0  ;;  %v4648_v37 = vpop.f32.mrb[14].mxu1 }
 0x5b3   : > { %v4537_v38 = vpop.f32.mrb[15].mxu0  ;;  %v4649_v39 = vpop.f32.mrb[15].mxu1 }
 0x5b4   : > { %v3665_v55 = vadd.f32 %v4535_v34, %v6038_v2  ;;  %v4538_v40 = vadd.f32 %v4537_v38, %v4536_v36  ;;  %v4650_v20 = vadd.f32 %v4649_v39, %v4648_v37 }
 0x5b6   : > { %v3826_v59 = vadd.f32 %v4647_v35, %v3665_v55  ;;  %v3668_v41 = vadd.f32 %v4538_v40, %v6038_v2 }
 0x5b8   : > { %3918 = vst [vmem:[%s6045_s25 + $0xb0] sm:$0xff] %v3826_v59  ;;  %v3829_v42 = vadd.f32 %v4650_v20, %v3668_v41  ;;  %v4539_v43 = vpop.f32.mrb[16].mxu0  ;;  %v4651_v44 = vpop.f32.mrb[16].mxu1 }
 0x5b9   : > { %v4540_v45 = vpop.f32.mrb[17].mxu0  ;;  %v4652_v46 = vpop.f32.mrb[17].mxu1 }
 0x5ba   : > { %3919 = vst [vmem:[%s6045_s25 + $0xb8] sm:$0xff] %v3829_v42  ;;  %v4541_v47 = vadd.f32 %v4540_v45, %v4539_v43  ;;  %v4653_v21 = vadd.f32 %v4652_v46, %v4651_v44  ;;  %v4542_v48 = vpop.f32.mrb[18].mxu0  ;;  %v4654_v49 = vpop.f32.mrb[18].mxu1 }
 0x5bb   : > { %v4543_v50 = vpop.f32.mrb[19].mxu0  ;;  %v4655_v62 = vpop.f32.mrb[19].mxu1 }
 0x5bc   : > { %v3673_v63 = vadd.f32 %v4541_v47, %v6038_v2  ;;  %v4544_v0 = vadd.f32 %v4543_v50, %v4542_v48  ;;  %v4656_v1 = vadd.f32 %v4655_v62, %v4654_v49 }
 0x5be   : > { %v3834_v3 = vadd.f32 %v4653_v21, %v3673_v63  ;;  %v3676_v4 = vadd.f32 %v4544_v0, %v6038_v2 }
 0x5c0   : > { %3920 = vst [vmem:[%s6045_s25 + $0xc0] sm:$0xff] %v3834_v3  ;;  %v3837_v5 = vadd.f32 %v4656_v1, %v3676_v4  ;;  %v4545_v52 = vpop.f32.mrb[20].mxu0  ;;  %v4657_v6 = vpop.f32.mrb[20].mxu1 }
 0x5c1   : > { %v4546_v7 = vpop.f32.mrb[21].mxu0  ;;  %v4658_v8 = vpop.f32.mrb[21].mxu1 }
 0x5c2   : > { %3921 = vst [vmem:[%s6045_s25 + $0xc8] sm:$0xff] %v3837_v5  ;;  %v4547_v9 = vadd.f32 %v4546_v7, %v4545_v52  ;;  %v4659_v10 = vadd.f32 %v4658_v8, %v4657_v6  ;;  %v4548_v11 = vpop.f32.mrb[22].mxu0  ;;  %v4660_v12 = vpop.f32.mrb[22].mxu1 }
 0x5c3   : > { %v4549_v13 = vpop.f32.mrb[23].mxu0  ;;  %v4661_v14 = vpop.f32.mrb[23].mxu1 }
 0x5c4   : > { %v3681_v15 = vadd.f32 %v4547_v9, %v6038_v2  ;;  %v4550_v16 = vadd.f32 %v4549_v13, %v4548_v11  ;;  %v4662_v17 = vadd.f32 %v4661_v14, %v4660_v12 }
 0x5c6   : > { %v3842_v18 = vadd.f32 %v4659_v10, %v3681_v15  ;;  %v3684_v19 = vadd.f32 %v4550_v16, %v6038_v2 }
 0x5c8   : > { %3922 = vst [vmem:[%s6045_s25 + $0xd0] sm:$0xff] %v3842_v18  ;;  %v3845_v58 = vadd.f32 %v4662_v17, %v3684_v19  ;;  %v4551_v60 = vpop.f32.mrb[24].mxu0  ;;  %v4663_v61 = vpop.f32.mrb[24].mxu1 }
 0x5c9   : > { %v4552_v22 = vpop.f32.mrb[25].mxu0  ;;  %v4664_v23 = vpop.f32.mrb[25].mxu1 }
 0x5ca   : > { %3923 = vst [vmem:[%s6045_s25 + $0xd8] sm:$0xff] %v3845_v58  ;;  %v4553_v53 = vadd.f32 %v4552_v22, %v4551_v60  ;;  %v4665_v24 = vadd.f32 %v4664_v23, %v4663_v61  ;;  %v4554_v25 = vpop.f32.mrb[26].mxu0  ;;  %v4666_v54 = vpop.f32.mrb[26].mxu1 }
 0x5cb   : > { %v4555_v26 = vpop.f32.mrb[27].mxu0  ;;  %v4667_v27 = vpop.f32.mrb[27].mxu1 }
 0x5cc   : > { %v3689_v56 = vadd.f32 %v4553_v53, %v6038_v2  ;;  %v4556_v51 = vadd.f32 %v4555_v26, %v4554_v25  ;;  %v4668_v57 = vadd.f32 %v4667_v27, %v4666_v54 }
 0x5ce   : > { %v3850_v28 = vadd.f32 %v4665_v24, %v3689_v56  ;;  %v3692_v29 = vadd.f32 %v4556_v51, %v6038_v2 }
 0x5d0   : > { %3924 = vst [vmem:[%s6045_s25 + $0xe0] sm:$0xff] %v3850_v28  ;;  %v3853_v30 = vadd.f32 %v4668_v57, %v3692_v29  ;;  %v4557_v31 = vpop.f32.mrb[28].mxu0  ;;  %v4669_v32 = vpop.f32.mrb[28].mxu1 }
 0x5d1   : > { %v4558_v33 = vpop.f32.mrb[29].mxu0  ;;  %v4670_v34 = vpop.f32.mrb[29].mxu1 }
 0x5d2   : > { %3925 = vst [vmem:[%s6045_s25 + $0xe8] sm:$0xff] %v3853_v30  ;;  %v4559_v35 = vadd.f32 %v4558_v33, %v4557_v31  ;;  %v4671_v36 = vadd.f32 %v4670_v34, %v4669_v32  ;;  %v4560_v37 = vpop.f32.mrb[30].mxu0  ;;  %v4672_v38 = vpop.f32.mrb[30].mxu1 }
 0x5d3   : > { %v4561_v39 = vpop.f32.mrb[31].mxu0  ;;  %v4673_v55 = vpop.f32.mrb[31].mxu1 }
 0x5d4   : > { %v3697_v40 = vadd.f32 %v4559_v35, %v6038_v2  ;;  %v4562_v20 = vadd.f32 %v4561_v39, %v4560_v37  ;;  %v4674_v59 = vadd.f32 %v4673_v55, %v4672_v38 }
 0x5d6   : > { %v3858_v41 = vadd.f32 %v4671_v36, %v3697_v40  ;;  %v3700_v42 = vadd.f32 %v4562_v20, %v6038_v2 }
 0x5d8   : > { %3926 = vst [vmem:[%s6045_s25 + $0xf0] sm:$0xff] %v3858_v41  ;;  %v3861_v43 = vadd.f32 %v4674_v59, %v3700_v42 }
 0x5da   : > { %3927 = vst [vmem:[%s6045_s25 + $0xf8] sm:$0xff] %v3861_v43 }
 0x5db PF: > { %s25_s29 = sadd.s32 1, %s4962_s29  }
 0x5dc   : > { %p22_p4 = scmp.ge.s32.totalorder %s25_s29, 4  }
 0x5de   :  { %24 = sbr.rel (!%p22_p4) target bundleno = 1 (0x1), region = 114 }

</bundles_post_ra>
